<compile_context>
chip_gen: v7x
topology: tpu7x:2x2x1
jax: 0.10.0
libtpu: 0.0.40
codegen_flags: <defaults>
</compile_context>

<pallas_src>
import functools
import math

import jax
import jax.numpy as jnp
from jax import lax
from jax.experimental import pallas as pl
from jax.experimental.pallas import tpu as pltpu


# --------------------------------------------------------------------------
# Pallas kernels
# --------------------------------------------------------------------------

def _mm_kernel(x_ref, w_ref, b_ref, o_ref, acc_ref, *, act):
    """Tiled Y = act(X @ W + b); grid = (M tiles, N tiles, K tiles)."""
    @pl.when(pl.program_id(2) == 0)
    def _():
        acc_ref[...] = jnp.zeros_like(acc_ref)

    acc_ref[...] += jnp.dot(x_ref[...], w_ref[...],
                            preferred_element_type=jnp.float32)

    @pl.when(pl.program_id(2) == pl.num_programs(2) - 1)
    def _():
        y = acc_ref[...] + b_ref[...]          # bias is f32
        if act == "relu":
            y = jnp.maximum(y, 0.0)
        elif act == "gelu":
            # TODO(synk): HF RoBERTa uses exact (erf) GELU; tanh approx here.
            y = jax.nn.gelu(y, approximate=True)
        o_ref[...] = y.astype(o_ref.dtype)


def _mm_ln_kernel(x_ref, w_ref, b_ref, r_ref, g_ref, be_ref, o_ref, acc_ref,
                  *, eps):
    """Y = LayerNorm(X @ W + b + residual); grid = (M tiles, K tiles).

    N is NOT tiled (full hidden row resident) so the LN reduction can run in
    the final-K epilogue -- fuses the residual add and LN into the matmul and
    removes two memory-bound HBM round trips per transformer layer.
    """
    @pl.when(pl.program_id(1) == 0)
    def _():
        acc_ref[...] = jnp.zeros_like(acc_ref)

    acc_ref[...] += jnp.dot(x_ref[...], w_ref[...],
                            preferred_element_type=jnp.float32)

    @pl.when(pl.program_id(1) == pl.num_programs(1) - 1)
    def _():
        x = acc_ref[...] + b_ref[...] + r_ref[...].astype(jnp.float32)
        mu = jnp.mean(x, axis=-1, keepdims=True)
        # one-pass variance: E[x^2] - mu^2
        var = jnp.mean(x * x, axis=-1, keepdims=True) - mu * mu
        y = (x - mu) * lax.rsqrt(var + eps)
        o_ref[...] = (y * g_ref[...] + be_ref[...]).astype(o_ref.dtype)


def _ln_kernel(x_ref, g_ref, b_ref, o_ref, *, eps):
    """Standalone LayerNorm (embedding LN only); f32 math, one-pass variance."""
    x = x_ref[...].astype(jnp.float32)
    mu = jnp.mean(x, axis=-1, keepdims=True)
    var = jnp.mean(x * x, axis=-1, keepdims=True) - mu * mu
    y = (x - mu) * lax.rsqrt(var + eps)
    o_ref[...] = (y * g_ref[...] + b_ref[...]).astype(o_ref.dtype)


def _attn_kernel(q_ref, k_ref, v_ref, m_ref, o_ref, *, G, Dh, scale):
    """One (batch, head-group) grid step of softmax(Q K^T * scale + mask) V.

    q_ref/k_ref/v_ref: (1, S, G*Dh) bf16 -- 128-lane-aligned column blocks of
                       the fused QKV slab, selected by BlockSpec.
    m_ref:             (1, 1, S) f32 additive mask (0 attended, -1e9 padded).
    o_ref:             (1, S, G*Dh) bf16 lane-dense context store.
    """
    addmask = m_ref[0]                     # (1, S) f32, broadcasts over rows
    qg = q_ref[0]                          # (S, G*Dh) bf16
    kg = k_ref[0]
    vg = v_ref[0]

    ctx = []
    for j in range(G):                     # heads within the 128-lane group
        q = qg[:, j * Dh:(j + 1) * Dh]     # (S, Dh) bf16 (static slice)
        k = kg[:, j * Dh:(j + 1) * Dh]
        v = vg[:, j * Dh:(j + 1) * Dh]
        # NT contraction: MXU consumes K without an explicit transpose.
        s = lax.dot_general(q, k, (((1,), (1,)), ((), ())),
                            preferred_element_type=jnp.float32) * scale
        s = s + addmask                    # f32 mask add
        s = s - jnp.max(s, axis=-1, keepdims=True)
        p = jnp.exp(s)
        p = p * pl.reciprocal(jnp.sum(p, axis=-1, keepdims=True), approx=True)
        c = jnp.dot(p.astype(v.dtype), v,
                    preferred_element_type=jnp.float32)          # (S, Dh) f32
        ctx.append(c.astype(o_ref.dtype))  # cast now -> bounded live range
    # Single lane-dense 128-wide (or full-H) unmasked store.
    o_ref[0] = jnp.concatenate(ctx, axis=-1) if G > 1 else ctx[0]


# --------------------------------------------------------------------------
# Tiling helpers
# --------------------------------------------------------------------------

def _tile(dim, prefs=(512, 256, 128)):
    """Largest preferred tile that divides dim; full dim for small shapes."""
    for p in prefs:
        if dim % p == 0:
            return p
    # TODO(synk): large non-128-aligned dims would need cdiv grids + padding.
    assert dim <= 1024, f"un-tileable dimension {dim}"
    return dim


def _vmem_estimate(tm, tn, tk, in_bytes, out_bytes):
    # double-buffered inputs + f32 accumulator + double-buffered output
    return (2 * (tm * tk + tk * tn) * in_bytes
            + tm * tn * 4
            + 2 * tm * tn * out_bytes)


def _fit_tiles(tm, tn, tk, K, N, in_bytes, out_bytes, budget=12 << 20):
    """Shrink K/N tiles toward a conservative scoped-VMEM budget (v5e-safe)."""
    while (_vmem_estimate(tm, tn, tk, in_bytes, out_bytes) > budget
           and tk >= 256 and K % (tk // 2) == 0):
        tk //= 2
    while (_vmem_estimate(tm, tn, tk, in_bytes, out_bytes) > budget
           and tn >= 256 and N % (tn // 2) == 0):
        tn //= 2
    return tn, tk


# --------------------------------------------------------------------------
# Pallas wrappers
# --------------------------------------------------------------------------

def _maybe_cast(a, dt):
    return a if a.dtype == dt else a.astype(dt)


def pallas_matmul(x, w, b=None, act=None, out_dtype=jnp.float32,
                  compute_dtype=jnp.bfloat16):
    """Y = act(x @ w + b).  x:(M,K), w:(K,N), b:(N,).

    Weights / activations are expected to already be in `compute_dtype`
    (pre-cast once at param-prep time) -- no per-call casts on the hot path.
    """
    M, K = x.shape
    K2, N = w.shape
    assert K == K2
    if b is None:
        b = jnp.zeros((N,), jnp.float32)
    b = b.reshape(1, N).astype(jnp.float32)
    x = _maybe_cast(x, compute_dtype)      # no-op when already compute_dtype
    w = _maybe_cast(w, compute_dtype)

    tm, tn, tk = _tile(M), _tile(N), _tile(K)
    # Expose >=2 parallel M tiles for multi-TensorCore parts when possible.
    if M // tm == 1 and tm >= 256 and M % (tm // 2) == 0:
        tm //= 2
    in_b = jnp.dtype(compute_dtype).itemsize
    out_b = jnp.dtype(out_dtype).itemsize
    tn, tk = _fit_tiles(tm, tn, tk, K, N, in_b, out_b)
    est = _vmem_estimate(tm, tn, tk, in_b, out_b)
    vmem_limit = min(2 * est, 64 << 20) if est > (12 << 20) else None

    grid = (M // tm, N // tn, K // tk)
    cost = pl.CostEstimate(
        flops=2 * M * N * K,
        transcendentals=0,
        bytes_accessed=(M * K + K * N) * in_b + M * N * out_b)
    return pl.pallas_call(
        functools.partial(_mm_kernel, act=act),
        out_shape=jax.ShapeDtypeStruct((M, N), out_dtype),
        grid_spec=pltpu.PrefetchScalarGridSpec(
            num_scalar_prefetch=0,
            grid=grid,
            in_specs=[pl.BlockSpec((tm, tk), lambda i, j, k: (i, k)),
                      pl.BlockSpec((tk, tn), lambda i, j, k: (k, j)),
                      pl.BlockSpec((1, tn), lambda i, j, k: (0, j))],
            out_specs=pl.BlockSpec((tm, tn), lambda i, j, k: (i, j)),
            scratch_shapes=[pltpu.VMEM((tm, tn), jnp.float32)]),
        compiler_params=pltpu.CompilerParams(
            dimension_semantics=("parallel", "parallel", "arbitrary"),
            vmem_limit_bytes=vmem_limit),
        cost_estimate=cost,
    )(x, w, b)


def pallas_matmul_ln(x, w, b, res, gamma, beta, eps=1e-5,
                     out_dtype=jnp.bfloat16, compute_dtype=jnp.bfloat16):
    """Y = LayerNorm(x @ w + b + res).  N is kept un-tiled (full hidden row)."""
    M, K = x.shape
    K2, N = w.shape
    assert K == K2 and res.shape == (M, N)
    b = b.reshape(1, N).astype(jnp.float32)
    gamma = gamma.reshape(1, N).astype(jnp.float32)
    beta = beta.reshape(1, N).astype(jnp.float32)
    x = _maybe_cast(x, compute_dtype)
    w = _maybe_cast(w, compute_dtype)

    tm, tk = _tile(M), _tile(K)
    if M // tm == 1 and tm >= 256 and M % (tm // 2) == 0:
        tm //= 2
    in_b = jnp.dtype(compute_dtype).itemsize
    out_b = jnp.dtype(out_dtype).itemsize
    while (_vmem_estimate(tm, N, tk, in_b, out_b) > (12 << 20)
           and tk >= 256 and K % (tk // 2) == 0):
        tk //= 2
    est = _vmem_estimate(tm, N, tk, in_b, out_b)
    vmem_limit = min(2 * est, 64 << 20) if est > (12 << 20) else None

    grid = (M // tm, K // tk)
    cost = pl.CostEstimate(
        flops=2 * M * N * K + 8 * M * N,
        transcendentals=0,
        bytes_accessed=(M * K + K * N + 2 * M * N) * in_b + M * N * out_b)
    row_spec = pl.BlockSpec((tm, N), lambda i, k: (i, 0))
    vec_spec = pl.BlockSpec((1, N), lambda i, k: (0, 0))
    return pl.pallas_call(
        functools.partial(_mm_ln_kernel, eps=eps),
        out_shape=jax.ShapeDtypeStruct((M, N), out_dtype),
        grid_spec=pltpu.PrefetchScalarGridSpec(
            num_scalar_prefetch=0,
            grid=grid,
            in_specs=[pl.BlockSpec((tm, tk), lambda i, k: (i, k)),
                      pl.BlockSpec((tk, N), lambda i, k: (k, 0)),
                      vec_spec,            # bias
                      row_spec,            # residual
                      vec_spec,            # gamma
                      vec_spec],           # beta
            out_specs=row_spec,
            scratch_shapes=[pltpu.VMEM((tm, N), jnp.float32)]),
        compiler_params=pltpu.CompilerParams(
            dimension_semantics=("parallel", "arbitrary"),
            vmem_limit_bytes=vmem_limit),
        cost_estimate=cost,
    )(x, w, b, res, gamma, beta)


def pallas_layernorm(x, gamma, beta, eps=1e-5, out_dtype=jnp.bfloat16):
    """Standalone LayerNorm (embedding LN only)."""
    R, H = x.shape
    tr = _tile(R)
    gamma = gamma.reshape(1, H).astype(jnp.float32)
    beta = beta.reshape(1, H).astype(jnp.float32)
    row_spec = pl.BlockSpec((tr, H), lambda i: (i, 0))
    vec_spec = pl.BlockSpec((1, H), lambda i: (0, 0))
    return pl.pallas_call(
        functools.partial(_ln_kernel, eps=eps),
        out_shape=jax.ShapeDtypeStruct((R, H), out_dtype),
        grid_spec=pltpu.PrefetchScalarGridSpec(
            num_scalar_prefetch=0,
            grid=(R // tr,),
            in_specs=[row_spec, vec_spec, vec_spec],
            out_specs=row_spec),
        compiler_params=pltpu.CompilerParams(
            dimension_semantics=("parallel",)),
    )(x, gamma, beta)


def pallas_attention(qkv, addmask, nH):
    """qkv: (B, S, 3H) bf16 fused projections; addmask: (B, 1, S) f32.

    Grid is (B, head_groups); each head-group is 128 lanes wide (pairs of
    Dh=64 heads at roberta-large geometry), so Q/K/V blocks are 128-aligned
    BlockSpec slices and the context store is lane-dense and unmasked.
    """
    B, S, threeH = qkv.shape
    H = threeH // 3
    Dh = H // nH
    G = 1 if Dh >= 128 else min(nH, 128 // Dh)     # heads per group
    GW = G * Dh                                    # group lane width
    assert nH % G == 0 and H % GW == 0
    assert GW % 128 == 0 or GW == H
    NG = nH // G                                   # head groups
    nblk = H // GW                                 # GW-wide blocks per Q/K/V
    scale = 1.0 / math.sqrt(Dh)
    # TODO(synk): for long sequences (S >~ 512-1024 on v7x's 64 MiB VMEM, or
    # S >= 2048 elsewhere) switch to a KV-blocked flash-style online softmax.
    cost = pl.CostEstimate(
        flops=4 * B * nH * S * S * Dh,
        transcendentals=B * nH * S * S,
        bytes_accessed=(3 * B * S * H + B * S * H) * 2 + B * S * 4)
    gspec = lambda off: pl.BlockSpec((1, S, GW),
                                     lambda b, g, _o=off: (b, 0, _o + g))
    return pl.pallas_call(
        functools.partial(_attn_kernel, G=G, Dh=Dh, scale=scale),
        out_shape=jax.ShapeDtypeStruct((B, S, H), jnp.bfloat16),
        grid_spec=pltpu.PrefetchScalarGridSpec(
            num_scalar_prefetch=0,
            grid=(B, NG),
            in_specs=[gspec(0),            # Q columns of the fused slab
                      gspec(nblk),         # K columns
                      gspec(2 * nblk),     # V columns
                      pl.BlockSpec((1, 1, S), lambda b, g: (b, 0, 0))],
            out_specs=pl.BlockSpec((1, S, GW), lambda b, g: (b, 0, g))),
        compiler_params=pltpu.CompilerParams(
            dimension_semantics=("parallel", "parallel")),
        cost_estimate=cost,
    )(qkv, qkv, qkv, addmask)


# --------------------------------------------------------------------------
# Model (glue in plain JAX; compute in Pallas kernels above)
# --------------------------------------------------------------------------

def _transformer_layer(p, h, addmask, B, S, nH):
    """h: (B*S, H) bf16 hidden states."""
    H = h.shape[1]
    # Fused Q/K/V projection: one pass over h, lane-dense 3H output.
    qkv = pallas_matmul(h, p["wqkv"], p["bqkv"], out_dtype=jnp.bfloat16)
    ctx = pallas_attention(qkv.reshape(B, S, 3 * H), addmask, nH)  # (B,S,H)
    ctx = ctx.reshape(B * S, H)                                    # free reshape
    # Output projection with residual + LayerNorm fused into the epilogue.
    h = pallas_matmul_ln(ctx, p["wo"], p["bo"], h, p["ln1_g"], p["ln1_b"])

    ff = pallas_matmul(h, p["w1"], p["b1"], act="gelu", out_dtype=jnp.bfloat16)
    # FFN down-projection with residual + LayerNorm fused into the epilogue.
    h = pallas_matmul_ln(ff, p["w2"], p["b2"], h, p["ln2_g"], p["ln2_b"])
    return h


def roberta_forward(rp, ids, mask, nH):
    B, S = ids.shape
    H = rp["word_emb"].shape[1]
    # TODO(synk): token-id embedding gather stays in JAX glue (tiny at this size).
    # TODO(synk): real RoBERTa offsets position ids by padding_idx+1.
    h = (rp["word_emb"][ids]
         + rp["pos_emb"][:S][None, :, :]
         + rp["type_emb"][0][None, None, :])
    h = pallas_layernorm(h.reshape(B * S, H), rp["emb_ln_g"], rp["emb_ln_b"])
    # Additive mask: 0 for attended, -1e9 for padded positions (kept in f32).
    addmask = (mask.astype(jnp.float32) - 1.0)[:, None, :] * 1e9   # (B,1,S)
    for layer in rp["layers"]:
        h = _transformer_layer(layer, h, addmask, B, S, nH)
    return h.reshape(B, S, H)  # last_hidden_state (bf16)


def bert_class_forward(params, ids, mask, nH):
    emb = params["embedding"]                       # (20, E)
    E = emb.shape[1]
    pad = jnp.zeros((E,), jnp.float32)
    groups = [
        (1, 9, 12, 17), (1, 8, None, None), (1, 9, 11, 13), (1, 9, 12, 18),
        (1, 9, 11, 14), (1, 9, 11, 15), (1, 9, 12, 19), (0, 2, 4, None),
        (1, 9, 11, 16), (0, 2, 5, None), (0, 2, 6, None), (0, 2, 7, None),
        (0, 3, None, None), (1, 10, None, None),
    ]
    rows = [jnp.concatenate([emb[i] if i is not None else pad for i in g], 0)
            for g in groups]
    project_down = jnp.stack(rows)                  # (14, 4*E)

    # Tiny label-projection MLP kept in f32 compute (negligible cost).
    project_down = pallas_matmul(project_down, params["fc1_w"],
                                 params["fc1_b"], act="relu",
                                 out_dtype=jnp.float32,
                                 compute_dtype=jnp.float32)
    project_down = pallas_matmul(project_down, params["fc2_w"],
                                 params["fc2_b"],
                                 out_dtype=jnp.float32,
                                 compute_dtype=jnp.float32)   # (14, H)
    num_labels, H = project_down.shape
    # Pad the 14-wide projection to 128 lanes -> unmasked stores, 1 K block.
    pd_pad = jnp.pad(project_down.T, ((0, 0), (0, 128 - num_labels)))
    pd_pad = pd_pad.astype(jnp.bfloat16)            # (H, 128) bf16, tiny cast

    hidden = roberta_forward(params["roberta"], ids, mask, nH)   # (B,S,H) bf16
    B, S, _ = hidden.shape
    x = pallas_matmul(hidden.reshape(B * S, H), pd_pad,
                      out_dtype=jnp.float32)                     # (B*S, 128)
    x = x[:, :num_labels]
    # Dropout is identity at inference time.
    return x.reshape(B, S, num_labels)


# --------------------------------------------------------------------------
# Deterministic parameter init (synthetic, scaled-down roberta config).
# Encoder GEMM weights are stored in bf16 ONCE here (no per-call casts).
# --------------------------------------------------------------------------

def init_params(key, *, vocab, max_pos, H, nH, n_layers, I, E):
    keys = iter(jax.random.split(key, 256))

    def w(shape, scale=0.02, dtype=jnp.float32):
        return (scale * jax.random.normal(next(keys), shape)).astype(dtype)

    def zeros(shape):
        return jnp.zeros(shape, jnp.float32)

    def ones(shape):
        return jnp.ones(shape, jnp.float32)

    bf = jnp.bfloat16
    layers = []
    for _ in range(n_layers):
        layers.append(dict(
            wqkv=w((H, 3 * H), dtype=bf), bqkv=zeros((3 * H,)),  # fused q|k|v
            wo=w((H, H), dtype=bf), bo=zeros((H,)),
            ln1_g=ones((H,)), ln1_b=zeros((H,)),
            w1=w((H, I), dtype=bf), b1=zeros((I,)),
            w2=w((I, H), dtype=bf), b2=zeros((H,)),
            ln2_g=ones((H,)), ln2_b=zeros((H,)),
        ))
    roberta = dict(
        word_emb=w((vocab, H)),
        pos_emb=w((max_pos, H)),
        type_emb=w((1, H)),
        emb_ln_g=ones((H,)), emb_ln_b=zeros((H,)),
        layers=layers,
    )
    bound = math.sqrt(1.0 / E)
    params = dict(
        roberta=roberta,
        # torch.nn.init.uniform_(embedding, -sqrt(1/E), sqrt(1/E))
        embedding=jax.random.uniform(next(keys), (20, E), jnp.float32,
                                     -bound, bound),
        fc1_w=w((4 * E, H)), fc1_b=zeros((H,)),
        fc2_w=w((H, H)), fc2_b=zeros((H,)),
    )
    return params


# --------------------------------------------------------------------------

if __name__ == "__main__":
    # Scaled-down config (roberta-large would be H=1024, 24 layers, 16 heads,
    # Dh=64).  Keep Dh=64 so the head-pair (128-lane) attention path is used.
    B, S = 2, 32
    VOCAB, MAX_POS = 128, 64
    H, NH, I, N_LAYERS = 256, 4, 512, 2
    E = 32                       # embedding_size (scaled from 100); 4*E = fc1 in-dim

    key = jax.random.PRNGKey(0)
    kp, kid = jax.random.split(key)
    params = init_params(kp, vocab=VOCAB, max_pos=MAX_POS, H=H, nH=NH,
                         n_layers=N_LAYERS, I=I, E=E)

    ids = jax.random.randint(kid, (B, S), 0, VOCAB, dtype=jnp.int32)
    # attention mask: row 0 fully attended, row 1 has 6 padding positions.
    mask = jnp.ones((B, S), jnp.int32).at[1, S - 6:].set(0)

    fwd = jax.jit(functools.partial(bert_class_forward, nH=NH))
    out = fwd(params, ids, mask)
    out = jax.block_until_ready(out)

    assert out.shape == (B, S, 14), out.shape
    assert jnp.all(jnp.isfinite(out))
    print("KERNEL_OK")
</pallas_src>

<mosaic_0001>
module attributes {stable_mosaic.version = 11 : i64} {
  func.func @_mm_kernel(%arg0: i32, %arg1: i32, %arg2: i32, %arg3: memref<64x256xbf16, #tpu.memory_space<vmem>>, %arg4: memref<256x256xbf16, #tpu.memory_space<vmem>>, %arg5: memref<1x256xf32, #tpu.memory_space<vmem>>, %arg6: memref<64x256xbf16, #tpu.memory_space<vmem>>, %arg7: memref<64x256xf32, #tpu.memory_space<vmem>>) attributes {dimension_semantics = [#tpu.dimension_semantics<parallel>, #tpu.dimension_semantics<parallel>, #tpu.dimension_semantics<arbitrary>], iteration_bounds = array<i64: 1, 3, 1>, scalar_prefetch = 0 : i64, scratch_operands = 1 : i64, tpu.core_type = #tpu.core_type<tc>, window_params = [{transform_indices = @transform_0, window_bounds = array<i64: 64, 256>}, {transform_indices = @transform_1, window_bounds = array<i64: 256, 256>}, {transform_indices = @transform_2, window_bounds = array<i64: 1, 256>}, {transform_indices = @transform_3, window_bounds = array<i64: 64, 256>}]} {
    %c0_i32 = arith.constant 0 : i32
    %0 = arith.cmpi eq, %arg2, %c0_i32 : i32
    %1 = arith.extui %0 : i1 to i32
    %c0_i32_0 = arith.constant 0 : i32
    %2 = arith.cmpi ne, %1, %c0_i32_0 : i32
    scf.if %2 {
      %cst_10 = arith.constant 0.000000e+00 : f32
      %12 = vector.broadcast %cst_10 : f32 to vector<64x256xf32>
      %c0_11 = arith.constant 0 : index
      %c0_12 = arith.constant 0 : index
      %13 = vector.load %arg7[%c0_11, %c0_12] : memref<64x256xf32, #tpu.memory_space<vmem>>, vector<64x256xf32>
      tpu.vector_store %arg7[%c0_11, %c0_12], %12 {strides = array<i32>} : memref<64x256xf32, #tpu.memory_space<vmem>>, vector<64x256xf32>,
    } else {
    }
    %c0 = arith.constant 0 : index
    %c0_1 = arith.constant 0 : index
    %3 = vector.load %arg7[%c0, %c0_1] : memref<64x256xf32, #tpu.memory_space<vmem>>, vector<64x256xf32>
    %c0_2 = arith.constant 0 : index
    %c0_3 = arith.constant 0 : index
    %4 = vector.load %arg3[%c0_2, %c0_3] : memref<64x256xbf16, #tpu.memory_space<vmem>>, vector<64x256xbf16>
    %c0_4 = arith.constant 0 : index
    %c0_5 = arith.constant 0 : index
    %5 = vector.load %arg4[%c0_4, %c0_5] : memref<256x256xbf16, #tpu.memory_space<vmem>>, vector<256x256xbf16>
    %cst = arith.constant dense<0.000000e+00> : vector<64x256xf32>
    %6 = tpu.matmul %4, %5, %cst {dimension_numbers = #tpu.dot_dimension_numbers<[1], [0], [0], [1], [0, 0, 1, 1], [], []>} : vector<64x256xbf16>, vector<256x256xbf16>, vector<64x256xf32> -> vector<64x256xf32>
    %7 = arith.addf %3, %6 : vector<64x256xf32>
    %c0_6 = arith.constant 0 : index
    %c0_7 = arith.constant 0 : index
    %8 = vector.load %arg7[%c0_6, %c0_7] : memref<64x256xf32, #tpu.memory_space<vmem>>, vector<64x256xf32>
    tpu.vector_store %arg7[%c0_6, %c0_7], %7 {strides = array<i32>} : memref<64x256xf32, #tpu.memory_space<vmem>>, vector<64x256xf32>,
    %c0_i32_8 = arith.constant 0 : i32
    %9 = arith.cmpi eq, %arg2, %c0_i32_8 : i32
    %10 = arith.extui %9 : i1 to i32
    %c0_i32_9 = arith.constant 0 : i32
    %11 = arith.cmpi ne, %10, %c0_i32_9 : i32
    scf.if %11 {
      %c0_10 = arith.constant 0 : index
      %c0_11 = arith.constant 0 : index
      %12 = vector.load %arg7[%c0_10, %c0_11] : memref<64x256xf32, #tpu.memory_space<vmem>>, vector<64x256xf32>
      %c0_12 = arith.constant 0 : index
      %c0_13 = arith.constant 0 : index
      %13 = vector.load %arg5[%c0_12, %c0_13] : memref<1x256xf32, #tpu.memory_space<vmem>>, vector<1x256xf32>
      %14 = vector.broadcast %13 : vector<1x256xf32> to vector<64x256xf32>
      %15 = arith.addf %12, %14 : vector<64x256xf32>
      %16 = arith.truncf %15 : vector<64x256xf32> to vector<64x256xbf16>
      %c0_14 = arith.constant 0 : index
      %c0_15 = arith.constant 0 : index
      %17 = vector.load %arg6[%c0_14, %c0_15] : memref<64x256xbf16, #tpu.memory_space<vmem>>, vector<64x256xbf16>
      tpu.vector_store %arg6[%c0_14, %c0_15], %16 {strides = array<i32>} : memref<64x256xbf16, #tpu.memory_space<vmem>>, vector<64x256xbf16>,
    } else {
    }
    return
  }
  func.func @transform_0(%arg0: i32, %arg1: i32, %arg2: i32) -> (i32, i32) {
    %c0_i32 = arith.constant 0 : i32
    return %arg0, %arg2 : i32, i32
  }
  func.func @transform_1(%arg0: i32, %arg1: i32, %arg2: i32) -> (i32, i32) {
    %c0_i32 = arith.constant 0 : i32
    return %arg2, %arg1 : i32, i32
  }
  func.func @transform_2(%arg0: i32, %arg1: i32, %arg2: i32) -> (i32, i32) {
    %c0_i32 = arith.constant 0 : i32
    %c0_i32_0 = arith.constant 0 : i32
    return %c0_i32, %arg1 : i32, i32
  }
  func.func @transform_3(%arg0: i32, %arg1: i32, %arg2: i32) -> (i32, i32) {
    %c0_i32 = arith.constant 0 : i32
    return %arg0, %arg1 : i32, i32
  }
}

module attributes {stable_mosaic.version = 11 : i64} {
  func.func @_ln_kernel(%arg0: i32, %arg1: memref<64x256xf32, #tpu.memory_space<vmem>>, %arg2: memref<1x256xf32, #tpu.memory_space<vmem>>, %arg3: memref<1x256xf32, #tpu.memory_space<vmem>>, %arg4: memref<64x256xbf16, #tpu.memory_space<vmem>>) attributes {dimension_semantics = [#tpu.dimension_semantics<parallel>], iteration_bounds = array<i64: 1>, scalar_prefetch = 0 : i64, scratch_operands = 0 : i64, tpu.core_type = #tpu.core_type<tc>, window_params = [{transform_indices = @transform_0, window_bounds = array<i64: 64, 256>}, {pipeline_mode = #tpu.pipeline_mode<synchronous>, transform_indices = @transform_1, window_bounds = array<i64: 1, 256>}, {pipeline_mode = #tpu.pipeline_mode<synchronous>, transform_indices = @transform_2, window_bounds = array<i64: 1, 256>}, {transform_indices = @transform_3, window_bounds = array<i64: 64, 256>}]} {
    %c0 = arith.constant 0 : index
    %c0_0 = arith.constant 0 : index
    %0 = vector.load %arg1[%c0, %c0_0] : memref<64x256xf32, #tpu.memory_space<vmem>>, vector<64x256xf32>
    %cst = arith.constant dense<0.000000e+00> : vector<64xf32>
    %1 = vector.multi_reduction <add>, %0, %cst [1] : vector<64x256xf32> to vector<64xf32>
    %2 = vector.shape_cast %1 : vector<64xf32> to vector<64x1xf32>
    %cst_1 = arith.constant 2.560000e+02 : f32
    %3 = vector.broadcast %cst_1 : f32 to vector<64x1xf32>
    %4 = arith.divf %2, %3 : vector<64x1xf32>
    %5 = arith.mulf %0, %0 : vector<64x256xf32>
    %cst_2 = arith.constant dense<0.000000e+00> : vector<64xf32>
    %6 = vector.multi_reduction <add>, %5, %cst_2 [1] : vector<64x256xf32> to vector<64xf32>
    %7 = vector.shape_cast %6 : vector<64xf32> to vector<64x1xf32>
    %cst_3 = arith.constant 2.560000e+02 : f32
    %8 = vector.broadcast %cst_3 : f32 to vector<64x1xf32>
    %9 = arith.divf %7, %8 : vector<64x1xf32>
    %10 = arith.mulf %4, %4 : vector<64x1xf32>
    %11 = arith.subf %9, %10 : vector<64x1xf32>
    %12 = vector.broadcast %4 : vector<64x1xf32> to vector<64x256xf32>
    %13 = arith.subf %0, %12 : vector<64x256xf32>
    %cst_4 = arith.constant 9.99999974E-6 : f32
    %14 = vector.broadcast %cst_4 : f32 to vector<64x1xf32>
    %15 = arith.addf %11, %14 : vector<64x1xf32>
    %16 = math.rsqrt %15 : vector<64x1xf32>
    %17 = vector.broadcast %16 : vector<64x1xf32> to vector<64x256xf32>
    %18 = arith.mulf %13, %17 : vector<64x256xf32>
    %c0_5 = arith.constant 0 : index
    %c0_6 = arith.constant 0 : index
    %19 = vector.load %arg2[%c0_5, %c0_6] : memref<1x256xf32, #tpu.memory_space<vmem>>, vector<1x256xf32>
    %20 = vector.broadcast %19 : vector<1x256xf32> to vector<64x256xf32>
    %21 = arith.mulf %18, %20 : vector<64x256xf32>
    %c0_7 = arith.constant 0 : index
    %c0_8 = arith.constant 0 : index
    %22 = vector.load %arg3[%c0_7, %c0_8] : memref<1x256xf32, #tpu.memory_space<vmem>>, vector<1x256xf32>
    %23 = vector.broadcast %22 : vector<1x256xf32> to vector<64x256xf32>
    %24 = arith.addf %21, %23 : vector<64x256xf32>
    %25 = arith.truncf %24 : vector<64x256xf32> to vector<64x256xbf16>
    %c0_9 = arith.constant 0 : index
    %c0_10 = arith.constant 0 : index
    %26 = vector.load %arg4[%c0_9, %c0_10] : memref<64x256xbf16, #tpu.memory_space<vmem>>, vector<64x256xbf16>
    tpu.vector_store %arg4[%c0_9, %c0_10], %25 {strides = array<i32>} : memref<64x256xbf16, #tpu.memory_space<vmem>>, vector<64x256xbf16>,
    return
  }
  func.func @transform_0(%arg0: i32) -> (i32, i32) {
    %c0_i32 = arith.constant 0 : i32
    %c0_i32_0 = arith.constant 0 : i32
    return %arg0, %c0_i32 : i32, i32
  }
  func.func @transform_1(%arg0: i32) -> (i32, i32) {
    %c0_i32 = arith.constant 0 : i32
    %c0_i32_0 = arith.constant 0 : i32
    %c0_i32_1 = arith.constant 0 : i32
    return %c0_i32, %c0_i32_0 : i32, i32
  }
  func.func @transform_2(%arg0: i32) -> (i32, i32) {
    %c0_i32 = arith.constant 0 : i32
    %c0_i32_0 = arith.constant 0 : i32
    %c0_i32_1 = arith.constant 0 : i32
    return %c0_i32, %c0_i32_0 : i32, i32
  }
  func.func @transform_3(%arg0: i32) -> (i32, i32) {
    %c0_i32 = arith.constant 0 : i32
    %c0_i32_0 = arith.constant 0 : i32
    return %arg0, %c0_i32 : i32, i32
  }
}

module attributes {stable_mosaic.version = 11 : i64} {
  func.func @_mm_ln_kernel(%arg0: i32, %arg1: i32, %arg2: memref<64x256xbf16, #tpu.memory_space<vmem>>, %arg3: memref<256x256xbf16, #tpu.memory_space<vmem>>, %arg4: memref<1x256xf32, #tpu.memory_space<vmem>>, %arg5: memref<64x256xbf16, #tpu.memory_space<vmem>>, %arg6: memref<1x256xf32, #tpu.memory_space<vmem>>, %arg7: memref<1x256xf32, #tpu.memory_space<vmem>>, %arg8: memref<64x256xbf16, #tpu.memory_space<vmem>>, %arg9: memref<64x256xf32, #tpu.memory_space<vmem>>) attributes {dimension_semantics = [#tpu.dimension_semantics<parallel>, #tpu.dimension_semantics<arbitrary>], iteration_bounds = array<i64: 1, 1>, scalar_prefetch = 0 : i64, scratch_operands = 1 : i64, tpu.core_type = #tpu.core_type<tc>, window_params = [{transform_indices = @transform_0, window_bounds = array<i64: 64, 256>}, {transform_indices = @transform_1, window_bounds = array<i64: 256, 256>}, {pipeline_mode = #tpu.pipeline_mode<synchronous>, transform_indices = @transform_2, window_bounds = array<i64: 1, 256>}, {transform_indices = @transform_3, window_bounds = array<i64: 64, 256>}, {pipeline_mode = #tpu.pipeline_mode<synchronous>, transform_indices = @transform_4, window_bounds = array<i64: 1, 256>}, {pipeline_mode = #tpu.pipeline_mode<synchronous>, transform_indices = @transform_5, window_bounds = array<i64: 1, 256>}, {transform_indices = @transform_6, window_bounds = array<i64: 64, 256>}]} {
    %c0_i32 = arith.constant 0 : i32
    %0 = arith.cmpi eq, %arg1, %c0_i32 : i32
    %1 = arith.extui %0 : i1 to i32
    %c0_i32_0 = arith.constant 0 : i32
    %2 = arith.cmpi ne, %1, %c0_i32_0 : i32
    scf.if %2 {
      %cst_10 = arith.constant 0.000000e+00 : f32
      %12 = vector.broadcast %cst_10 : f32 to vector<64x256xf32>
      %c0_11 = arith.constant 0 : index
      %c0_12 = arith.constant 0 : index
      %13 = vector.load %arg9[%c0_11, %c0_12] : memref<64x256xf32, #tpu.memory_space<vmem>>, vector<64x256xf32>
      tpu.vector_store %arg9[%c0_11, %c0_12], %12 {strides = array<i32>} : memref<64x256xf32, #tpu.memory_space<vmem>>, vector<64x256xf32>,
    } else {
    }
    %c0 = arith.constant 0 : index
    %c0_1 = arith.constant 0 : index
    %3 = vector.load %arg9[%c0, %c0_1] : memref<64x256xf32, #tpu.memory_space<vmem>>, vector<64x256xf32>
    %c0_2 = arith.constant 0 : index
    %c0_3 = arith.constant 0 : index
    %4 = vector.load %arg2[%c0_2, %c0_3] : memref<64x256xbf16, #tpu.memory_space<vmem>>, vector<64x256xbf16>
    %c0_4 = arith.constant 0 : index
    %c0_5 = arith.constant 0 : index
    %5 = vector.load %arg3[%c0_4, %c0_5] : memref<256x256xbf16, #tpu.memory_space<vmem>>, vector<256x256xbf16>
    %cst = arith.constant dense<0.000000e+00> : vector<64x256xf32>
    %6 = tpu.matmul %4, %5, %cst {dimension_numbers = #tpu.dot_dimension_numbers<[1], [0], [0], [1], [0, 0, 1, 1], [], []>} : vector<64x256xbf16>, vector<256x256xbf16>, vector<64x256xf32> -> vector<64x256xf32>
    %7 = arith.addf %3, %6 : vector<64x256xf32>
    %c0_6 = arith.constant 0 : index
    %c0_7 = arith.constant 0 : index
    %8 = vector.load %arg9[%c0_6, %c0_7] : memref<64x256xf32, #tpu.memory_space<vmem>>, vector<64x256xf32>
    tpu.vector_store %arg9[%c0_6, %c0_7], %7 {strides = array<i32>} : memref<64x256xf32, #tpu.memory_space<vmem>>, vector<64x256xf32>,
    %c0_i32_8 = arith.constant 0 : i32
    %9 = arith.cmpi eq, %arg1, %c0_i32_8 : i32
    %10 = arith.extui %9 : i1 to i32
    %c0_i32_9 = arith.constant 0 : i32
    %11 = arith.cmpi ne, %10, %c0_i32_9 : i32
    scf.if %11 {
      %c0_10 = arith.constant 0 : index
      %c0_11 = arith.constant 0 : index
      %12 = vector.load %arg9[%c0_10, %c0_11] : memref<64x256xf32, #tpu.memory_space<vmem>>, vector<64x256xf32>
      %c0_12 = arith.constant 0 : index
      %c0_13 = arith.constant 0 : index
      %13 = vector.load %arg4[%c0_12, %c0_13] : memref<1x256xf32, #tpu.memory_space<vmem>>, vector<1x256xf32>
      %14 = vector.broadcast %13 : vector<1x256xf32> to vector<64x256xf32>
      %15 = arith.addf %12, %14 : vector<64x256xf32>
      %c0_14 = arith.constant 0 : index
      %c0_15 = arith.constant 0 : index
      %16 = vector.load %arg5[%c0_14, %c0_15] : memref<64x256xbf16, #tpu.memory_space<vmem>>, vector<64x256xbf16>
      %17 = arith.extf %16 : vector<64x256xbf16> to vector<64x256xf32>
      %18 = arith.addf %15, %17 : vector<64x256xf32>
      %cst_16 = arith.constant dense<0.000000e+00> : vector<64xf32>
      %19 = vector.multi_reduction <add>, %18, %cst_16 [1] : vector<64x256xf32> to vector<64xf32>
      %20 = vector.shape_cast %19 : vector<64xf32> to vector<64x1xf32>
      %cst_17 = arith.constant 2.560000e+02 : f32
      %21 = vector.broadcast %cst_17 : f32 to vector<64x1xf32>
      %22 = arith.divf %20, %21 : vector<64x1xf32>
      %23 = arith.mulf %18, %18 : vector<64x256xf32>
      %cst_18 = arith.constant dense<0.000000e+00> : vector<64xf32>
      %24 = vector.multi_reduction <add>, %23, %cst_18 [1] : vector<64x256xf32> to vector<64xf32>
      %25 = vector.shape_cast %24 : vector<64xf32> to vector<64x1xf32>
      %cst_19 = arith.constant 2.560000e+02 : f32
      %26 = vector.broadcast %cst_19 : f32 to vector<64x1xf32>
      %27 = arith.divf %25, %26 : vector<64x1xf32>
      %28 = arith.mulf %22, %22 : vector<64x1xf32>
      %29 = arith.subf %27, %28 : vector<64x1xf32>
      %30 = vector.broadcast %22 : vector<64x1xf32> to vector<64x256xf32>
      %31 = arith.subf %18, %30 : vector<64x256xf32>
      %cst_20 = arith.constant 9.99999974E-6 : f32
      %32 = vector.broadcast %cst_20 : f32 to vector<64x1xf32>
      %33 = arith.addf %29, %32 : vector<64x1xf32>
      %34 = math.rsqrt %33 : vector<64x1xf32>
      %35 = vector.broadcast %34 : vector<64x1xf32> to vector<64x256xf32>
      %36 = arith.mulf %31, %35 : vector<64x256xf32>
      %c0_21 = arith.constant 0 : index
      %c0_22 = arith.constant 0 : index
      %37 = vector.load %arg6[%c0_21, %c0_22] : memref<1x256xf32, #tpu.memory_space<vmem>>, vector<1x256xf32>
      %38 = vector.broadcast %37 : vector<1x256xf32> to vector<64x256xf32>
      %39 = arith.mulf %36, %38 : vector<64x256xf32>
      %c0_23 = arith.constant 0 : index
      %c0_24 = arith.constant 0 : index
      %40 = vector.load %arg7[%c0_23, %c0_24] : memref<1x256xf32, #tpu.memory_space<vmem>>, vector<1x256xf32>
      %41 = vector.broadcast %40 : vector<1x256xf32> to vector<64x256xf32>
      %42 = arith.addf %39, %41 : vector<64x256xf32>
      %43 = arith.truncf %42 : vector<64x256xf32> to vector<64x256xbf16>
      %c0_25 = arith.constant 0 : index
      %c0_26 = arith.constant 0 : index
      %44 = vector.load %arg8[%c0_25, %c0_26] : memref<64x256xbf16, #tpu.memory_space<vmem>>, vector<64x256xbf16>
      tpu.vector_store %arg8[%c0_25, %c0_26], %43 {strides = array<i32>} : memref<64x256xbf16, #tpu.memory_space<vmem>>, vector<64x256xbf16>,
    } else {
    }
    return
  }
  func.func @transform_0(%arg0: i32, %arg1: i32) -> (i32, i32) {
    %c0_i32 = arith.constant 0 : i32
    return %arg0, %arg1 : i32, i32
  }
  func.func @transform_1(%arg0: i32, %arg1: i32) -> (i32, i32) {
    %c0_i32 = arith.constant 0 : i32
    %c0_i32_0 = arith.constant 0 : i32
    return %arg1, %c0_i32 : i32, i32
  }
  func.func @transform_2(%arg0: i32, %arg1: i32) -> (i32, i32) {
    %c0_i32 = arith.constant 0 : i32
    %c0_i32_0 = arith.constant 0 : i32
    %c0_i32_1 = arith.constant 0 : i32
    return %c0_i32, %c0_i32_0 : i32, i32
  }
  func.func @transform_3(%arg0: i32, %arg1: i32) -> (i32, i32) {
    %c0_i32 = arith.constant 0 : i32
    %c0_i32_0 = arith.constant 0 : i32
    return %arg0, %c0_i32 : i32, i32
  }
  func.func @transform_4(%arg0: i32, %arg1: i32) -> (i32, i32) {
    %c0_i32 = arith.constant 0 : i32
    %c0_i32_0 = arith.constant 0 : i32
    %c0_i32_1 = arith.constant 0 : i32
    return %c0_i32, %c0_i32_0 : i32, i32
  }
  func.func @transform_5(%arg0: i32, %arg1: i32) -> (i32, i32) {
    %c0_i32 = arith.constant 0 : i32
    %c0_i32_0 = arith.constant 0 : i32
    %c0_i32_1 = arith.constant 0 : i32
    return %c0_i32, %c0_i32_0 : i32, i32
  }
  func.func @transform_6(%arg0: i32, %arg1: i32) -> (i32, i32) {
    %c0_i32 = arith.constant 0 : i32
    %c0_i32_0 = arith.constant 0 : i32
    return %arg0, %c0_i32 : i32, i32
  }
}

module attributes {stable_mosaic.version = 11 : i64} {
  func.func @_attn_kernel(%arg0: i32, %arg1: i32, %arg2: memref<1x32x128xbf16, #tpu.memory_space<vmem>>, %arg3: memref<1x32x128xbf16, #tpu.memory_space<vmem>>, %arg4: memref<1x32x128xbf16, #tpu.memory_space<vmem>>, %arg5: memref<1x1x32xf32, #tpu.memory_space<vmem>>, %arg6: memref<1x32x128xbf16, #tpu.memory_space<vmem>>) attributes {dimension_semantics = [#tpu.dimension_semantics<parallel>, #tpu.dimension_semantics<parallel>], iteration_bounds = array<i64: 2, 2>, scalar_prefetch = 0 : i64, scratch_operands = 0 : i64, tpu.core_type = #tpu.core_type<tc>, window_params = [{transform_indices = @transform_0, window_bounds = array<i64: 1, 32, 128>}, {transform_indices = @transform_1, window_bounds = array<i64: 1, 32, 128>}, {transform_indices = @transform_2, window_bounds = array<i64: 1, 32, 128>}, {transform_indices = @transform_3, window_bounds = array<i64: 1, 1, 32>}, {transform_indices = @transform_4, window_bounds = array<i64: 1, 32, 128>}]} {
    %c0 = arith.constant 0 : index
    %c0_0 = arith.constant 0 : index
    %c0_1 = arith.constant 0 : index
    %0 = vector.load %arg5[%c0, %c0_0, %c0_1] : memref<1x1x32xf32, #tpu.memory_space<vmem>>, vector<1x1x32xf32>
    %1 = vector.shape_cast %0 : vector<1x1x32xf32> to vector<1x32xf32>
    %c0_2 = arith.constant 0 : index
    %c0_3 = arith.constant 0 : index
    %c0_4 = arith.constant 0 : index
    %2 = vector.load %arg2[%c0_2, %c0_3, %c0_4] : memref<1x32x128xbf16, #tpu.memory_space<vmem>>, vector<1x32x128xbf16>
    %3 = vector.shape_cast %2 : vector<1x32x128xbf16> to vector<32x128xbf16>
    %c0_5 = arith.constant 0 : index
    %c0_6 = arith.constant 0 : index
    %c0_7 = arith.constant 0 : index
    %4 = vector.load %arg3[%c0_5, %c0_6, %c0_7] : memref<1x32x128xbf16, #tpu.memory_space<vmem>>, vector<1x32x128xbf16>
    %5 = vector.shape_cast %4 : vector<1x32x128xbf16> to vector<32x128xbf16>
    %c0_8 = arith.constant 0 : index
    %c0_9 = arith.constant 0 : index
    %c0_10 = arith.constant 0 : index
    %6 = vector.load %arg4[%c0_8, %c0_9, %c0_10] : memref<1x32x128xbf16, #tpu.memory_space<vmem>>, vector<1x32x128xbf16>
    %7 = vector.shape_cast %6 : vector<1x32x128xbf16> to vector<32x128xbf16>
    %8 = vector.extract_strided_slice %3 {offsets = [0, 0], sizes = [32, 64], strides = [1, 1]} : vector<32x128xbf16> to vector<32x64xbf16>
    %9 = vector.extract_strided_slice %5 {offsets = [0, 0], sizes = [32, 64], strides = [1, 1]} : vector<32x128xbf16> to vector<32x64xbf16>
    %10 = vector.extract_strided_slice %7 {offsets = [0, 0], sizes = [32, 64], strides = [1, 1]} : vector<32x128xbf16> to vector<32x64xbf16>
    %cst = arith.constant dense<0.000000e+00> : vector<32x32xf32>
    %11 = tpu.matmul %8, %9, %cst {dimension_numbers = #tpu.dot_dimension_numbers<[1], [1], [0], [0], [0, 0, 1, 0], [], []>} : vector<32x64xbf16>, vector<32x64xbf16>, vector<32x32xf32> -> vector<32x32xf32>
    %cst_11 = arith.constant 1.250000e-01 : f32
    %12 = vector.broadcast %cst_11 : f32 to vector<32x32xf32>
    %13 = arith.mulf %11, %12 : vector<32x32xf32>
    %14 = vector.broadcast %1 : vector<1x32xf32> to vector<32x32xf32>
    %15 = arith.addf %13, %14 : vector<32x32xf32>
    %cst_12 = arith.constant dense<0xFF800000> : vector<32xf32>
    %16 = vector.multi_reduction <maximumf>, %15, %cst_12 [1] : vector<32x32xf32> to vector<32xf32>
    %17 = vector.shape_cast %16 : vector<32xf32> to vector<32x1xf32>
    %18 = vector.broadcast %17 : vector<32x1xf32> to vector<32x32xf32>
    %19 = arith.subf %15, %18 : vector<32x32xf32>
    %20 = math.exp %19 : vector<32x32xf32>
    %cst_13 = arith.constant dense<0.000000e+00> : vector<32xf32>
    %21 = vector.multi_reduction <add>, %20, %cst_13 [1] : vector<32x32xf32> to vector<32xf32>
    %22 = vector.shape_cast %21 : vector<32xf32> to vector<32x1xf32>
    %23 = tpu.reciprocal %22 {approx = true} : vector<32x1xf32> -> vector<32x1xf32>
    %24 = vector.broadcast %23 : vector<32x1xf32> to vector<32x32xf32>
    %25 = arith.mulf %20, %24 : vector<32x32xf32>
    %26 = arith.truncf %25 : vector<32x32xf32> to vector<32x32xbf16>
    %cst_14 = arith.constant dense<0.000000e+00> : vector<32x64xf32>
    %27 = tpu.matmul %26, %10, %cst_14 {dimension_numbers = #tpu.dot_dimension_numbers<[1], [0], [0], [1], [0, 0, 1, 1], [], []>} : vector<32x32xbf16>, vector<32x64xbf16>, vector<32x64xf32> -> vector<32x64xf32>
    %28 = arith.truncf %27 : vector<32x64xf32> to vector<32x64xbf16>
    %29 = vector.extract_strided_slice %3 {offsets = [0, 64], sizes = [32, 64], strides = [1, 1]} : vector<32x128xbf16> to vector<32x64xbf16>
    %30 = vector.extract_strided_slice %5 {offsets = [0, 64], sizes = [32, 64], strides = [1, 1]} : vector<32x128xbf16> to vector<32x64xbf16>
    %31 = vector.extract_strided_slice %7 {offsets = [0, 64], sizes = [32, 64], strides = [1, 1]} : vector<32x128xbf16> to vector<32x64xbf16>
    %cst_15 = arith.constant dense<0.000000e+00> : vector<32x32xf32>
    %32 = tpu.matmul %29, %30, %cst_15 {dimension_numbers = #tpu.dot_dimension_numbers<[1], [1], [0], [0], [0, 0, 1, 0], [], []>} : vector<32x64xbf16>, vector<32x64xbf16>, vector<32x32xf32> -> vector<32x32xf32>
    %cst_16 = arith.constant 1.250000e-01 : f32
    %33 = vector.broadcast %cst_16 : f32 to vector<32x32xf32>
    %34 = arith.mulf %32, %33 : vector<32x32xf32>
    %35 = vector.broadcast %1 : vector<1x32xf32> to vector<32x32xf32>
    %36 = arith.addf %34, %35 : vector<32x32xf32>
    %cst_17 = arith.constant dense<0xFF800000> : vector<32xf32>
    %37 = vector.multi_reduction <maximumf>, %36, %cst_17 [1] : vector<32x32xf32> to vector<32xf32>
    %38 = vector.shape_cast %37 : vector<32xf32> to vector<32x1xf32>
    %39 = vector.broadcast %38 : vector<32x1xf32> to vector<32x32xf32>
    %40 = arith.subf %36, %39 : vector<32x32xf32>
    %41 = math.exp %40 : vector<32x32xf32>
    %cst_18 = arith.constant dense<0.000000e+00> : vector<32xf32>
    %42 = vector.multi_reduction <add>, %41, %cst_18 [1] : vector<32x32xf32> to vector<32xf32>
    %43 = vector.shape_cast %42 : vector<32xf32> to vector<32x1xf32>
    %44 = tpu.reciprocal %43 {approx = true} : vector<32x1xf32> -> vector<32x1xf32>
    %45 = vector.broadcast %44 : vector<32x1xf32> to vector<32x32xf32>
    %46 = arith.mulf %41, %45 : vector<32x32xf32>
    %47 = arith.truncf %46 : vector<32x32xf32> to vector<32x32xbf16>
    %cst_19 = arith.constant dense<0.000000e+00> : vector<32x64xf32>
    %48 = tpu.matmul %47, %31, %cst_19 {dimension_numbers = #tpu.dot_dimension_numbers<[1], [0], [0], [1], [0, 0, 1, 1], [], []>} : vector<32x32xbf16>, vector<32x64xbf16>, vector<32x64xf32> -> vector<32x64xf32>
    %49 = arith.truncf %48 : vector<32x64xf32> to vector<32x64xbf16>
    %50 = tpu.concatenate %28, %49 in 1 : vector<32x64xbf16>, vector<32x64xbf16> -> vector<32x128xbf16>
    %c0_20 = arith.constant 0 : index
    %c0_21 = arith.constant 0 : index
    %c0_22 = arith.constant 0 : index
    %51 = vector.load %arg6[%c0_20, %c0_21, %c0_22] : memref<1x32x128xbf16, #tpu.memory_space<vmem>>, vector<1x32x128xbf16>
    %52 = vector.shape_cast %51 : vector<1x32x128xbf16> to vector<32x128xbf16>
    %53 = vector.shape_cast %50 : vector<32x128xbf16> to vector<1x32x128xbf16>
    tpu.vector_store %arg6[%c0_20, %c0_21, %c0_22], %53 {strides = array<i32>} : memref<1x32x128xbf16, #tpu.memory_space<vmem>>, vector<1x32x128xbf16>,
    return
  }
  func.func @transform_0(%arg0: i32, %arg1: i32) -> (i32, i32, i32) {
    %c0_i32 = arith.constant 0 : i32
    %0 = arith.addi %c0_i32, %arg1 : i32
    %c0_i32_0 = arith.constant 0 : i32
    %c0_i32_1 = arith.constant 0 : i32
    return %arg0, %c0_i32_0, %0 : i32, i32, i32
  }
  func.func @transform_1(%arg0: i32, %arg1: i32) -> (i32, i32, i32) {
    %c2_i32 = arith.constant 2 : i32
    %0 = arith.addi %c2_i32, %arg1 : i32
    %c0_i32 = arith.constant 0 : i32
    %c0_i32_0 = arith.constant 0 : i32
    return %arg0, %c0_i32, %0 : i32, i32, i32
  }
  func.func @transform_2(%arg0: i32, %arg1: i32) -> (i32, i32, i32) {
    %c4_i32 = arith.constant 4 : i32
    %0 = arith.addi %c4_i32, %arg1 : i32
    %c0_i32 = arith.constant 0 : i32
    %c0_i32_0 = arith.constant 0 : i32
    return %arg0, %c0_i32, %0 : i32, i32, i32
  }
  func.func @transform_3(%arg0: i32, %arg1: i32) -> (i32, i32, i32) {
    %c0_i32 = arith.constant 0 : i32
    %c0_i32_0 = arith.constant 0 : i32
    %c0_i32_1 = arith.constant 0 : i32
    return %arg0, %c0_i32, %c0_i32_0 : i32, i32, i32
  }
  func.func @transform_4(%arg0: i32, %arg1: i32) -> (i32, i32, i32) {
    %c0_i32 = arith.constant 0 : i32
    %c0_i32_0 = arith.constant 0 : i32
    return %arg0, %c0_i32, %arg1 : i32, i32, i32
  }
}

module attributes {stable_mosaic.version = 11 : i64} {
  func.func @_mm_kernel(%arg0: i32, %arg1: i32, %arg2: i32, %arg3: memref<64x256xbf16, #tpu.memory_space<vmem>>, %arg4: memref<256x512xbf16, #tpu.memory_space<vmem>>, %arg5: memref<1x512xf32, #tpu.memory_space<vmem>>, %arg6: memref<64x512xbf16, #tpu.memory_space<vmem>>, %arg7: memref<64x512xf32, #tpu.memory_space<vmem>>) attributes {dimension_semantics = [#tpu.dimension_semantics<parallel>, #tpu.dimension_semantics<parallel>, #tpu.dimension_semantics<arbitrary>], iteration_bounds = array<i64: 1, 1, 1>, scalar_prefetch = 0 : i64, scratch_operands = 1 : i64, tpu.core_type = #tpu.core_type<tc>, window_params = [{transform_indices = @transform_0, window_bounds = array<i64: 64, 256>}, {transform_indices = @transform_1, window_bounds = array<i64: 256, 512>}, {transform_indices = @transform_2, window_bounds = array<i64: 1, 512>}, {transform_indices = @transform_3, window_bounds = array<i64: 64, 512>}]} {
    %c0_i32 = arith.constant 0 : i32
    %0 = arith.cmpi eq, %arg2, %c0_i32 : i32
    %1 = arith.extui %0 : i1 to i32
    %c0_i32_0 = arith.constant 0 : i32
    %2 = arith.cmpi ne, %1, %c0_i32_0 : i32
    scf.if %2 {
      %cst_10 = arith.constant 0.000000e+00 : f32
      %12 = vector.broadcast %cst_10 : f32 to vector<64x512xf32>
      %c0_11 = arith.constant 0 : index
      %c0_12 = arith.constant 0 : index
      %13 = vector.load %arg7[%c0_11, %c0_12] : memref<64x512xf32, #tpu.memory_space<vmem>>, vector<64x512xf32>
      tpu.vector_store %arg7[%c0_11, %c0_12], %12 {strides = array<i32>} : memref<64x512xf32, #tpu.memory_space<vmem>>, vector<64x512xf32>,
    } else {
    }
    %c0 = arith.constant 0 : index
    %c0_1 = arith.constant 0 : index
    %3 = vector.load %arg7[%c0, %c0_1] : memref<64x512xf32, #tpu.memory_space<vmem>>, vector<64x512xf32>
    %c0_2 = arith.constant 0 : index
    %c0_3 = arith.constant 0 : index
    %4 = vector.load %arg3[%c0_2, %c0_3] : memref<64x256xbf16, #tpu.memory_space<vmem>>, vector<64x256xbf16>
    %c0_4 = arith.constant 0 : index
    %c0_5 = arith.constant 0 : index
    %5 = vector.load %arg4[%c0_4, %c0_5] : memref<256x512xbf16, #tpu.memory_space<vmem>>, vector<256x512xbf16>
    %cst = arith.constant dense<0.000000e+00> : vector<64x512xf32>
    %6 = tpu.matmul %4, %5, %cst {dimension_numbers = #tpu.dot_dimension_numbers<[1], [0], [0], [1], [0, 0, 1, 1], [], []>} : vector<64x256xbf16>, vector<256x512xbf16>, vector<64x512xf32> -> vector<64x512xf32>
    %7 = arith.addf %3, %6 : vector<64x512xf32>
    %c0_6 = arith.constant 0 : index
    %c0_7 = arith.constant 0 : index
    %8 = vector.load %arg7[%c0_6, %c0_7] : memref<64x512xf32, #tpu.memory_space<vmem>>, vector<64x512xf32>
    tpu.vector_store %arg7[%c0_6, %c0_7], %7 {strides = array<i32>} : memref<64x512xf32, #tpu.memory_space<vmem>>, vector<64x512xf32>,
    %c0_i32_8 = arith.constant 0 : i32
    %9 = arith.cmpi eq, %arg2, %c0_i32_8 : i32
    %10 = arith.extui %9 : i1 to i32
    %c0_i32_9 = arith.constant 0 : i32
    %11 = arith.cmpi ne, %10, %c0_i32_9 : i32
    scf.if %11 {
      %c0_10 = arith.constant 0 : index
      %c0_11 = arith.constant 0 : index
      %12 = vector.load %arg7[%c0_10, %c0_11] : memref<64x512xf32, #tpu.memory_space<vmem>>, vector<64x512xf32>
      %c0_12 = arith.constant 0 : index
      %c0_13 = arith.constant 0 : index
      %13 = vector.load %arg5[%c0_12, %c0_13] : memref<1x512xf32, #tpu.memory_space<vmem>>, vector<1x512xf32>
      %14 = vector.broadcast %13 : vector<1x512xf32> to vector<64x512xf32>
      %15 = arith.addf %12, %14 : vector<64x512xf32>
      %16 = arith.mulf %15, %15 : vector<64x512xf32>
      %17 = arith.mulf %15, %16 : vector<64x512xf32>
      %cst_14 = arith.constant 4.471500e-02 : f32
      %18 = vector.broadcast %cst_14 : f32 to vector<64x512xf32>
      %19 = arith.mulf %18, %17 : vector<64x512xf32>
      %20 = arith.addf %15, %19 : vector<64x512xf32>
      %cst_15 = arith.constant 0.797884583 : f32
      %21 = vector.broadcast %cst_15 : f32 to vector<64x512xf32>
      %22 = arith.mulf %21, %20 : vector<64x512xf32>
      %23 = math.tanh %22 : vector<64x512xf32>
      %cst_16 = arith.constant 1.000000e+00 : f32
      %24 = vector.broadcast %cst_16 : f32 to vector<64x512xf32>
      %25 = arith.addf %24, %23 : vector<64x512xf32>
      %cst_17 = arith.constant 5.000000e-01 : f32
      %26 = vector.broadcast %cst_17 : f32 to vector<64x512xf32>
      %27 = arith.mulf %26, %25 : vector<64x512xf32>
      %28 = arith.mulf %15, %27 : vector<64x512xf32>
      %29 = arith.truncf %28 : vector<64x512xf32> to vector<64x512xbf16>
      %c0_18 = arith.constant 0 : index
      %c0_19 = arith.constant 0 : index
      %30 = vector.load %arg6[%c0_18, %c0_19] : memref<64x512xbf16, #tpu.memory_space<vmem>>, vector<64x512xbf16>
      tpu.vector_store %arg6[%c0_18, %c0_19], %29 {strides = array<i32>} : memref<64x512xbf16, #tpu.memory_space<vmem>>, vector<64x512xbf16>,
    } else {
    }
    return
  }
  func.func @transform_0(%arg0: i32, %arg1: i32, %arg2: i32) -> (i32, i32) {
    %c0_i32 = arith.constant 0 : i32
    return %arg0, %arg2 : i32, i32
  }
  func.func @transform_1(%arg0: i32, %arg1: i32, %arg2: i32) -> (i32, i32) {
    %c0_i32 = arith.constant 0 : i32
    return %arg2, %arg1 : i32, i32
  }
  func.func @transform_2(%arg0: i32, %arg1: i32, %arg2: i32) -> (i32, i32) {
    %c0_i32 = arith.constant 0 : i32
    %c0_i32_0 = arith.constant 0 : i32
    return %c0_i32, %arg1 : i32, i32
  }
  func.func @transform_3(%arg0: i32, %arg1: i32, %arg2: i32) -> (i32, i32) {
    %c0_i32 = arith.constant 0 : i32
    return %arg0, %arg1 : i32, i32
  }
}

module attributes {stable_mosaic.version = 11 : i64} {
  func.func @_mm_ln_kernel(%arg0: i32, %arg1: i32, %arg2: memref<64x512xbf16, #tpu.memory_space<vmem>>, %arg3: memref<512x256xbf16, #tpu.memory_space<vmem>>, %arg4: memref<1x256xf32, #tpu.memory_space<vmem>>, %arg5: memref<64x256xbf16, #tpu.memory_space<vmem>>, %arg6: memref<1x256xf32, #tpu.memory_space<vmem>>, %arg7: memref<1x256xf32, #tpu.memory_space<vmem>>, %arg8: memref<64x256xbf16, #tpu.memory_space<vmem>>, %arg9: memref<64x256xf32, #tpu.memory_space<vmem>>) attributes {dimension_semantics = [#tpu.dimension_semantics<parallel>, #tpu.dimension_semantics<arbitrary>], iteration_bounds = array<i64: 1, 1>, scalar_prefetch = 0 : i64, scratch_operands = 1 : i64, tpu.core_type = #tpu.core_type<tc>, window_params = [{transform_indices = @transform_0, window_bounds = array<i64: 64, 512>}, {transform_indices = @transform_1, window_bounds = array<i64: 512, 256>}, {pipeline_mode = #tpu.pipeline_mode<synchronous>, transform_indices = @transform_2, window_bounds = array<i64: 1, 256>}, {transform_indices = @transform_3, window_bounds = array<i64: 64, 256>}, {pipeline_mode = #tpu.pipeline_mode<synchronous>, transform_indices = @transform_4, window_bounds = array<i64: 1, 256>}, {pipeline_mode = #tpu.pipeline_mode<synchronous>, transform_indices = @transform_5, window_bounds = array<i64: 1, 256>}, {transform_indices = @transform_6, window_bounds = array<i64: 64, 256>}]} {
    %c0_i32 = arith.constant 0 : i32
    %0 = arith.cmpi eq, %arg1, %c0_i32 : i32
    %1 = arith.extui %0 : i1 to i32
    %c0_i32_0 = arith.constant 0 : i32
    %2 = arith.cmpi ne, %1, %c0_i32_0 : i32
    scf.if %2 {
      %cst_10 = arith.constant 0.000000e+00 : f32
      %12 = vector.broadcast %cst_10 : f32 to vector<64x256xf32>
      %c0_11 = arith.constant 0 : index
      %c0_12 = arith.constant 0 : index
      %13 = vector.load %arg9[%c0_11, %c0_12] : memref<64x256xf32, #tpu.memory_space<vmem>>, vector<64x256xf32>
      tpu.vector_store %arg9[%c0_11, %c0_12], %12 {strides = array<i32>} : memref<64x256xf32, #tpu.memory_space<vmem>>, vector<64x256xf32>,
    } else {
    }
    %c0 = arith.constant 0 : index
    %c0_1 = arith.constant 0 : index
    %3 = vector.load %arg9[%c0, %c0_1] : memref<64x256xf32, #tpu.memory_space<vmem>>, vector<64x256xf32>
    %c0_2 = arith.constant 0 : index
    %c0_3 = arith.constant 0 : index
    %4 = vector.load %arg2[%c0_2, %c0_3] : memref<64x512xbf16, #tpu.memory_space<vmem>>, vector<64x512xbf16>
    %c0_4 = arith.constant 0 : index
    %c0_5 = arith.constant 0 : index
    %5 = vector.load %arg3[%c0_4, %c0_5] : memref<512x256xbf16, #tpu.memory_space<vmem>>, vector<512x256xbf16>
    %cst = arith.constant dense<0.000000e+00> : vector<64x256xf32>
    %6 = tpu.matmul %4, %5, %cst {dimension_numbers = #tpu.dot_dimension_numbers<[1], [0], [0], [1], [0, 0, 1, 1], [], []>} : vector<64x512xbf16>, vector<512x256xbf16>, vector<64x256xf32> -> vector<64x256xf32>
    %7 = arith.addf %3, %6 : vector<64x256xf32>
    %c0_6 = arith.constant 0 : index
    %c0_7 = arith.constant 0 : index
    %8 = vector.load %arg9[%c0_6, %c0_7] : memref<64x256xf32, #tpu.memory_space<vmem>>, vector<64x256xf32>
    tpu.vector_store %arg9[%c0_6, %c0_7], %7 {strides = array<i32>} : memref<64x256xf32, #tpu.memory_space<vmem>>, vector<64x256xf32>,
    %c0_i32_8 = arith.constant 0 : i32
    %9 = arith.cmpi eq, %arg1, %c0_i32_8 : i32
    %10 = arith.extui %9 : i1 to i32
    %c0_i32_9 = arith.constant 0 : i32
    %11 = arith.cmpi ne, %10, %c0_i32_9 : i32
    scf.if %11 {
      %c0_10 = arith.constant 0 : index
      %c0_11 = arith.constant 0 : index
      %12 = vector.load %arg9[%c0_10, %c0_11] : memref<64x256xf32, #tpu.memory_space<vmem>>, vector<64x256xf32>
      %c0_12 = arith.constant 0 : index
      %c0_13 = arith.constant 0 : index
      %13 = vector.load %arg4[%c0_12, %c0_13] : memref<1x256xf32, #tpu.memory_space<vmem>>, vector<1x256xf32>
      %14 = vector.broadcast %13 : vector<1x256xf32> to vector<64x256xf32>
      %15 = arith.addf %12, %14 : vector<64x256xf32>
      %c0_14 = arith.constant 0 : index
      %c0_15 = arith.constant 0 : index
      %16 = vector.load %arg5[%c0_14, %c0_15] : memref<64x256xbf16, #tpu.memory_space<vmem>>, vector<64x256xbf16>
      %17 = arith.extf %16 : vector<64x256xbf16> to vector<64x256xf32>
      %18 = arith.addf %15, %17 : vector<64x256xf32>
      %cst_16 = arith.constant dense<0.000000e+00> : vector<64xf32>
      %19 = vector.multi_reduction <add>, %18, %cst_16 [1] : vector<64x256xf32> to vector<64xf32>
      %20 = vector.shape_cast %19 : vector<64xf32> to vector<64x1xf32>
      %cst_17 = arith.constant 2.560000e+02 : f32
      %21 = vector.broadcast %cst_17 : f32 to vector<64x1xf32>
      %22 = arith.divf %20, %21 : vector<64x1xf32>
      %23 = arith.mulf %18, %18 : vector<64x256xf32>
      %cst_18 = arith.constant dense<0.000000e+00> : vector<64xf32>
      %24 = vector.multi_reduction <add>, %23, %cst_18 [1] : vector<64x256xf32> to vector<64xf32>
      %25 = vector.shape_cast %24 : vector<64xf32> to vector<64x1xf32>
      %cst_19 = arith.constant 2.560000e+02 : f32
      %26 = vector.broadcast %cst_19 : f32 to vector<64x1xf32>
      %27 = arith.divf %25, %26 : vector<64x1xf32>
      %28 = arith.mulf %22, %22 : vector<64x1xf32>
      %29 = arith.subf %27, %28 : vector<64x1xf32>
      %30 = vector.broadcast %22 : vector<64x1xf32> to vector<64x256xf32>
      %31 = arith.subf %18, %30 : vector<64x256xf32>
      %cst_20 = arith.constant 9.99999974E-6 : f32
      %32 = vector.broadcast %cst_20 : f32 to vector<64x1xf32>
      %33 = arith.addf %29, %32 : vector<64x1xf32>
      %34 = math.rsqrt %33 : vector<64x1xf32>
      %35 = vector.broadcast %34 : vector<64x1xf32> to vector<64x256xf32>
      %36 = arith.mulf %31, %35 : vector<64x256xf32>
      %c0_21 = arith.constant 0 : index
      %c0_22 = arith.constant 0 : index
      %37 = vector.load %arg6[%c0_21, %c0_22] : memref<1x256xf32, #tpu.memory_space<vmem>>, vector<1x256xf32>
      %38 = vector.broadcast %37 : vector<1x256xf32> to vector<64x256xf32>
      %39 = arith.mulf %36, %38 : vector<64x256xf32>
      %c0_23 = arith.constant 0 : index
      %c0_24 = arith.constant 0 : index
      %40 = vector.load %arg7[%c0_23, %c0_24] : memref<1x256xf32, #tpu.memory_space<vmem>>, vector<1x256xf32>
      %41 = vector.broadcast %40 : vector<1x256xf32> to vector<64x256xf32>
      %42 = arith.addf %39, %41 : vector<64x256xf32>
      %43 = arith.truncf %42 : vector<64x256xf32> to vector<64x256xbf16>
      %c0_25 = arith.constant 0 : index
      %c0_26 = arith.constant 0 : index
      %44 = vector.load %arg8[%c0_25, %c0_26] : memref<64x256xbf16, #tpu.memory_space<vmem>>, vector<64x256xbf16>
      tpu.vector_store %arg8[%c0_25, %c0_26], %43 {strides = array<i32>} : memref<64x256xbf16, #tpu.memory_space<vmem>>, vector<64x256xbf16>,
    } else {
    }
    return
  }
  func.func @transform_0(%arg0: i32, %arg1: i32) -> (i32, i32) {
    %c0_i32 = arith.constant 0 : i32
    return %arg0, %arg1 : i32, i32
  }
  func.func @transform_1(%arg0: i32, %arg1: i32) -> (i32, i32) {
    %c0_i32 = arith.constant 0 : i32
    %c0_i32_0 = arith.constant 0 : i32
    return %arg1, %c0_i32 : i32, i32
  }
  func.func @transform_2(%arg0: i32, %arg1: i32) -> (i32, i32) {
    %c0_i32 = arith.constant 0 : i32
    %c0_i32_0 = arith.constant 0 : i32
    %c0_i32_1 = arith.constant 0 : i32
    return %c0_i32, %c0_i32_0 : i32, i32
  }
  func.func @transform_3(%arg0: i32, %arg1: i32) -> (i32, i32) {
    %c0_i32 = arith.constant 0 : i32
    %c0_i32_0 = arith.constant 0 : i32
    return %arg0, %c0_i32 : i32, i32
  }
  func.func @transform_4(%arg0: i32, %arg1: i32) -> (i32, i32) {
    %c0_i32 = arith.constant 0 : i32
    %c0_i32_0 = arith.constant 0 : i32
    %c0_i32_1 = arith.constant 0 : i32
    return %c0_i32, %c0_i32_0 : i32, i32
  }
  func.func @transform_5(%arg0: i32, %arg1: i32) -> (i32, i32) {
    %c0_i32 = arith.constant 0 : i32
    %c0_i32_0 = arith.constant 0 : i32
    %c0_i32_1 = arith.constant 0 : i32
    return %c0_i32, %c0_i32_0 : i32, i32
  }
  func.func @transform_6(%arg0: i32, %arg1: i32) -> (i32, i32) {
    %c0_i32 = arith.constant 0 : i32
    %c0_i32_0 = arith.constant 0 : i32
    return %arg0, %c0_i32 : i32, i32
  }
}

module attributes {stable_mosaic.version = 11 : i64} {
  func.func @_mm_kernel(%arg0: i32, %arg1: i32, %arg2: i32, %arg3: memref<14x256xf32, #tpu.memory_space<vmem>>, %arg4: memref<256x256xf32, #tpu.memory_space<vmem>>, %arg5: memref<1x256xf32, #tpu.memory_space<vmem>>, %arg6: memref<14x256xf32, #tpu.memory_space<vmem>>, %arg7: memref<14x256xf32, #tpu.memory_space<vmem>>) attributes {dimension_semantics = [#tpu.dimension_semantics<parallel>, #tpu.dimension_semantics<parallel>, #tpu.dimension_semantics<arbitrary>], iteration_bounds = array<i64: 1, 1, 1>, scalar_prefetch = 0 : i64, scratch_operands = 1 : i64, tpu.core_type = #tpu.core_type<tc>, window_params = [{transform_indices = @transform_0, window_bounds = array<i64: 14, 256>}, {transform_indices = @transform_1, window_bounds = array<i64: 256, 256>}, {transform_indices = @transform_2, window_bounds = array<i64: 1, 256>}, {transform_indices = @transform_3, window_bounds = array<i64: 14, 256>}]} {
    %c0_i32 = arith.constant 0 : i32
    %0 = arith.cmpi eq, %arg2, %c0_i32 : i32
    %1 = arith.extui %0 : i1 to i32
    %c0_i32_0 = arith.constant 0 : i32
    %2 = arith.cmpi ne, %1, %c0_i32_0 : i32
    scf.if %2 {
      %cst_10 = arith.constant 0.000000e+00 : f32
      %12 = vector.broadcast %cst_10 : f32 to vector<14x256xf32>
      %c0_11 = arith.constant 0 : index
      %c0_12 = arith.constant 0 : index
      %13 = vector.load %arg7[%c0_11, %c0_12] : memref<14x256xf32, #tpu.memory_space<vmem>>, vector<14x256xf32>
      tpu.vector_store %arg7[%c0_11, %c0_12], %12 {strides = array<i32>} : memref<14x256xf32, #tpu.memory_space<vmem>>, vector<14x256xf32>,
    } else {
    }
    %c0 = arith.constant 0 : index
    %c0_1 = arith.constant 0 : index
    %3 = vector.load %arg7[%c0, %c0_1] : memref<14x256xf32, #tpu.memory_space<vmem>>, vector<14x256xf32>
    %c0_2 = arith.constant 0 : index
    %c0_3 = arith.constant 0 : index
    %4 = vector.load %arg3[%c0_2, %c0_3] : memref<14x256xf32, #tpu.memory_space<vmem>>, vector<14x256xf32>
    %c0_4 = arith.constant 0 : index
    %c0_5 = arith.constant 0 : index
    %5 = vector.load %arg4[%c0_4, %c0_5] : memref<256x256xf32, #tpu.memory_space<vmem>>, vector<256x256xf32>
    %cst = arith.constant dense<0.000000e+00> : vector<14x256xf32>
    %6 = tpu.matmul %4, %5, %cst {dimension_numbers = #tpu.dot_dimension_numbers<[1], [0], [0], [1], [0, 0, 1, 1], [], []>} : vector<14x256xf32>, vector<256x256xf32>, vector<14x256xf32> -> vector<14x256xf32>
    %7 = arith.addf %3, %6 : vector<14x256xf32>
    %c0_6 = arith.constant 0 : index
    %c0_7 = arith.constant 0 : index
    %8 = vector.load %arg7[%c0_6, %c0_7] : memref<14x256xf32, #tpu.memory_space<vmem>>, vector<14x256xf32>
    tpu.vector_store %arg7[%c0_6, %c0_7], %7 {strides = array<i32>} : memref<14x256xf32, #tpu.memory_space<vmem>>, vector<14x256xf32>,
    %c0_i32_8 = arith.constant 0 : i32
    %9 = arith.cmpi eq, %arg2, %c0_i32_8 : i32
    %10 = arith.extui %9 : i1 to i32
    %c0_i32_9 = arith.constant 0 : i32
    %11 = arith.cmpi ne, %10, %c0_i32_9 : i32
    scf.if %11 {
      %c0_10 = arith.constant 0 : index
      %c0_11 = arith.constant 0 : index
      %12 = vector.load %arg7[%c0_10, %c0_11] : memref<14x256xf32, #tpu.memory_space<vmem>>, vector<14x256xf32>
      %c0_12 = arith.constant 0 : index
      %c0_13 = arith.constant 0 : index
      %13 = vector.load %arg5[%c0_12, %c0_13] : memref<1x256xf32, #tpu.memory_space<vmem>>, vector<1x256xf32>
      %14 = vector.broadcast %13 : vector<1x256xf32> to vector<14x256xf32>
      %15 = arith.addf %12, %14 : vector<14x256xf32>
      %c0_14 = arith.constant 0 : index
      %c0_15 = arith.constant 0 : index
      %16 = vector.load %arg6[%c0_14, %c0_15] : memref<14x256xf32, #tpu.memory_space<vmem>>, vector<14x256xf32>
      tpu.vector_store %arg6[%c0_14, %c0_15], %15 {strides = array<i32>} : memref<14x256xf32, #tpu.memory_space<vmem>>, vector<14x256xf32>,
    } else {
    }
    return
  }
  func.func @transform_0(%arg0: i32, %arg1: i32, %arg2: i32) -> (i32, i32) {
    %c0_i32 = arith.constant 0 : i32
    return %arg0, %arg2 : i32, i32
  }
  func.func @transform_1(%arg0: i32, %arg1: i32, %arg2: i32) -> (i32, i32) {
    %c0_i32 = arith.constant 0 : i32
    return %arg2, %arg1 : i32, i32
  }
  func.func @transform_2(%arg0: i32, %arg1: i32, %arg2: i32) -> (i32, i32) {
    %c0_i32 = arith.constant 0 : i32
    %c0_i32_0 = arith.constant 0 : i32
    return %c0_i32, %arg1 : i32, i32
  }
  func.func @transform_3(%arg0: i32, %arg1: i32, %arg2: i32) -> (i32, i32) {
    %c0_i32 = arith.constant 0 : i32
    return %arg0, %arg1 : i32, i32
  }
}

module attributes {stable_mosaic.version = 11 : i64} {
  func.func @_mm_kernel(%arg0: i32, %arg1: i32, %arg2: i32, %arg3: memref<14x128xf32, #tpu.memory_space<vmem>>, %arg4: memref<128x256xf32, #tpu.memory_space<vmem>>, %arg5: memref<1x256xf32, #tpu.memory_space<vmem>>, %arg6: memref<14x256xf32, #tpu.memory_space<vmem>>, %arg7: memref<14x256xf32, #tpu.memory_space<vmem>>) attributes {dimension_semantics = [#tpu.dimension_semantics<parallel>, #tpu.dimension_semantics<parallel>, #tpu.dimension_semantics<arbitrary>], iteration_bounds = array<i64: 1, 1, 1>, scalar_prefetch = 0 : i64, scratch_operands = 1 : i64, tpu.core_type = #tpu.core_type<tc>, window_params = [{transform_indices = @transform_0, window_bounds = array<i64: 14, 128>}, {transform_indices = @transform_1, window_bounds = array<i64: 128, 256>}, {transform_indices = @transform_2, window_bounds = array<i64: 1, 256>}, {transform_indices = @transform_3, window_bounds = array<i64: 14, 256>}]} {
    %c0_i32 = arith.constant 0 : i32
    %0 = arith.cmpi eq, %arg2, %c0_i32 : i32
    %1 = arith.extui %0 : i1 to i32
    %c0_i32_0 = arith.constant 0 : i32
    %2 = arith.cmpi ne, %1, %c0_i32_0 : i32
    scf.if %2 {
      %cst_10 = arith.constant 0.000000e+00 : f32
      %12 = vector.broadcast %cst_10 : f32 to vector<14x256xf32>
      %c0_11 = arith.constant 0 : index
      %c0_12 = arith.constant 0 : index
      %13 = vector.load %arg7[%c0_11, %c0_12] : memref<14x256xf32, #tpu.memory_space<vmem>>, vector<14x256xf32>
      tpu.vector_store %arg7[%c0_11, %c0_12], %12 {strides = array<i32>} : memref<14x256xf32, #tpu.memory_space<vmem>>, vector<14x256xf32>,
    } else {
    }
    %c0 = arith.constant 0 : index
    %c0_1 = arith.constant 0 : index
    %3 = vector.load %arg7[%c0, %c0_1] : memref<14x256xf32, #tpu.memory_space<vmem>>, vector<14x256xf32>
    %c0_2 = arith.constant 0 : index
    %c0_3 = arith.constant 0 : index
    %4 = vector.load %arg3[%c0_2, %c0_3] : memref<14x128xf32, #tpu.memory_space<vmem>>, vector<14x128xf32>
    %c0_4 = arith.constant 0 : index
    %c0_5 = arith.constant 0 : index
    %5 = vector.load %arg4[%c0_4, %c0_5] : memref<128x256xf32, #tpu.memory_space<vmem>>, vector<128x256xf32>
    %cst = arith.constant dense<0.000000e+00> : vector<14x256xf32>
    %6 = tpu.matmul %4, %5, %cst {dimension_numbers = #tpu.dot_dimension_numbers<[1], [0], [0], [1], [0, 0, 1, 1], [], []>} : vector<14x128xf32>, vector<128x256xf32>, vector<14x256xf32> -> vector<14x256xf32>
    %7 = arith.addf %3, %6 : vector<14x256xf32>
    %c0_6 = arith.constant 0 : index
    %c0_7 = arith.constant 0 : index
    %8 = vector.load %arg7[%c0_6, %c0_7] : memref<14x256xf32, #tpu.memory_space<vmem>>, vector<14x256xf32>
    tpu.vector_store %arg7[%c0_6, %c0_7], %7 {strides = array<i32>} : memref<14x256xf32, #tpu.memory_space<vmem>>, vector<14x256xf32>,
    %c0_i32_8 = arith.constant 0 : i32
    %9 = arith.cmpi eq, %arg2, %c0_i32_8 : i32
    %10 = arith.extui %9 : i1 to i32
    %c0_i32_9 = arith.constant 0 : i32
    %11 = arith.cmpi ne, %10, %c0_i32_9 : i32
    scf.if %11 {
      %c0_10 = arith.constant 0 : index
      %c0_11 = arith.constant 0 : index
      %12 = vector.load %arg7[%c0_10, %c0_11] : memref<14x256xf32, #tpu.memory_space<vmem>>, vector<14x256xf32>
      %c0_12 = arith.constant 0 : index
      %c0_13 = arith.constant 0 : index
      %13 = vector.load %arg5[%c0_12, %c0_13] : memref<1x256xf32, #tpu.memory_space<vmem>>, vector<1x256xf32>
      %14 = vector.broadcast %13 : vector<1x256xf32> to vector<14x256xf32>
      %15 = arith.addf %12, %14 : vector<14x256xf32>
      %cst_14 = arith.constant 0.000000e+00 : f32
      %16 = vector.broadcast %cst_14 : f32 to vector<14x256xf32>
      %17 = arith.maximumf %15, %16 : vector<14x256xf32>
      %c0_15 = arith.constant 0 : index
      %c0_16 = arith.constant 0 : index
      %18 = vector.load %arg6[%c0_15, %c0_16] : memref<14x256xf32, #tpu.memory_space<vmem>>, vector<14x256xf32>
      tpu.vector_store %arg6[%c0_15, %c0_16], %17 {strides = array<i32>} : memref<14x256xf32, #tpu.memory_space<vmem>>, vector<14x256xf32>,
    } else {
    }
    return
  }
  func.func @transform_0(%arg0: i32, %arg1: i32, %arg2: i32) -> (i32, i32) {
    %c0_i32 = arith.constant 0 : i32
    return %arg0, %arg2 : i32, i32
  }
  func.func @transform_1(%arg0: i32, %arg1: i32, %arg2: i32) -> (i32, i32) {
    %c0_i32 = arith.constant 0 : i32
    return %arg2, %arg1 : i32, i32
  }
  func.func @transform_2(%arg0: i32, %arg1: i32, %arg2: i32) -> (i32, i32) {
    %c0_i32 = arith.constant 0 : i32
    %c0_i32_0 = arith.constant 0 : i32
    return %c0_i32, %arg1 : i32, i32
  }
  func.func @transform_3(%arg0: i32, %arg1: i32, %arg2: i32) -> (i32, i32) {
    %c0_i32 = arith.constant 0 : i32
    return %arg0, %arg1 : i32, i32
  }
}

module attributes {stable_mosaic.version = 11 : i64} {
  func.func @_mm_kernel(%arg0: i32, %arg1: i32, %arg2: i32, %arg3: memref<64x256xbf16, #tpu.memory_space<vmem>>, %arg4: memref<256x128xbf16, #tpu.memory_space<vmem>>, %arg5: memref<1x128xf32, #tpu.memory_space<vmem>>, %arg6: memref<64x128xf32, #tpu.memory_space<vmem>>, %arg7: memref<64x128xf32, #tpu.memory_space<vmem>>) attributes {dimension_semantics = [#tpu.dimension_semantics<parallel>, #tpu.dimension_semantics<parallel>, #tpu.dimension_semantics<arbitrary>], iteration_bounds = array<i64: 1, 1, 1>, scalar_prefetch = 0 : i64, scratch_operands = 1 : i64, tpu.core_type = #tpu.core_type<tc>, window_params = [{transform_indices = @transform_0, window_bounds = array<i64: 64, 256>}, {transform_indices = @transform_1, window_bounds = array<i64: 256, 128>}, {transform_indices = @transform_2, window_bounds = array<i64: 1, 128>}, {transform_indices = @transform_3, window_bounds = array<i64: 64, 128>}]} {
    %c0_i32 = arith.constant 0 : i32
    %0 = arith.cmpi eq, %arg2, %c0_i32 : i32
    %1 = arith.extui %0 : i1 to i32
    %c0_i32_0 = arith.constant 0 : i32
    %2 = arith.cmpi ne, %1, %c0_i32_0 : i32
    scf.if %2 {
      %cst_10 = arith.constant 0.000000e+00 : f32
      %12 = vector.broadcast %cst_10 : f32 to vector<64x128xf32>
      %c0_11 = arith.constant 0 : index
      %c0_12 = arith.constant 0 : index
      %13 = vector.load %arg7[%c0_11, %c0_12] : memref<64x128xf32, #tpu.memory_space<vmem>>, vector<64x128xf32>
      tpu.vector_store %arg7[%c0_11, %c0_12], %12 {strides = array<i32>} : memref<64x128xf32, #tpu.memory_space<vmem>>, vector<64x128xf32>,
    } else {
    }
    %c0 = arith.constant 0 : index
    %c0_1 = arith.constant 0 : index
    %3 = vector.load %arg7[%c0, %c0_1] : memref<64x128xf32, #tpu.memory_space<vmem>>, vector<64x128xf32>
    %c0_2 = arith.constant 0 : index
    %c0_3 = arith.constant 0 : index
    %4 = vector.load %arg3[%c0_2, %c0_3] : memref<64x256xbf16, #tpu.memory_space<vmem>>, vector<64x256xbf16>
    %c0_4 = arith.constant 0 : index
    %c0_5 = arith.constant 0 : index
    %5 = vector.load %arg4[%c0_4, %c0_5] : memref<256x128xbf16, #tpu.memory_space<vmem>>, vector<256x128xbf16>
    %cst = arith.constant dense<0.000000e+00> : vector<64x128xf32>
    %6 = tpu.matmul %4, %5, %cst {dimension_numbers = #tpu.dot_dimension_numbers<[1], [0], [0], [1], [0, 0, 1, 1], [], []>} : vector<64x256xbf16>, vector<256x128xbf16>, vector<64x128xf32> -> vector<64x128xf32>
    %7 = arith.addf %3, %6 : vector<64x128xf32>
    %c0_6 = arith.constant 0 : index
    %c0_7 = arith.constant 0 : index
    %8 = vector.load %arg7[%c0_6, %c0_7] : memref<64x128xf32, #tpu.memory_space<vmem>>, vector<64x128xf32>
    tpu.vector_store %arg7[%c0_6, %c0_7], %7 {strides = array<i32>} : memref<64x128xf32, #tpu.memory_space<vmem>>, vector<64x128xf32>,
    %c0_i32_8 = arith.constant 0 : i32
    %9 = arith.cmpi eq, %arg2, %c0_i32_8 : i32
    %10 = arith.extui %9 : i1 to i32
    %c0_i32_9 = arith.constant 0 : i32
    %11 = arith.cmpi ne, %10, %c0_i32_9 : i32
    scf.if %11 {
      %c0_10 = arith.constant 0 : index
      %c0_11 = arith.constant 0 : index
      %12 = vector.load %arg7[%c0_10, %c0_11] : memref<64x128xf32, #tpu.memory_space<vmem>>, vector<64x128xf32>
      %c0_12 = arith.constant 0 : index
      %c0_13 = arith.constant 0 : index
      %13 = vector.load %arg5[%c0_12, %c0_13] : memref<1x128xf32, #tpu.memory_space<vmem>>, vector<1x128xf32>
      %14 = vector.broadcast %13 : vector<1x128xf32> to vector<64x128xf32>
      %15 = arith.addf %12, %14 : vector<64x128xf32>
      %c0_14 = arith.constant 0 : index
      %c0_15 = arith.constant 0 : index
      %16 = vector.load %arg6[%c0_14, %c0_15] : memref<64x128xf32, #tpu.memory_space<vmem>>, vector<64x128xf32>
      tpu.vector_store %arg6[%c0_14, %c0_15], %15 {strides = array<i32>} : memref<64x128xf32, #tpu.memory_space<vmem>>, vector<64x128xf32>,
    } else {
    }
    return
  }
  func.func @transform_0(%arg0: i32, %arg1: i32, %arg2: i32) -> (i32, i32) {
    %c0_i32 = arith.constant 0 : i32
    return %arg0, %arg2 : i32, i32
  }
  func.func @transform_1(%arg0: i32, %arg1: i32, %arg2: i32) -> (i32, i32) {
    %c0_i32 = arith.constant 0 : i32
    return %arg2, %arg1 : i32, i32
  }
  func.func @transform_2(%arg0: i32, %arg1: i32, %arg2: i32) -> (i32, i32) {
    %c0_i32 = arith.constant 0 : i32
    %c0_i32_0 = arith.constant 0 : i32
    return %c0_i32, %arg1 : i32, i32
  }
  func.func @transform_3(%arg0: i32, %arg1: i32, %arg2: i32) -> (i32, i32) {
    %c0_i32 = arith.constant 0 : i32
    return %arg0, %arg1 : i32, i32
  }
}

</mosaic_0001>

<bundles_post_ra>
// kernel: bert_class_forward.16
= control target key start
LH: loop header
LB: loop body
LE: loop exit
PB: predicated region body
PF: predicated region fallthrough
CT: control target
= control target key end

     0   :  { %v177_v58 = vlaneseq  ;;  %s605_s0 = inlined_call_operand.vmem [shape: f32[64,256], index: 0, kind: input, shape index: {}]   ;;  %s606_s1 = inlined_call_operand.vmem [shape: f32[1,256], index: 1, kind: input, shape index: {}]   ;;  %s607_s2 = inlined_call_operand.vmem [shape: f32[1,256], index: 2, kind: input, shape index: {}]   ;;  %s608_s3 = inlined_call_operand.vmem [shape: bf16[64,256], index: 3, kind: output, shape index: {}]  }
   0x1   :  { %v346_v0 = vld [vmem:[%s605_s0 + $0x20] sm:$0xff]  ;;  %v351_v1 = vld [vmem:[%s605_s0 + $0x28] sm:$0xff]  ;;  %v368_v5 = vld [vmem:[%s605_s0 + $0x30] sm:$0xff] }
   0x2   :  { %v356_v2 = vld [vmem:[%s605_s0] sm:$0xff]  ;;  %v36_v3 = vadd.f32 %v351_v1, %v346_v0  ;;  %v363_v4 = vld [vmem:[%s605_s0 + $0x8] sm:$0xff]  ;;  %v373_v6 = vld [vmem:[%s605_s0 + $0x38] sm:$0xff]  ;;  %v69_v29 = vmul.f32 %v368_v5, %v368_v5  ;;  %v67_v32 = vmul.f32 %v346_v0, %v346_v0  ;;  %v68_v33 = vmul.f32 %v351_v1, %v351_v1 }
   0x3   :  { %v30_v7 = vadd.f32 %v363_v4, %v356_v2  ;;  %v380_v8 = vld [vmem:[%s605_s0 + $0x10] sm:$0xff]  ;;  %v385_v9 = vld [vmem:[%s605_s0 + $0x18] sm:$0xff]  ;;  %v39_v10 = vadd.f32 %v373_v6, %v368_v5  ;;  %v404_v14 = vld [vmem:[%s605_s0 + $0x40] sm:$0xff]  ;;  %v63_v26 = vmul.f32 %v356_v2, %v356_v2  ;;  %v64_v27 = vmul.f32 %v363_v4, %v363_v4 }
   0x4   :  { %37 = vadd.xlane.f32.xlu1 %v36_v3  ;;  %v33_v11 = vadd.f32 %v385_v9, %v380_v8  ;;  %v394_v12 = vld [vmem:[%s605_s0 + $0x50] sm:$0xff]  ;;  %v399_v13 = vld [vmem:[%s605_s0 + $0x58] sm:$0xff]  ;;  %v409_v15 = vld [vmem:[%s605_s0 + $0x48] sm:$0xff]  ;;  %v65_v23 = vmul.f32 %v380_v8, %v380_v8  ;;  %v66_v24 = vmul.f32 %v385_v9, %v385_v9  ;;  %v70_v30 = vmul.f32 %v373_v6, %v373_v6 }
   0x5   :  { %31 = vadd.xlane.f32.xlu0 %v30_v7  ;;  %v45_v16 = vadd.f32 %v399_v13, %v394_v12  ;;  %v42_v17 = vadd.f32 %v409_v15, %v404_v14  ;;  %v418_v18 = vld [vmem:[%s605_s0 + $0x70] sm:$0xff]  ;;  %v423_v19 = vld [vmem:[%s605_s0 + $0x78] sm:$0xff]  ;;  %v428_v20 = vld [vmem:[%s605_s0 + $0x60] sm:$0xff]  ;;  %v79_v31 = vadd.f32 %v64_v27, %v63_v26  ;;  %v73_v35 = vmul.f32 %v394_v12, %v394_v12 }
   0x6   :  { %v433_v21 = vld [vmem:[%s605_s0 + $0x68] sm:$0xff]  ;;  %v51_v22 = vadd.f32 %v423_v19, %v418_v18  ;;  %v82_v28 = vadd.f32 %v66_v24, %v65_v23  ;;  %v88_v34 = vadd.f32 %v70_v30, %v69_v29  ;;  %v74_v36 = vmul.f32 %v399_v13, %v399_v13 }
   0x7   :  { %v48_v25 = vadd.f32 %v433_v21, %v428_v20  ;;  %v85_v37 = vadd.f32 %v68_v33, %v67_v32  ;;  %v71_v38 = vmul.f32 %v404_v14, %v404_v14  ;;  %v72_v39 = vmul.f32 %v409_v15, %v409_v15 }
   0x8   :  { %40 = vadd.xlane.f32.xlu1 %v39_v10  ;;  %v94_v40 = vadd.f32 %v74_v36, %v73_v35  ;;  %v77_v41 = vmul.f32 %v418_v18, %v418_v18  ;;  %v78_v42 = vmul.f32 %v423_v19, %v423_v19  ;;  %v75_v44 = vmul.f32 %v428_v20, %v428_v20 }
   0x9   :  { %34 = vadd.xlane.f32.xlu0 %v33_v11  ;;  %v91_v43 = vadd.f32 %v72_v39, %v71_v38  ;;  %v76_v45 = vmul.f32 %v433_v21, %v433_v21  ;;  %v175_v38 = vld [vmem:[%s606_s1] sm:$0x3] }
   0xa   :  { %v100_v46 = vadd.f32 %v78_v42, %v77_v41 }
   0xb   :  { %v97_v47 = vadd.f32 %v76_v45, %v75_v44  ;;  %v203_v44 = vld [vmem:[%s607_s2] sm:$0x3] }
   0xc   :  { %46 = vadd.xlane.f32.xlu1 %v45_v16  ;;  %v178_v16 = vshrl.u32 %v177_v58, 7 }
   0xd   :  { %43 = vadd.xlane.f32.xlu0 %v42_v17 }
   0xe   :  { %v179_v33 = vsub.s32 0, %v178_v16 }
  0x10   :  { %52 = vadd.xlane.f32.xlu1 %v51_v22 }
  0x11   :  { %49 = vadd.xlane.f32.xlu0 %v48_v25 }
  0x14   :  { %83 = vadd.xlane.f32.xlu1 %v82_v28 }
  0x15   :  { %80 = vadd.xlane.f32.xlu0 %v79_v31 }
  0x18   :  { %89 = vadd.xlane.f32.xlu1 %v88_v34  ;;  %v183_v34 = vsub.s32 1, %v178_v16 }
  0x19   :  { %86 = vadd.xlane.f32.xlu0 %v85_v37 }
  0x1c   :  { %95 = vadd.xlane.f32.xlu1 %v94_v40 }
  0x1d   :  { %92 = vadd.xlane.f32.xlu0 %v91_v43 }
  0x20   :  { %101 = vadd.xlane.f32.xlu1 %v100_v46 }
  0x21   :  { %98 = vadd.xlane.f32.xlu0 %v97_v47 }
  0x91   :  { %v38_v48 = vpop.xlane.xlu1 %37 }
  0x92   :  { %v32_v49 = vpop.xlane.xlu0 %31  ;;  %v479_v3 = vmul.f32 0.00390625, %v38_v48 }
  0x93   :  { %v473_v57 = vmul.f32 0.00390625, %v32_v49  ;;  %v505_v49 = vrot.slane %v175_v38, %v179_v33 }
  0x94   :  { %v113_v30 = vmul.f32 %v479_v3, %v479_v3 }
  0x95   :  { %v41_v50 = vpop.xlane.xlu1 %40  ;;  %v111_v7 = vmul.f32 %v473_v57, %v473_v57 }
  0x96   :  { %v35_v51 = vpop.xlane.xlu0 %34  ;;  %v475_v60 = vmul.f32 0.00390625, %v41_v50  ;;  %v507_v50 = vrot.slane %v175_v38, %v183_v34 }
  0x97   :  { %v471_v55 = vmul.f32 0.00390625, %v35_v51 }
  0x98   :  { %v114_v25 = vmul.f32 %v475_v60, %v475_v60 }
  0x99   :  { %v47_v52 = vpop.xlane.xlu1 %46  ;;  %v112_v62 = vmul.f32 %v471_v55, %v471_v55 }
  0x9a   :  { %v44_v53 = vpop.xlane.xlu0 %43  ;;  %v483_v23 = vmul.f32 0.00390625, %v47_v52 }
  0x9b   :  { %v487_v28 = vmul.f32 0.00390625, %v44_v53  ;;  %v509_v53 = vrot.slane %v203_v44, %v179_v33 }
  0x9c   :  { %v116_v40 = vmul.f32 %v483_v23, %v483_v23 }
  0x9d   :  { %v53_v54 = vpop.xlane.xlu1 %52  ;;  %v115_v46 = vmul.f32 %v487_v28, %v487_v28 }
  0x9e   :  { %v50_v56 = vpop.xlane.xlu0 %49  ;;  %v491_v37 = vmul.f32 0.00390625, %v53_v54 }
  0x9f   :  { %v498_v43 = vmul.f32 0.00390625, %v50_v56 }
  0xa0   :  { %v118_v56 = vmul.f32 %v491_v37, %v491_v37 }
  0xa1   :  { %v84_v59 = vpop.xlane.xlu1 %83 }
  0xa2   :  { %v104_v61 = vmul.f32 0.00390625, %v84_v59  ;;  %v81_v63 = vpop.xlane.xlu0 %80 }
  0xa3   :  { %v103_v10 = vmul.f32 0.00390625, %v81_v63  ;;  %v117_v63 = vmul.f32 %v498_v43, %v498_v43 }
  0xa4   :  { %v120_v11 = vsub.f32 %v104_v61, %v112_v62  ;;  %v513_v61 = vrot.slane %v203_v44, %v183_v34 }
  0xa5   :  { %v119_v17 = vsub.f32 %v103_v10, %v111_v7  ;;  %v90_v22 = vpop.xlane.xlu1 %89  ;;  %v131_v10 = vsub.f32 %v346_v0, %v479_v3  ;;  %v128_v0 = vsub.f32 %v363_v4, %v473_v57 }
  0xa6   :  { %v144_v24 = vadd.f32 1e-05, %v120_v11  ;;  %v106_v26 = vmul.f32 0.00390625, %v90_v22  ;;  %v87_v27 = vpop.xlane.xlu0 %86  ;;  %v132_v11 = vsub.f32 %v351_v1, %v479_v3  ;;  %v130_v22 = vsub.f32 %v385_v9, %v471_v55 }
  0xa7   :  { %v143_v29 = vadd.f32 1e-05, %v119_v17  ;;  %v105_v31 = vmul.f32 0.00390625, %v87_v27  ;;  %v129_v17 = vsub.f32 %v380_v8, %v471_v55  ;;  %v133_v1 = vsub.f32 %v368_v5, %v475_v60 }
  0xa8   :  { %307 = vrsqrt.f32 %v144_v24  ;;  %v122_v32 = vsub.f32 %v106_v26, %v114_v25  ;;  %v127_v26 = vsub.f32 %v356_v2, %v473_v57  ;;  %v134_v8 = vsub.f32 %v373_v6, %v475_v60 }
  0xa9   :  { %309 = vrsqrt.f32 %v143_v29  ;;  %v121_v35 = vsub.f32 %v105_v31, %v113_v30  ;;  %v96_v36 = vpop.xlane.xlu1 %95  ;;  %v137_v55 = vsub.f32 %v394_v12, %v483_v23  ;;  %v138_v2 = vsub.f32 %v399_v13, %v483_v23 }
  0xaa   :  { %v146_v39 = vadd.f32 1e-05, %v122_v32  ;;  %v108_v41 = vmul.f32 0.00390625, %v96_v36  ;;  %v93_v42 = vpop.xlane.xlu0 %92  ;;  %v135_v6 = vsub.f32 %v404_v14, %v487_v28  ;;  %v136_v60 = vsub.f32 %v409_v15, %v487_v28 }
  0xab   :  { %v145_v45 = vadd.f32 1e-05, %v121_v35  ;;  %v107_v47 = vmul.f32 0.00390625, %v93_v42  ;;  %v141_v15 = vsub.f32 %v418_v18, %v491_v37 }
  0xac   :  { %311 = vrsqrt.f32 %v146_v39  ;;  %v124_v48 = vsub.f32 %v108_v41, %v116_v40 }
  0xad   :  { %313 = vrsqrt.f32 %v145_v45  ;;  %v123_v51 = vsub.f32 %v107_v47, %v115_v46  ;;  %v102_v52 = vpop.xlane.xlu1 %101  ;;  %v142_v45 = vsub.f32 %v423_v19, %v491_v37 }
  0xae   :  { %v148_v54 = vadd.f32 1e-05, %v124_v48  ;;  %v110_v58 = vmul.f32 0.00390625, %v102_v52  ;;  %v99_v59 = vpop.xlane.xlu0 %98 }
  0xaf   :  { %v147_v62 = vadd.f32 1e-05, %v123_v51  ;;  %v109_v7 = vmul.f32 0.00390625, %v99_v59 }
  0xb0   :  { %315 = vrsqrt.f32 %v148_v54  ;;  %v126_v16 = vsub.f32 %v110_v58, %v118_v56 }
  0xb1   :  { %317 = vrsqrt.f32 %v147_v62  ;;  %v125_v24 = vsub.f32 %v109_v7, %v117_v63  ;;  %v139_v62 = vsub.f32 %v428_v20, %v498_v43 }
  0xb2   :  { %v308_v25 = vpop.eup %307  ;;  %v150_v3 = vadd.f32 1e-05, %v126_v16  ;;  %v140_v16 = vsub.f32 %v433_v21, %v498_v43 }
  0xb3   :  { %v310_v27 = vpop.eup %309  ;;  %v161_v29 = vmul.f32 %v308_v25, %v129_v17  ;;  %v162_v30 = vmul.f32 %v308_v25, %v130_v22  ;;  %v149_v9 = vadd.f32 1e-05, %v125_v24 }
  0xb4   :  { %v159_v31 = vmul.f32 %v310_v27, %v127_v26  ;;  %v160_v32 = vmul.f32 %v310_v27, %v128_v0  ;;  %319 = vrsqrt.f32 %v150_v3 }
  0xb5   :  { %v189_v4 = vmul.f32 %v505_v49, %v161_v29  ;;  %v190_v5 = vmul.f32 %v507_v50, %v162_v30  ;;  %321 = vrsqrt.f32 %v149_v9 }
  0xb6   :  { %v312_v57 = vpop.eup %311  ;;  %v187_v12 = vmul.f32 %v505_v49, %v159_v31  ;;  %v188_v33 = vmul.f32 %v507_v50, %v160_v32 }
  0xb7   :  { %v314_v34 = vpop.eup %313  ;;  %v217_v35 = vadd.f32 %v509_v53, %v189_v4  ;;  %v218_v13 = vadd.f32 %v513_v61, %v190_v5  ;;  %v165_v23 = vmul.f32 %v312_v57, %v133_v1  ;;  %v166_v36 = vmul.f32 %v312_v57, %v134_v8 }
  0xb8   :  { %v215_v38 = vadd.f32 %v509_v53, %v187_v12  ;;  %v216_v39 = vadd.f32 %v513_v61, %v188_v33  ;;  %v163_v40 = vmul.f32 %v314_v34, %v131_v10  ;;  %v164_v14 = vmul.f32 %v314_v34, %v132_v11 }
  0xb9   :  { %v300_v28 = vpack.c.bf16 %v218_v13, %v217_v35  ;;  %v193_v41 = vmul.f32 %v505_v49, %v165_v23  ;;  %v194_v42 = vmul.f32 %v507_v50, %v166_v36 }
  0xba   :  { %v316_v44 = vpop.eup %315  ;;  %v299_v46 = vpack.c.bf16 %v216_v39, %v215_v38  ;;  %v191_v47 = vmul.f32 %v505_v49, %v163_v40  ;;  %v192_v48 = vmul.f32 %v507_v50, %v164_v14 }
  0xbb   :  { %v318_v51 = vpop.eup %317  ;;  %280 = vst [vmem:[%s608_s3 + $0x8] sm:$0xff] %v300_v28  ;;  %v221_v18 = vadd.f32 %v509_v53, %v193_v41  ;;  %v222_v52 = vadd.f32 %v513_v61, %v194_v42  ;;  %v169_v54 = vmul.f32 %v316_v44, %v137_v55  ;;  %v170_v56 = vmul.f32 %v316_v44, %v138_v2 }
  0xbc   :  { %279 = vst [vmem:[%s608_s3] sm:$0xff] %v299_v46  ;;  %v219_v19 = vadd.f32 %v509_v53, %v191_v47  ;;  %v220_v37 = vadd.f32 %v513_v61, %v192_v48  ;;  %v167_v58 = vmul.f32 %v318_v51, %v135_v6  ;;  %v168_v59 = vmul.f32 %v318_v51, %v136_v60 }
  0xbd   :  { %v302_v63 = vpack.c.bf16 %v222_v52, %v221_v18  ;;  %v197_v7 = vmul.f32 %v505_v49, %v169_v54  ;;  %v198_v10 = vmul.f32 %v507_v50, %v170_v56 }
  0xbe   :  { %v320_v11 = vpop.eup %319  ;;  %v301_v17 = vpack.c.bf16 %v220_v37, %v219_v19  ;;  %v195_v22 = vmul.f32 %v505_v49, %v167_v58  ;;  %v196_v24 = vmul.f32 %v507_v50, %v168_v59 }
  0xbf   :  { %v322_v25 = vpop.eup %321  ;;  %282 = vst [vmem:[%s608_s3 + $0x18] sm:$0xff] %v302_v63  ;;  %v225_v20 = vadd.f32 %v509_v53, %v197_v7  ;;  %v226_v26 = vadd.f32 %v513_v61, %v198_v10  ;;  %v173_v0 = vmul.f32 %v320_v11, %v141_v15  ;;  %v174_v1 = vmul.f32 %v320_v11, %v142_v45 }
  0xc0   :  { %281 = vst [vmem:[%s608_s3 + $0x10] sm:$0xff] %v301_v17  ;;  %v223_v21 = vadd.f32 %v509_v53, %v195_v22  ;;  %v224_v43 = vadd.f32 %v513_v61, %v196_v24  ;;  %v171_v3 = vmul.f32 %v322_v25, %v139_v62  ;;  %v172_v27 = vmul.f32 %v322_v25, %v140_v16 }
  0xc1   :  { %v304_v8 = vpack.c.bf16 %v226_v26, %v225_v20  ;;  %v201_v29 = vmul.f32 %v505_v49, %v173_v0  ;;  %v202_v30 = vmul.f32 %v507_v50, %v174_v1 }
  0xc2   :  { %v303_v9 = vpack.c.bf16 %v224_v43, %v223_v21  ;;  %v199_v55 = vmul.f32 %v505_v49, %v171_v3  ;;  %v200_v31 = vmul.f32 %v507_v50, %v172_v27 }
  0xc3   :  { %284 = vst [vmem:[%s608_s3 + $0x28] sm:$0xff] %v304_v8  ;;  %v229_v32 = vadd.f32 %v509_v53, %v201_v29  ;;  %v230_v2 = vadd.f32 %v513_v61, %v202_v30 }
  0xc4   :  { %283 = vst [vmem:[%s608_s3 + $0x20] sm:$0xff] %v303_v9  ;;  %v227_v4 = vadd.f32 %v509_v53, %v199_v55  ;;  %v228_v5 = vadd.f32 %v513_v61, %v200_v31 }
  0xc5   :  { %v306_v57 = vpack.c.bf16 %v230_v2, %v229_v32 }
  0xc6   :  { %v305_v49 = vpack.c.bf16 %v228_v5, %v227_v4 }
  0xc7   :  { %286 = vst [vmem:[%s608_s3 + $0x38] sm:$0xff] %v306_v57 }
  0xc8   :  { %285 = vst [vmem:[%s608_s3 + $0x30] sm:$0xff] %v305_v49 }

// kernel: bert_class_forward.18
= control target key start
LH: loop header
LB: loop body
LE: loop exit
PB: predicated region body
PF: predicated region fallthrough
CT: control target
= control target key end

     0   :  { %s1704_s0 = inlined_call_operand.vmem [shape: bf16[2,32,768], index: 0, kind: input, shape index: {}, may-alias: {0,1,2}]   ;;  %s1705_s1 = inlined_call_operand.vmem [shape: bf16[2,32,768], index: 1, kind: input, shape index: {}, may-alias: {0,1,2}]   ;;  %s1706_s2 = inlined_call_operand.vmem [shape: bf16[2,32,768], index: 2, kind: input, shape index: {}, may-alias: {0,1,2}]   ;;  %s1707_s3 = inlined_call_operand.vmem [shape: f32[2,1,32], index: 3, kind: input, shape index: {}]   ;;  %s1708_s4 = inlined_call_operand.vmem [shape: bf16[2,32,256], index: 4, kind: output, shape index: {}]  }
   0x1   :  { %1710 = sst [smem:[#allocation8_spill]] %s1708_s4 }
   0x2   :  { %s1407_s15 = smov 0   ;;  %s1409_s16 = smov 0  }
   0x3   :  { %s1411_s17 = smov 0   ;;  %s1413_s18 = smov 0  }
   0x4   :  { %s1415_s19 = smov 0   ;;  %s1417_s20 = smov 0  }
   0x5   :  { %s1419_s21 = smov 0   ;;  %s1421_s22 = smov 0  }
   0x6   :  { %s1423_s23 = smov 0   ;;  %s1425_s24 = smov 0  }
   0x7   :  { %s1427_s25 = smov 0  }
   0x8 LB: > { %1711 = sst [smem:[#allocation6_spill]] %s1363_s21  ;;  %s23_s27 = sadd.s32 1, %s1371_s23  ;;  %s1379_s25 = sphi %s1427_s25, %s14_s25   ;;  %s1375_s24 = sphi %s1425_s24, %s1730_s24   ;;  %s1371_s23 = sphi %s1423_s23, %s1729_s23   ;;  %s1367_s22 = sphi %s1421_s22, %s1728_s22   ;;  %s1363_s21 = sphi %s1419_s21, %s1727_s21   ;;  %s1359_s20 = sphi %s1417_s20, %s1726_s20   ;;  %s1355_s19 = sphi %s1415_s19, %s1725_s19   ;;  %s1351_s18 = sphi %s1413_s18, %s1724_s18   ;;  %s1347_s17 = sphi %s1411_s17, %s1723_s17   ;;  %s1343_s16 = sphi %s1409_s16, %s1722_s16   ;;  %s1339_s15 = sphi %s1407_s15, %s1721_s15  }
   0x9   : > { %p24_p0 = scmp.ge.s32.totalorder %s23_s27, 2  ;;  %s26_s28 = sadd.s32 1, %s1375_s24 }
   0xa   : > { %s35_s29 = sadd.s32 1, %s1359_s20  ;;  %p42_p1 = scmp.ne.s32.totalorder %s1359_s20, %s1355_s19 }
   0xb   : > { %s1732_s27 = smov (%p24_p0, %s23_s27), 0  ;;  %s1734_s28 = smov (!%p24_p0, %s26_s28), %s1375_s24 }
   0xc   : > { %s31_s30 = ssub.s32 %s1371_s23, %s1732_s27  ;;  %p43_p2 = scmp.eq.s32.totalorder %s1379_s25, 0 }
   0xd   : > { %p28_p3 = scmp.ge.s32.totalorder %s1734_s28, 2  ;;  %s58_s5 = sadd.s32 2, %s1371_s23 }
   0xe   : > { %p1480_p4 = por %p43_p2, %p42_p1  ;;  %s59_s7 = sadd.s32 2, %s1732_s27 }
   0xf   : > { %s1736_s28 = smov (%p28_p3, %s1734_s28), 0  ;;  %s61_s8 = ssub.s32 %s58_s5, %s59_s7 }
  0x10   : > { %1713 = sst [smem:[#allocation7_spill]] %s1736_s28  ;;  %s65_s9 = sadd.s32 1, %s1351_s18 }
  0x11   : > { %s30_s10 = ssub.s32 %s1375_s24, %s1736_s28  ;;  %p72_p5 = scmp.ne.s32.totalorder %s1351_s18, %s1347_s17 }
  0x12   : > { %s32_s11 = sor.u32 %s31_s30, %s30_s10  ;;  %s62_s12 = sor.u32 %s61_s8, %s30_s10 }
  0x13   : > { %p33_p6 = scmp.eq.s32.totalorder %s32_s11, 0  ;;  %p63_p7 = scmp.eq.s32.totalorder %s62_s12, 0 }
  0x14   : > { %p1494_p8 = por %p72_p5, %p43_p2  ;;  %s88_s14 = sadd.s32 4, %s1371_s23 }
  0x15   : > { %s1500_s26 = scalar_select %p33_p6, %s1359_s20, %s35_s29  }
  0x16   : > { %s1503_s5 = scalar_select %p63_p7, %s1351_s18, %s65_s9  }
  0x17   : > { %s89_s7 = sadd.s32 4, %s1732_s27  ;;  %s95_s28 = sadd.s32 1, %s1343_s16 }
  0x18   : > { %s91_s4 = ssub.s32 %s88_s14, %s89_s7  ;;  %p102_p9 = scmp.ne.s32.totalorder %s1343_s16, %s1339_s15 }
  0x19   : > { %s92_s30 = sor.u32 %s91_s4, %s30_s10  ;;  %s1715_s21 = sadd.s32 4294967295, %s1379_s25  }
  0x1a   : > { %p160_p10 = scmp.eq.s32.totalorder %s1715_s21, 3  ;;  %p93_p11 = scmp.eq.s32.totalorder %s92_s30, 0 }
  0x1b   : > { %p1513_p12 = por %p102_p9, %p43_p2  ;;  %p1069_p0 = scmp.ge.s32.totalorder %s1379_s25, 4 }
  0x1c   : > { %p1520_p13 = por %p160_p10, %p42_p1 }
  0x1d   : > { %s1525_s29 = scalar_select %p93_p11, %s1343_s16, %s95_s28  }
  0x1e   : > { %182 = sbr.rel (%p1069_p0) target bundleno = 64 (0x40), region = 16 }
  0x25   : > { %185 = sbr.rel (!%p1480_p4) target bundleno = 46 (0x2e), region = 20  ;;  %s187_s4 = sand.u32 (%p1480_p4), 1, %s1359_s20  }
  0x26   : > { %s1165_s21 = smul.u32 (%p1480_p4), 24, %s1375_s24  ;;  %s1070_s9 = sshll.u32 (%p1480_p4), %s187_s4, 4 }
  0x27   : > { %s189_s28 = scalar_lea.vmem (%p1480_p4), [#allocation2], %s1070_s9 }
  0x28   : > { %s191_s10 = sadd.s32 (%p1480_p4), %s1371_s23, %s1165_s21 }
  0x29   : > { %s1071_s12 = sshll.u32 (%p1480_p4), %s191_s10, 2 }
  0x2a   : > { %s193_s30 = scalar_lea.vmem (%p1480_p4), %s1704_s0, %s1071_s12 }
  0x2b   : > { %v209_v0 = vld [vmem:[%s193_s30] sm:$0xf] (%p1480_p4)  ;;  %v211_v1 = vld [vmem:[%s193_s30 + $0x18] sm:$0xf] (%p1480_p4)  ;;  %v213_v2 = vld [vmem:[%s193_s30 + $0x30] sm:$0xf] (%p1480_p4) }
  0x2c   : > { %210 = vst [vmem:[%s189_s28] sm:$0xf] %v209_v0  ;;  %212 = vst [vmem:[%s189_s28 + $0x4] sm:$0xf] %v211_v1  ;;  %v215_v3 = vld [vmem:[%s193_s30 + $0x48] sm:$0xf] }
  0x2d   : > { %214 = vst [vmem:[%s189_s28 + $0x8] sm:$0xf] %v213_v2  ;;  %216 = vst [vmem:[%s189_s28 + $0xc] sm:$0xf] %v215_v3 }
  0x2e PF: > { %247 = sbr.rel (!%p1494_p8) target bundleno = 55 (0x37), region = 61  ;;  %s249_s6 = sand.u32 (%p1494_p8), 1, %s1351_s18  }
  0x2f   : > { %s963_s4 = smul.u32 (%p1494_p8), 24, %s1375_s24  ;;  %s1072_s21 = sshll.u32 (%p1494_p8), %s249_s6, 4 }
  0x30   : > { %s251_s30 = scalar_lea.vmem (%p1494_p8), [#allocation3], %s1072_s21 }
  0x31   : > { %s964_s10 = sadd.s32 (%p1494_p8), %s1371_s23, %s963_s4 }
  0x32   : > { %s1073_s12 = sshll.u32 (%p1494_p8), %s964_s10, 2 }
  0x33   : > { %s966_s9 = scalar_lea.vmem (%p1494_p8), %s1705_s1, %s1073_s12 }
  0x34   : > { %v1074_v4 = vld [vmem:[%s966_s9 + $0x8] sm:$0xf] (%p1494_p8)  ;;  %v1075_v5 = vld [vmem:[%s966_s9 + $0x20] sm:$0xf] (%p1494_p8)  ;;  %v1076_v6 = vld [vmem:[%s966_s9 + $0x38] sm:$0xf] (%p1494_p8) }
  0x35   : > { %273 = vst [vmem:[%s251_s30] sm:$0xf] %v1074_v4  ;;  %275 = vst [vmem:[%s251_s30 + $0x4] sm:$0xf] %v1075_v5  ;;  %v1077_v7 = vld [vmem:[%s966_s9 + $0x50] sm:$0xf] }
  0x36   : > { %277 = vst [vmem:[%s251_s30 + $0x8] sm:$0xf] %v1076_v6  ;;  %279 = vst [vmem:[%s251_s30 + $0xc] sm:$0xf] %v1077_v7 }
  0x37 PF: > { %310 = sbr.rel (!%p1513_p12) target bundleno = 64 (0x40), region = 102  ;;  %s312_s13 = sand.u32 (%p1513_p12), 1, %s1343_s16  }
  0x38   : > { %s970_s28 = smul.u32 (%p1513_p12), 24, %s1375_s24  ;;  %s1078_s6 = sshll.u32 (%p1513_p12), %s312_s13, 4 }
  0x39   : > { %s314_s7 = scalar_lea.vmem (%p1513_p12), [#allocation4], %s1078_s6 }
  0x3a   : > { %s971_s4 = sadd.s32 (%p1513_p12), %s1371_s23, %s970_s28 }
  0x3b   : > { %s1079_s10 = sshll.u32 (%p1513_p12), %s971_s4, 2 }
  0x3c   : > { %s973_s21 = scalar_lea.vmem (%p1513_p12), %s1706_s2, %s1079_s10 }
  0x3d   : > { %v1080_v8 = vld [vmem:[%s973_s21 + $0x10] sm:$0xf] (%p1513_p12)  ;;  %v1081_v9 = vld [vmem:[%s973_s21 + $0x28] sm:$0xf] (%p1513_p12)  ;;  %v1082_v10 = vld [vmem:[%s973_s21 + $0x40] sm:$0xf] (%p1513_p12) }
  0x3e   : > { %336 = vst [vmem:[%s314_s7] sm:$0xf] %v1080_v8  ;;  %338 = vst [vmem:[%s314_s7 + $0x4] sm:$0xf] %v1081_v9  ;;  %v1083_v11 = vld [vmem:[%s973_s21 + $0x58] sm:$0xf] }
  0x3f   : > { %340 = vst [vmem:[%s314_s7 + $0x8] sm:$0xf] %v1082_v10  ;;  %342 = vst [vmem:[%s314_s7 + $0xc] sm:$0xf] %v1083_v11 }
  0x40 PF: > { %p1084_p1 = scmp.ge.s32.totalorder %s1379_s25, 1  ;;  %p378_p2 = scmp.lt.s32.totalorder %s1379_s25, 5 }
  0x42   : > { %p379_p3 = pnand %p1084_p1, %p378_p2 }
  0x43   : > { %s392_s8 = sand.u32 (!%p379_p3), 1, %s1347_s17   ;;  %s385_s9 = sand.u32 (!%p379_p3), 1, %s1355_s19   ;;  %vm473_vm0 = vcmask (!%p379_p3), 523264   ;;  %vm549_vm1 = vcmask (!%p379_p3), 261120  }
  0x44   : > { %382 = sbr.rel (%p379_p3) target bundleno = 1538 (0x602), region = 147  ;;  %s1086_s30 = sshll.u32 (!%p379_p3), %s392_s8, 4 }
  0x45   : > { %s1556_s13 = sshll.u32 (!%p379_p3), %s385_s9, 4  ;;  %s394_s28 = scalar_lea.vmem (!%p379_p3), [#allocation3], %s1086_s30 }
  0x46   : > { %v1558_v12 = vld [vmem:[%s394_s28] sm:$0xff] (!%p379_p3)   ;;  %v1560_v13 = vld [vmem:[%s394_s28 + $0x8] sm:$0xff] (!%p379_p3)   ;;  %s387_s17 = scalar_lea.vmem (!%p379_p3), [#allocation2], %s1556_s13  ;;  %p436_p4 = scmp.lt.s32.totalorder (!%p379_p3), %s1367_s22, 1 }
  0x47   : > { %1161 = vmatprep.subr.msk.bf16.mxu0 (!%p379_p3), %vm473_vm0, %v1558_v12  ;;  %v481_v14 = vsel (!%p379_p3), %vm473_vm0, %v1558_v12, 0  ;;  %v1567_v15 = vld [vmem:[%s387_s17] sm:$0xff] (!%p379_p3)   ;;  %v484_v16 = vsel (!%p379_p3), %vm473_vm0, %v1560_v13, 0  ;;  %v1575_v17 = vld [vmem:[%s387_s17 + $0x8] sm:$0xff] (!%p379_p3)   ;;  %s399_s12 = sand.u32 (!%p379_p3), 1, %s1339_s15   ;;  %s1381_s7 = smov (!%p379_p3), 64  }
  0x48   : > { %1130 = vmatpush3.bf16.xpose.msra.mxu0 (!%p379_p3), %v481_v14  ;;  %1133 = vmatprep.mubr.msk.bf16.mxu0 (!%p379_p3), %vm473_vm0, %v1567_v15  ;;  %s1087_s14 = sshll.u32 (!%p379_p3), %s399_s12, 4  ;;  %s433_s15 = scalar_lea.vmem (!%p379_p3), [#allocation5], %s1556_s13 }
  0x49   : > { %1162 = vmatprep.subr.msk.bf16.mxu0 (!%p379_p3), %vm473_vm0, %v1560_v13  ;;  %s401_s21 = scalar_lea.vmem (!%p379_p3), [#allocation4], %s1087_s14 }
  0x4a   : > { %v1599_v55 = vld [vmem:[%s401_s21] sm:$0xff] (!%p379_p3)   ;;  %v1601_v56 = vld [vmem:[%s401_s21 + $0x8] sm:$0xff] (!%p379_p3)  }
  0x4b   : > { %s437_s19 = scalar_select %p436_p4, %s1367_s22, 1  ;;  %1137 = vmatprep.subr.bf16.mxu1 %v1599_v55 }
  0x4c   : > { %1138 = vmatpush3.bf16.msra.mxu1 %v1599_v55  ;;  %s1718_s8 = sld [smem:[#allocation6_spill]] (%p1520_p13)  ;;  %s1109_s9 = sshll.u32 (%p1520_p13), %s1367_s22, 3 }
  0x4d   : > { %s438_s10 = scalar_lea.vmem %s1707_s3, %s437_s19  ;;  %1139 = vmatprep.subr.bf16.mxu1 %v1601_v56  ;;  %s1719_s19 = sld [smem:[#allocation8_spill]] (%p1520_p13) }
  0x4e   : > { %v1584_v19 = vld [vmem:[%s438_s10] ss:$0 sm:$0xff] }
  0x50   : > { %1132 = vmatpush3.bf16.xpose.msra.mxu0 %v484_v16  ;;  %1140 = vmatpush3.bf16.msra.mxu1 %v1601_v56 }
  0x52   : > { %s889_s30 = sadd.s32 (%p1520_p13), %s1718_s8, %s1109_s9 }
  0x53   : > { %s1110_s13 = sshll.u32 (%p1520_p13), %s889_s30, 2 }
  0x54   : > { %s891_s6 = scalar_lea.vmem (%p1520_p13), %s1719_s19, %s1110_s13 }
  0x57   : > { %1134 = vmatmul.mubr.msk.bf16.vlgmr.msra.gmra.mrb[0].mxu0 %vm473_vm0, %v1575_v17 }
 0x12a   : > { %v1135_v18 = vpop.f32.mrb[0].mxu0 }
 0x12b   : > { %v537_v20 = vmul.f32 0.125, %v1135_v18  ;;  %v520_v21 = vpop.f32.mrb[1].mxu0 }
 0x12c   : > { %v535_v22 = vmul.f32 0.125, %v520_v21  ;;  %v1136_v23 = vpop.f32.mrb[2].mxu0 }
 0x12d   : > { %v538_v24 = vmul.f32 0.125, %v1136_v23  ;;  %v523_v25 = vpop.f32.mrb[3].mxu0  ;;  %v547_v26 = vadd.f32 %v1584_v19, %v537_v20 }
 0x12e   : > { %v536_v27 = vmul.f32 0.125, %v523_v25  ;;  %v545_v28 = vadd.f32 %v1584_v19, %v535_v22 }
 0x12f   : > { %v556_v29 = vsel %vm549_vm1, %v547_v26, -inf  ;;  %v548_v30 = vadd.f32 %v1584_v19, %v538_v24 }
 0x130   : > { %557 = vmax.xlane.f32.xlu1 %v556_v29  ;;  %v550_v31 = vsel %vm549_vm1, %v545_v28, -inf  ;;  %v546_v32 = vadd.f32 %v1584_v19, %v536_v27 }
 0x131   : > { %551 = vmax.xlane.f32.xlu0 %v550_v31  ;;  %v559_v33 = vsel %vm549_vm1, %v548_v30, -inf }
 0x132   : > { %v553_v34 = vsel %vm549_vm1, %v546_v32, -inf }
 0x134   : > { %560 = vmax.xlane.f32.xlu1 %v559_v33 }
 0x135   : > { %554 = vmax.xlane.f32.xlu0 %v553_v34 }
 0x1bd   : > { %v558_v35 = vpop.xlane.xlu1 %557 }
 0x1be   : > { %v564_v36 = vsub.f32 %v547_v26, %v558_v35  ;;  %v552_v37 = vpop.xlane.xlu0 %551 }
 0x1bf   : > { %v562_v38 = vsub.f32 %v545_v28, %v552_v37 }
 0x1c0   : > { %v570_v39 = vmul.f32 1.442695, %v564_v36 }
 0x1c1   : > { %v566_v40 = vmul.f32 1.442695, %v562_v38  ;;  %v561_v41 = vpop.xlane.xlu1 %560 }
 0x1c2   : > { %1261 = vpow2.f32 %v570_v39  ;;  %v565_v42 = vsub.f32 %v548_v30, %v561_v41  ;;  %v555_v43 = vpop.xlane.xlu0 %554 }
 0x1c3   : > { %v563_v44 = vsub.f32 %v546_v32, %v555_v43  ;;  %1263 = vpow2.f32 %v566_v40 }
 0x1c4   : > { %v572_v45 = vmul.f32 1.442695, %v565_v42 }
 0x1c5   : > { %v568_v46 = vmul.f32 1.442695, %v563_v44 }
 0x1c7   : > { %1265 = vpow2.f32 %v568_v46 }
 0x1c8   : > { %1267 = vpow2.f32 %v572_v45 }
 0x1cc   : > { %v1262_v47 = vpop.eup %1261 }
 0x1cd   : > { %v580_v48 = vsel %vm549_vm1, %v1262_v47, 0.0  ;;  %v1264_v49 = vpop.eup %1263 }
 0x1ce   : > { %581 = vadd.xlane.f32.xlu0 %v580_v48  ;;  %v574_v51 = vsel %vm549_vm1, %v1264_v49, 0.0 }
 0x1d1   : > { %v1266_v50 = vpop.eup %1265 }
 0x1d2   : > { %575 = vadd.xlane.f32.xlu0 %v574_v51  ;;  %v577_v52 = vsel %vm549_vm1, %v1266_v50, 0.0  ;;  %v1268_v53 = vpop.eup %1267 }
 0x1d3   : > { %578 = vadd.xlane.f32.xlu1 %v577_v52  ;;  %v583_v54 = vsel %vm549_vm1, %v1268_v53, 0.0 }
 0x1d7   : > { %584 = vadd.xlane.f32.xlu1 %v583_v54 }
 0x1e8   : > { %669 = vrot.lane.b32.xlu0 %v1558_v12, %s1381_s7  ;;  %671 = vrot.lane.b32.xlu1 %v1560_v13, %s1381_s7 }
 0x1ec   : > { %665 = vrot.lane.b32.xlu1 %v1567_v15, %s1381_s7 }
 0x1f0   : > { %667 = vrot.lane.b32.xlu1 %v1575_v17, %s1381_s7 }
 0x25b   : > { %v582_v57 = vpop.xlane.xlu0 %581 }
 0x25f   : > { %v576_v58 = vpop.xlane.xlu0 %575 }
 0x260   : > { %1269 = vrcp.f32 %v576_v58  ;;  %v579_v59 = vpop.xlane.xlu1 %578 }
 0x261   : > { %1271 = vrcp.f32 %v579_v59 }
 0x262   : > { %1273 = vrcp.f32 %v582_v57 }
 0x263   : > { %v670_v60 = vpop.permute.xlu0 %669 }
 0x264   : > { %v585_v61 = vpop.xlane.xlu1 %584  ;;  %1163 = vmatprep.subr.msk.bf16.mxu1 %vm473_vm0, %v670_v60  ;;  %v680_v8 = vsel %vm473_vm0, %v670_v60, 0 }
 0x265   : > { %1275 = vrcp.f32 %v585_v61 }
 0x268   : > { %v672_v2 = vpop.permute.xlu1 %671 }
 0x269   : > { %v683_v11 = vsel %vm473_vm0, %v672_v2, 0 }
 0x26a   : > { %v1270_v62 = vpop.eup %1269 }
 0x26b   : > { %v1272_v63 = vpop.eup %1271  ;;  %v590_v0 = vmul.f32 %v1270_v62, %v1264_v49 }
 0x26c   : > { %v591_v1 = vmul.f32 %v1272_v63, %v1266_v50  ;;  %v1274_v3 = vpop.eup %1273  ;;  %v666_v10 = vpop.permute.xlu1 %665 }
 0x26d   : > { %v592_v6 = vmul.f32 %v1274_v3, %v1262_v47 }
 0x26e   : > { %v594_v4 = vpack.c.bf16 %v591_v1, %v590_v0 }
 0x26f   : > { %v1276_v5 = vpop.eup %1275 }
 0x270   : > { %1141 = vmatprep.mubr.msk.bf16.mxu1 %vm549_vm1, %v594_v4  ;;  %v593_v7 = vmul.f32 %v1276_v5, %v1268_v53  ;;  %v668_v12 = vpop.permute.xlu1 %667 }
 0x272   : > { %v595_v9 = vpack.c.bf16 %v593_v7, %v592_v6 }
 0x274   : > { %1142 = vmatmul.mubr.msk.bf16.vlgmr.msra.gmra.mrb[0].mxu1 %vm549_vm1, %v595_v9 }
 0x275   : > { %1146 = vmatpush3.bf16.xpose.msra.mxu1 %v680_v8  ;;  %1149 = vmatprep.mubr.msk.bf16.mxu1 %vm473_vm0, %v666_v10 }
 0x276   : > { %1164 = vmatprep.subr.msk.bf16.mxu1 %vm473_vm0, %v672_v2 }
 0x27d   : > { %1148 = vmatpush3.bf16.xpose.msra.mxu1 %v683_v11 }
 0x284   : > { %1150 = vmatmul.mubr.msk.bf16.vlgmr.msra.gmra.mrb[4].mxu1 %vm473_vm0, %v668_v12 }
 0x347   : > { %v1623_v13 = vpop.f32.mrb[0].mxu1 }
 0x348   : > { %v1625_v14 = vpop.f32.mrb[1].mxu1 }
 0x349   : > { %v1627_v15 = vpop.f32.mrb[2].mxu1 }
 0x34a   : > { %v664_v16 = vpack.c.bf16 %v1627_v15, %v1623_v13  ;;  %v1631_v17 = vpop.f32.mrb[3].mxu1 }
 0x34b   : > { %v663_v18 = vpack.c.bf16 %v1631_v17, %v1625_v14 }
 0x357   : > { %v1151_v20 = vpop.f32.mrb[4].mxu1 }
 0x358   : > { %v719_v21 = vpop.f32.mrb[5].mxu1  ;;  %v736_v22 = vmul.f32 0.125, %v1151_v20 }
 0x359   : > { %v734_v23 = vmul.f32 0.125, %v719_v21  ;;  %v1152_v24 = vpop.f32.mrb[6].mxu1 }
 0x35a   : > { %v722_v25 = vpop.f32.mrb[7].mxu1  ;;  %v737_v28 = vmul.f32 0.125, %v1152_v24  ;;  %v740_v31 = vadd.f32 %v1584_v19, %v736_v22 }
 0x35b   : > { %v735_v26 = vmul.f32 0.125, %v722_v25  ;;  %v738_v27 = vadd.f32 %v1584_v19, %v734_v23 }
 0x35c   : > { %v748_v33 = vsel %vm549_vm1, %v740_v31, -inf  ;;  %v741_v34 = vadd.f32 %v1584_v19, %v737_v28 }
 0x35d   : > { %v739_v29 = vadd.f32 %v1584_v19, %v735_v26  ;;  %v742_v30 = vsel %vm549_vm1, %v738_v27, -inf }
 0x35e   : > { %743 = vmax.xlane.f32.xlu0 %v742_v30  ;;  %v751_v35 = vsel %vm549_vm1, %v741_v34, -inf }
 0x35f   : > { %v745_v32 = vsel %vm549_vm1, %v739_v29, -inf }
 0x360   : > { %746 = vmax.xlane.f32.xlu1 %v745_v32 }
 0x362   : > { %749 = vmax.xlane.f32.xlu0 %v748_v33 }
 0x366   : > { %752 = vmax.xlane.f32.xlu0 %v751_v35 }
 0x3eb   : > { %v744_v36 = vpop.xlane.xlu0 %743 }
 0x3ec   : > { %v754_v37 = vsub.f32 %v738_v27, %v744_v36 }
 0x3ed   : > { %v747_v38 = vpop.xlane.xlu1 %746 }
 0x3ee   : > { %v758_v41 = vmul.f32 1.442695, %v754_v37  ;;  %v755_v42 = vsub.f32 %v739_v29, %v747_v38 }
 0x3ef   : > { %v750_v39 = vpop.xlane.xlu0 %749 }
 0x3f0   : > { %v756_v40 = vsub.f32 %v740_v31, %v750_v39  ;;  %v760_v46 = vmul.f32 1.442695, %v755_v42 }
 0x3f2   : > { %v762_v43 = vmul.f32 1.442695, %v756_v40 }
 0x3f3   : > { %v753_v44 = vpop.xlane.xlu0 %752 }
 0x3f4   : > { %1277 = vpow2.f32 %v762_v43  ;;  %v757_v45 = vsub.f32 %v741_v34, %v753_v44 }
 0x3f5   : > { %1279 = vpow2.f32 %v758_v41 }
 0x3f6   : > { %v764_v47 = vmul.f32 1.442695, %v757_v45 }
 0x3f8   : > { %1281 = vpow2.f32 %v764_v47 }
 0x3f9   : > { %1283 = vpow2.f32 %v760_v46 }
 0x3fe   : > { %v1278_v19 = vpop.eup %1277 }
 0x3ff   : > { %v772_v48 = vsel %vm549_vm1, %v1278_v19, 0.0  ;;  %v1280_v49 = vpop.eup %1279 }
 0x400   : > { %773 = vadd.xlane.f32.xlu0 %v772_v48  ;;  %v766_v51 = vsel %vm549_vm1, %v1280_v49, 0.0 }
 0x402   : > { %v1282_v50 = vpop.eup %1281 }
 0x403   : > { %v775_v52 = vsel %vm549_vm1, %v1282_v50, 0.0  ;;  %v1284_v53 = vpop.eup %1283 }
 0x404   : > { %767 = vadd.xlane.f32.xlu0 %v766_v51  ;;  %776 = vadd.xlane.f32.xlu1 %v775_v52  ;;  %v769_v54 = vsel %vm549_vm1, %v1284_v53, 0.0 }
 0x408   : > { %770 = vadd.xlane.f32.xlu1 %v769_v54 }
 0x419   : > { %790 = vrot.lane.b32.xlu1 %v1601_v56, %s1381_s7 }
 0x41a   : > { %788 = vrot.lane.b32.xlu0 %v1599_v55, %s1381_s7 }
 0x48d   : > { %v774_v57 = vpop.xlane.xlu0 %773 }
 0x491   : > { %v768_v58 = vpop.xlane.xlu0 %767  ;;  %v777_v59 = vpop.xlane.xlu1 %776 }
 0x492   : > { %1285 = vrcp.f32 %v777_v59 }
 0x493   : > { %1287 = vrcp.f32 %v768_v58 }
 0x494   : > { %1289 = vrcp.f32 %v774_v57 }
 0x495   : > { %v771_v60 = vpop.xlane.xlu1 %770  ;;  %v789_v61 = vpop.permute.xlu0 %788 }
 0x496   : > { %1291 = vrcp.f32 %v771_v60  ;;  %1153 = vmatprep.subr.bf16.mxu0 %v789_v61 }
 0x497   : > { %1154 = vmatpush3.bf16.msra.mxu0 %v789_v61 }
 0x499   : > { %v791_v62 = vpop.permute.xlu1 %790 }
 0x49a   : > { %1155 = vmatprep.subr.bf16.mxu0 %v791_v62 }
 0x49b   : > { %1156 = vmatpush3.bf16.msra.mxu0 %v791_v62 }
 0x49c   : > { %v1286_v63 = vpop.eup %1285 }
 0x49d   : > { %v1288_v0 = vpop.eup %1287  ;;  %v785_v2 = vmul.f32 %v1286_v63, %v1282_v50 }
 0x49e   : > { %v1290_v56 = vpop.eup %1289  ;;  %v782_v55 = vmul.f32 %v1288_v0, %v1280_v49 }
 0x49f   : > { %v784_v4 = vmul.f32 %v1290_v56, %v1278_v19 }
 0x4a0   : > { %v1292_v1 = vpop.eup %1291 }
 0x4a1   : > { %v783_v3 = vmul.f32 %v1292_v1, %v1284_v53  ;;  %v787_v6 = vpack.c.bf16 %v785_v2, %v784_v4 }
 0x4a3   : > { %v786_v5 = vpack.c.bf16 %v783_v3, %v782_v55 }
 0x4a5   : > { %1157 = vmatprep.mubr.msk.bf16.mxu0 %vm549_vm1, %v786_v5 }
 0x4a6   : > { %1158 = vmatmul.mubr.msk.bf16.vlgmr.msra.gmra.mrb[4].mxu0 %vm549_vm1, %v787_v6 }
 0x579   : > { %v1159_v7 = vpop.f32.mrb[4].mxu0 }
 0x57a   : > { %v834_v8 = vpop.f32.mrb[5].mxu0 }
 0x57b   : > { %v1160_v9 = vpop.f32.mrb[6].mxu0 }
 0x57c   : > { %v850_v10 = vpack.c.bf16 %v1160_v9, %v1159_v7  ;;  %v837_v11 = vpop.f32.mrb[7].mxu0 }
 0x57d   : > { %v849_v12 = vpack.c.bf16 %v837_v11, %v834_v8 }
 0x57f   : > { %853 = vrot.lane.b32.xlu1 %v849_v12, %s1381_s7 }
 0x583   : > { %855 = vrot.lane.b32.xlu1 %v850_v10, %s1381_s7 }
 0x5f1   : > { %v854_v20 = vpop.permute.xlu1 %853 }
 0x5f2   : > { %v859_v21 = vsel %vm473_vm0, %v663_v18, %v854_v20 }
 0x5f3   : > { %v1104_v22 = vcombine.low %v859_v21, %v859_v21  ;;  %v1105_v23 = vcombine.high %v859_v21, %v859_v21  ;;  %887 = sbr.rel (!%p1520_p13) target bundleno = 1538 (0x602), region = 163 }
 0x5f5   : > { %877 = vst [vmem:[%s433_s15] sm:$0xf] %v1104_v22  ;;  %878 = vst [vmem:[%s433_s15 + $0x4] sm:$0xf] %v1105_v23  ;;  %v856_v24 = vpop.permute.xlu1 %855 }
 0x5f6   : > { %v862_v25 = vsel %vm473_vm0, %v664_v16, %v856_v24 }
 0x5f7   : > { %v1106_v26 = vcombine.low %v862_v25, %v862_v25  ;;  %v1107_v27 = vcombine.high %v862_v25, %v862_v25 }
 0x5f9   : > { %879 = vst [vmem:[%s433_s15 + $0x8] sm:$0xf] %v1106_v26  ;;  %880 = vst [vmem:[%s433_s15 + $0xc] sm:$0xf] %v1107_v27 }
 0x5fc   : > { %v907_v14 = vld [vmem:[%s433_s15] sm:$0xf]  ;;  %v909_v17 = vld [vmem:[%s433_s15 + $0x4] sm:$0xf] }
 0x5fd   : > { %908 = vst [vmem:[%s891_s6] sm:$0xf] %v907_v14  ;;  %910 = vst [vmem:[%s891_s6 + $0x8] sm:$0xf] %v909_v17 }
 0x600   : > { %v911_v18 = vld [vmem:[%s433_s15 + $0x8] sm:$0xf]  ;;  %v913_v28 = vld [vmem:[%s433_s15 + $0xc] sm:$0xf] }
 0x601   : > { %912 = vst [vmem:[%s891_s6 + $0x10] sm:$0xf] %v911_v18  ;;  %914 = vst [vmem:[%s891_s6 + $0x18] sm:$0xf] %v913_v28 }
 0x602 PF: > { %s14_s25 = sadd.s32 1, %s1379_s25   ;;  %s1720_s11 = sld [smem:[#allocation7_spill]] }
 0x603   : > { %p11_p5 = scmp.ge.s32.totalorder %s14_s25, 6   ;;  %s1721_s15 = smov %s1343_s16 }
 0x604   : > { %s1722_s16 = smov %s1525_s29  ;;  %s1723_s17 = smov %s1351_s18 }
 0x605   : > { %s1724_s18 = smov %s1503_s5  ;;  %s1725_s19 = smov %s1359_s20 }
 0x606   : > { %s1726_s20 = smov %s1500_s26  ;;  %s1727_s21 = smov %s1371_s23 }
 0x607   : > { %s1728_s22 = smov %s1375_s24  ;;  %s1729_s23 = smov %s1732_s27 }
 0x608   : > { %s1730_s24 = smov %s1720_s11  ;;  %13 = sbr.rel (!%p11_p5) target bundleno = 8 (0x8), region = 254 }

// kernel: bert_class_forward.17
= control target key start
LH: loop header
LB: loop body
LE: loop exit
PB: predicated region body
PF: predicated region fallthrough
CT: control target
= control target key end

     0   :  { %s1342_s12 = smov 0   ;;  %s1344_s13 = smov 0   ;;  %s1566_s0 = inlined_call_operand.vmem [shape: bf16[64,256], index: 0, kind: input, shape index: {}]   ;;  %s1567_s1 = inlined_call_operand.vmem [shape: bf16[256,768], index: 1, kind: input, shape index: {}]   ;;  %s1568_s2 = inlined_call_operand.vmem [shape: f32[1,768], index: 2, kind: input, shape index: {}]   ;;  %s1569_s3 = inlined_call_operand.vmem [shape: bf16[64,768], index: 3, kind: output, shape index: {}]  }
   0x1   :  { %s1346_s14 = smov 0   ;;  %s1348_s15 = smov 0  }
   0x2   :  { %s1350_s16 = smov 0  }
   0x3 LB: > { %s28_s17 = sadd.s32 1, %s1316_s15  ;;  %s1075_s18 = sadd.s32 4294967295, %s1320_s16   ;;  %s1320_s16 = sphi %s1350_s16, %s13_s16   ;;  %s1316_s15 = sphi %s1348_s15, %s1574_s15   ;;  %s1312_s14 = sphi %s1346_s14, %s1573_s14   ;;  %s1308_s13 = sphi %s1344_s13, %s1572_s13   ;;  %s1304_s12 = sphi %s1342_s12, %s1571_s12  }
   0x4   : > { %p30_p0 = scmp.ge.s32.totalorder %s28_s17, 3  ;;  %p76_p1 = scmp.ne.s32.totalorder %s1308_s13, %s1304_s12 }
   0x5   : > { %p77_p2 = scmp.eq.s32.totalorder %s1320_s16, 0  ;;  %p134_p4 = scmp.eq.s32.totalorder %s1075_s18, 2 }
   0x6   : > { %s1576_s17 = smov (%p30_p0, %s28_s17), 0  ;;  %s69_s20 = sadd.s32 1, %s1308_s13 }
   0x7   : > { %p78_p3 = por %p77_p2, %p76_p1  ;;  %s65_s19 = ssub.s32 %s1316_s15, %s1576_s17 }
   0x8   : > { %p67_p5 = scmp.eq.s32.totalorder %s65_s19, 0  ;;  %p1377_p6 = por %p134_p4, %p76_p1 }
   0x9   : > { %p1079_p7 = scmp.ge.s32.totalorder %s1320_s16, 3 }
   0xa   : > { %s1382_s22 = scalar_select %p67_p5, %s1308_s13, %s69_s20  }
   0xb   : > { %171 = sbr.rel (%p1079_p7) target bundleno = 38 (0x26), region = 20 }
  0x12   : > { %174 = sbr.rel (!%p78_p3) target bundleno = 38 (0x26), region = 24  ;;  %s176_s23 = sand.u32 (%p78_p3), 1, %s1308_s13  }
  0x13   : > { %s1140_s24 = sshll.u32 (%p78_p3), %s1316_s15, 3  ;;  %s1080_s25 = sshll.u32 (%p78_p3), %s176_s23, 8 }
  0x14   : > { %s1390_s28 = scalar_lea.vmem (%p78_p3), %s1567_s1, %s1140_s24  ;;  %s1395_s29 = scalar_lea.vmem (%p78_p3), [#allocation3], %s1080_s25 }
  0x15   : > { %v274_v0 = vld [vmem:[%s1390_s28] sm:$0xff] (%p78_p3)  ;;  %v276_v1 = vld [vmem:[%s1390_s28 + $0x18] sm:$0xff] (%p78_p3)  ;;  %v278_v2 = vld [vmem:[%s1390_s28 + $0x30] sm:$0xff] (%p78_p3) }
  0x16   : > { %275 = vst [vmem:[%s1395_s29] sm:$0xff] (%p78_p3), %v274_v0  ;;  %277 = vst [vmem:[%s1395_s29 + $0x8] sm:$0xff] (%p78_p3), %v276_v1  ;;  %v280_v3 = vld [vmem:[%s1390_s28 + $0x48] sm:$0xff] (%p78_p3)  ;;  %v282_v4 = vld [vmem:[%s1390_s28 + $0x60] sm:$0xff] (%p78_p3) }
  0x17   : > { %279 = vst [vmem:[%s1395_s29 + $0x10] sm:$0xff] (%p78_p3), %v278_v2  ;;  %v284_v5 = vld [vmem:[%s1390_s28 + $0x78] sm:$0xff] (%p78_p3)  ;;  %281 = vst [vmem:[%s1395_s29 + $0x18] sm:$0xff] (%p78_p3), %v280_v3  ;;  %v286_v6 = vld [vmem:[%s1390_s28 + $0x90] sm:$0xff] (%p78_p3) }
  0x18   : > { %283 = vst [vmem:[%s1395_s29 + $0x20] sm:$0xff] (%p78_p3), %v282_v4  ;;  %285 = vst [vmem:[%s1395_s29 + $0x28] sm:$0xff] (%p78_p3), %v284_v5  ;;  %v288_v7 = vld [vmem:[%s1390_s28 + $0xa8] sm:$0xff] (%p78_p3)  ;;  %v290_v8 = vld [vmem:[%s1390_s28 + $0xc0] sm:$0xff] (%p78_p3) }
  0x19   : > { %287 = vst [vmem:[%s1395_s29 + $0x30] sm:$0xff] %v286_v6  ;;  %289 = vst [vmem:[%s1395_s29 + $0x38] sm:$0xff] %v288_v7  ;;  %v292_v9 = vld [vmem:[%s1390_s28 + $0xd8] sm:$0xff]  ;;  %v294_v10 = vld [vmem:[%s1390_s28 + $0xf0] sm:$0xff] }
  0x1a   : > { %291 = vst [vmem:[%s1395_s29 + $0x40] sm:$0xff] %v290_v8  ;;  %v296_v11 = vld [vmem:[%s1390_s28 + $0x108] sm:$0xff]  ;;  %293 = vst [vmem:[%s1395_s29 + $0x48] sm:$0xff] %v292_v9  ;;  %v298_v12 = vld [vmem:[%s1390_s28 + $0x120] sm:$0xff] }
  0x1b   : > { %295 = vst [vmem:[%s1395_s29 + $0x50] sm:$0xff] %v294_v10  ;;  %297 = vst [vmem:[%s1395_s29 + $0x58] sm:$0xff] %v296_v11  ;;  %v300_v13 = vld [vmem:[%s1390_s28 + $0x138] sm:$0xff]  ;;  %v302_v14 = vld [vmem:[%s1390_s28 + $0x150] sm:$0xff] }
  0x1c   : > { %299 = vst [vmem:[%s1395_s29 + $0x60] sm:$0xff] %v298_v12  ;;  %301 = vst [vmem:[%s1395_s29 + $0x68] sm:$0xff] %v300_v13  ;;  %v304_v15 = vld [vmem:[%s1390_s28 + $0x168] sm:$0xff]  ;;  %v306_v16 = vld [vmem:[%s1390_s28 + $0x180] sm:$0xff] }
  0x1d   : > { %303 = vst [vmem:[%s1395_s29 + $0x70] sm:$0xff] %v302_v14  ;;  %v308_v17 = vld [vmem:[%s1390_s28 + $0x198] sm:$0xff]  ;;  %305 = vst [vmem:[%s1395_s29 + $0x78] sm:$0xff] %v304_v15  ;;  %v310_v18 = vld [vmem:[%s1390_s28 + $0x1b0] sm:$0xff] }
  0x1e   : > { %307 = vst [vmem:[%s1395_s29 + $0x80] sm:$0xff] %v306_v16  ;;  %309 = vst [vmem:[%s1395_s29 + $0x88] sm:$0xff] %v308_v17  ;;  %v312_v19 = vld [vmem:[%s1390_s28 + $0x1c8] sm:$0xff]  ;;  %v314_v20 = vld [vmem:[%s1390_s28 + $0x1e0] sm:$0xff] }
  0x1f   : > { %311 = vst [vmem:[%s1395_s29 + $0x90] sm:$0xff] %v310_v18  ;;  %313 = vst [vmem:[%s1395_s29 + $0x98] sm:$0xff] %v312_v19  ;;  %v316_v21 = vld [vmem:[%s1390_s28 + $0x1f8] sm:$0xff]  ;;  %v318_v22 = vld [vmem:[%s1390_s28 + $0x210] sm:$0xff] }
  0x20   : > { %315 = vst [vmem:[%s1395_s29 + $0xa0] sm:$0xff] %v314_v20  ;;  %v320_v23 = vld [vmem:[%s1390_s28 + $0x228] sm:$0xff]  ;;  %317 = vst [vmem:[%s1395_s29 + $0xa8] sm:$0xff] %v316_v21  ;;  %v322_v24 = vld [vmem:[%s1390_s28 + $0x240] sm:$0xff] }
  0x21   : > { %319 = vst [vmem:[%s1395_s29 + $0xb0] sm:$0xff] %v318_v22  ;;  %321 = vst [vmem:[%s1395_s29 + $0xb8] sm:$0xff] %v320_v23  ;;  %v324_v25 = vld [vmem:[%s1390_s28 + $0x258] sm:$0xff]  ;;  %v326_v26 = vld [vmem:[%s1390_s28 + $0x270] sm:$0xff] }
  0x22   : > { %323 = vst [vmem:[%s1395_s29 + $0xc0] sm:$0xff] %v322_v24  ;;  %325 = vst [vmem:[%s1395_s29 + $0xc8] sm:$0xff] %v324_v25  ;;  %v328_v27 = vld [vmem:[%s1390_s28 + $0x288] sm:$0xff]  ;;  %v330_v28 = vld [vmem:[%s1390_s28 + $0x2a0] sm:$0xff] }
  0x23   : > { %327 = vst [vmem:[%s1395_s29 + $0xd0] sm:$0xff] %v326_v26  ;;  %v332_v29 = vld [vmem:[%s1390_s28 + $0x2b8] sm:$0xff]  ;;  %329 = vst [vmem:[%s1395_s29 + $0xd8] sm:$0xff] %v328_v27  ;;  %v334_v30 = vld [vmem:[%s1390_s28 + $0x2d0] sm:$0xff] }
  0x24   : > { %331 = vst [vmem:[%s1395_s29 + $0xe0] sm:$0xff] %v330_v28  ;;  %333 = vst [vmem:[%s1395_s29 + $0xe8] sm:$0xff] %v332_v29  ;;  %v336_v31 = vld [vmem:[%s1390_s28 + $0x2e8] sm:$0xff] }
  0x25   : > { %335 = vst [vmem:[%s1395_s29 + $0xf0] sm:$0xff] %v334_v30  ;;  %337 = vst [vmem:[%s1395_s29 + $0xf8] sm:$0xff] %v336_v31 }
  0x26 PF: > { %p1083_p8 = scmp.ge.s32.totalorder %s1320_s16, 1  ;;  %p350_p9 = scmp.lt.s32.totalorder %s1320_s16, 4 }
  0x28   : > { %p351_p10 = pnand %p1083_p8, %p350_p9 }
  0x29   : > { %s357_s30 = sand.u32 (!%p351_p10), 1, %s1304_s12   ;;  %v1272_v32 = vld [vmem:[%s1566_s0 + $0x4] ss:$8 sps:$4 sm:$0xff] (!%p351_p10)   ;;  %v1270_v2 = vld [vmem:[%s1566_s0] ss:$8 sps:$4 sm:$0xff] (!%p351_p10)   ;;  %v816_v8 = vlaneseq (!%p351_p10) }
  0x2a   : > { %354 = sbr.rel (%p351_p10) target bundleno = 346 (0x15a), region = 66  ;;  %s1084_s4 = sshll.u32 (!%p351_p10), %s357_s30, 8  ;;  %v1275_v33 = vld [vmem:[%s1566_s0 + $0x24] ss:$8 sps:$4 sm:$0xff] (!%p351_p10)   ;;  %722 = vmatprep.mubr.bf16.mxu0 (!%p351_p10), %v1272_v32  ;;  %v1273_v3 = vld [vmem:[%s1566_s0 + $0x20] ss:$8 sps:$4 sm:$0xff] (!%p351_p10)  }
  0x2b   : > { %s1469_s9 = scalar_lea.vmem (!%p351_p10), [#allocation3], %s1084_s4  ;;  %742 = vmatprep.mubr.bf16.mxu1 (!%p351_p10), %v1275_v33  ;;  %v1276_v4 = vld [vmem:[%s1566_s0 + $0x14] ss:$8 sps:$4 sm:$0xff] (!%p351_p10)   ;;  %v1280_v6 = vld [vmem:[%s1566_s0 + $0x10] ss:$8 sps:$4 sm:$0xff] (!%p351_p10)   ;;  %s1086_s4 = sshll.u32 (!%p351_p10), %s1312_s14, 1 }
  0x2c   : > { %v1222_v34 = vld [vmem:[%s1469_s9 + $0x4] ss:$8 sps:$4 sm:$0xff] (!%p351_p10)   ;;  %v1224_v35 = vld [vmem:[%s1469_s9] ss:$8 sps:$4 sm:$0xff] (!%p351_p10)   ;;  %v1225_v36 = vld [vmem:[%s1469_s9 + $0x14] ss:$8 sps:$4 sm:$0xff] (!%p351_p10)  }
  0x2d   : > { %690 = vmatprep.subr.bf16.mxu0 (!%p351_p10), %v1222_v34  ;;  %1150 = vmatprep.subr.bf16.mxu1 (!%p351_p10), %v1222_v34  ;;  %v1227_v37 = vld [vmem:[%s1469_s9 + $0x10] ss:$8 sps:$4 sm:$0xff] (!%p351_p10)   ;;  %v1228_v38 = vld [vmem:[%s1469_s9 + $0x24] ss:$8 sps:$4 sm:$0xff] (!%p351_p10)   ;;  %v1230_v39 = vld [vmem:[%s1469_s9 + $0x20] ss:$8 sps:$4 sm:$0xff] (!%p351_p10)  }
  0x2e   : > { %691 = vmatpush1.bf16.msra.mxu0 (!%p351_p10), %v1224_v35  ;;  %1166 = vmatpush1.bf16.msra.mxu1 (!%p351_p10), %v1224_v35  ;;  %v1231_v40 = vld [vmem:[%s1469_s9 + $0x34] ss:$8 sps:$4 sm:$0xff] (!%p351_p10)   ;;  %v1233_v41 = vld [vmem:[%s1469_s9 + $0x30] ss:$8 sps:$4 sm:$0xff] (!%p351_p10)   ;;  %v1234_v42 = vld [vmem:[%s1469_s9 + $0x44] ss:$8 sps:$4 sm:$0xff] (!%p351_p10)  }
  0x2f   : > { %692 = vmatprep.subr.bf16.mxu0 (!%p351_p10), %v1225_v36  ;;  %1151 = vmatprep.subr.bf16.mxu1 (!%p351_p10), %v1225_v36  ;;  %v1236_v43 = vld [vmem:[%s1469_s9 + $0x40] ss:$8 sps:$4 sm:$0xff] (!%p351_p10)   ;;  %v1237_v44 = vld [vmem:[%s1469_s9 + $0x54] ss:$8 sps:$4 sm:$0xff] (!%p351_p10)   ;;  %v1239_v45 = vld [vmem:[%s1469_s9 + $0x50] ss:$8 sps:$4 sm:$0xff] (!%p351_p10)  }
  0x30   : > { %v1240_v46 = vld [vmem:[%s1469_s9 + $0x64] ss:$8 sps:$4 sm:$0xff] (!%p351_p10)   ;;  %v1242_v47 = vld [vmem:[%s1469_s9 + $0x60] ss:$8 sps:$4 sm:$0xff] (!%p351_p10)   ;;  %v1243_v48 = vld [vmem:[%s1469_s9 + $0x74] ss:$8 sps:$4 sm:$0xff] (!%p351_p10)  }
  0x31   : > { %v1245_v49 = vld [vmem:[%s1469_s9 + $0x70] ss:$8 sps:$4 sm:$0xff]   ;;  %v1246_v50 = vld [vmem:[%s1469_s9 + $0x84] ss:$8 sps:$4 sm:$0xff]   ;;  %v1248_v51 = vld [vmem:[%s1469_s9 + $0x80] ss:$8 sps:$4 sm:$0xff]  }
  0x32   : > { %693 = vmatpush1.bf16.msra.mxu0 %v1227_v37  ;;  %1167 = vmatpush1.bf16.msra.mxu1 %v1227_v37  ;;  %v1249_v52 = vld [vmem:[%s1469_s9 + $0x94] ss:$8 sps:$4 sm:$0xff]   ;;  %v1251_v53 = vld [vmem:[%s1469_s9 + $0x90] ss:$8 sps:$4 sm:$0xff]   ;;  %v1252_v54 = vld [vmem:[%s1469_s9 + $0xa4] ss:$8 sps:$4 sm:$0xff]  }
  0x33   : > { %694 = vmatprep.subr.bf16.mxu0 %v1228_v38  ;;  %1152 = vmatprep.subr.bf16.mxu1 %v1228_v38  ;;  %v1254_v55 = vld [vmem:[%s1469_s9 + $0xa0] ss:$8 sps:$4 sm:$0xff]   ;;  %v1255_v56 = vld [vmem:[%s1469_s9 + $0xb4] ss:$8 sps:$4 sm:$0xff]   ;;  %v1257_v57 = vld [vmem:[%s1469_s9 + $0xb0] ss:$8 sps:$4 sm:$0xff]  }
  0x34   : > { %v1258_v58 = vld [vmem:[%s1469_s9 + $0xc4] ss:$8 sps:$4 sm:$0xff]   ;;  %v1260_v59 = vld [vmem:[%s1469_s9 + $0xc0] ss:$8 sps:$4 sm:$0xff]   ;;  %v1261_v60 = vld [vmem:[%s1469_s9 + $0xd4] ss:$8 sps:$4 sm:$0xff]  }
  0x35   : > { %v1263_v61 = vld [vmem:[%s1469_s9 + $0xd0] ss:$8 sps:$4 sm:$0xff]   ;;  %v1264_v62 = vld [vmem:[%s1469_s9 + $0xe4] ss:$8 sps:$4 sm:$0xff]   ;;  %v1266_v63 = vld [vmem:[%s1469_s9 + $0xe0] ss:$8 sps:$4 sm:$0xff]  }
  0x36   : > { %695 = vmatpush1.bf16.msra.mxu0 %v1230_v39  ;;  %1168 = vmatpush1.bf16.msra.mxu1 %v1230_v39  ;;  %v1267_v0 = vld [vmem:[%s1469_s9 + $0xf4] ss:$8 sps:$4 sm:$0xff]   ;;  %v1269_v1 = vld [vmem:[%s1469_s9 + $0xf0] ss:$8 sps:$4 sm:$0xff]   ;;  %p408_p11 = scmp.lt.s32.totalorder %s1086_s4, 5  ;;  %v817_v9 = vshrl.u32 %v816_v8, 7 }
  0x37   : > { %696 = vmatprep.subr.bf16.mxu0 %v1231_v40  ;;  %1153 = vmatprep.subr.bf16.mxu1 %v1231_v40  ;;  %v1278_v5 = vld [vmem:[%s1566_s0 + $0x34] ss:$8 sps:$4 sm:$0xff]   ;;  %v1281_v7 = vld [vmem:[%s1566_s0 + $0x30] ss:$8 sps:$4 sm:$0xff]   ;;  %s1085_s8 = sshll.u32 %s357_s30, 6  ;;  %s1149_s12 = sshll.u32 (%p1377_p6), %s1312_s14, 3 }
  0x38   : > { %s1578_s4 = smov (!%p408_p11, %s1086_s4), 5  ;;  %v818_v10 = vsub.s32 0, %v817_v9  ;;  %v822_v12 = vsub.s32 1, %v817_v9  ;;  %s1527_s9 = scalar_lea.vmem [#allocation4], %s1085_s8 }
  0x39   : > { %s410_s7 = scalar_lea.vmem %s1568_s2, %s1578_s4  ;;  %s910_s11 = scalar_lea.vmem (%p1377_p6), %s1569_s3, %s1149_s12 }
  0x3a   : > { %697 = vmatpush1.bf16.msra.mxu0 %v1233_v41  ;;  %1169 = vmatpush1.bf16.msra.mxu1 %v1233_v41  ;;  %v814_v11 = vld [vmem:[%s410_s7] sm:$0x3] }
  0x3b   : > { %698 = vmatprep.subr.bf16.mxu0 %v1234_v42  ;;  %1154 = vmatprep.subr.bf16.mxu1 %v1234_v42  ;;  %v819_v13 = vrot.slane %v814_v11, %v818_v10  ;;  %v823_v14 = vrot.slane %v814_v11, %v822_v12 }
  0x3e   : > { %699 = vmatpush1.bf16.msra.mxu0 %v1236_v43  ;;  %1170 = vmatpush1.bf16.msra.mxu1 %v1236_v43 }
  0x3f   : > { %700 = vmatprep.subr.bf16.mxu0 %v1237_v44  ;;  %1155 = vmatprep.subr.bf16.mxu1 %v1237_v44 }
  0x42   : > { %701 = vmatpush1.bf16.msra.mxu0 %v1239_v45  ;;  %1171 = vmatpush1.bf16.msra.mxu1 %v1239_v45 }
  0x43   : > { %702 = vmatprep.subr.bf16.mxu0 %v1240_v46  ;;  %1156 = vmatprep.subr.bf16.mxu1 %v1240_v46 }
  0x46   : > { %703 = vmatpush1.bf16.msra.mxu0 %v1242_v47  ;;  %1172 = vmatpush1.bf16.msra.mxu1 %v1242_v47 }
  0x47   : > { %704 = vmatprep.subr.bf16.mxu0 %v1243_v48  ;;  %1157 = vmatprep.subr.bf16.mxu1 %v1243_v48 }
  0x4a   : > { %705 = vmatpush1.bf16.msra.mxu0 %v1245_v49  ;;  %1173 = vmatpush1.bf16.msra.mxu1 %v1245_v49 }
  0x4b   : > { %706 = vmatprep.subr.bf16.mxu0 %v1246_v50  ;;  %1158 = vmatprep.subr.bf16.mxu1 %v1246_v50 }
  0x4e   : > { %707 = vmatpush1.bf16.msra.mxu0 %v1248_v51  ;;  %1174 = vmatpush1.bf16.msra.mxu1 %v1248_v51 }
  0x4f   : > { %708 = vmatprep.subr.bf16.mxu0 %v1249_v52  ;;  %1159 = vmatprep.subr.bf16.mxu1 %v1249_v52 }
  0x52   : > { %709 = vmatpush1.bf16.msra.mxu0 %v1251_v53  ;;  %1175 = vmatpush1.bf16.msra.mxu1 %v1251_v53 }
  0x53   : > { %710 = vmatprep.subr.bf16.mxu0 %v1252_v54  ;;  %1160 = vmatprep.subr.bf16.mxu1 %v1252_v54 }
  0x56   : > { %711 = vmatpush1.bf16.msra.mxu0 %v1254_v55  ;;  %1176 = vmatpush1.bf16.msra.mxu1 %v1254_v55 }
  0x57   : > { %712 = vmatprep.subr.bf16.mxu0 %v1255_v56  ;;  %1161 = vmatprep.subr.bf16.mxu1 %v1255_v56 }
  0x5a   : > { %713 = vmatpush1.bf16.msra.mxu0 %v1257_v57  ;;  %1177 = vmatpush1.bf16.msra.mxu1 %v1257_v57 }
  0x5b   : > { %714 = vmatprep.subr.bf16.mxu0 %v1258_v58  ;;  %1162 = vmatprep.subr.bf16.mxu1 %v1258_v58 }
  0x5e   : > { %715 = vmatpush1.bf16.msra.mxu0 %v1260_v59  ;;  %1178 = vmatpush1.bf16.msra.mxu1 %v1260_v59 }
  0x5f   : > { %716 = vmatprep.subr.bf16.mxu0 %v1261_v60  ;;  %1163 = vmatprep.subr.bf16.mxu1 %v1261_v60 }
  0x62   : > { %717 = vmatpush1.bf16.msra.mxu0 %v1263_v61  ;;  %1179 = vmatpush1.bf16.msra.mxu1 %v1263_v61 }
  0x63   : > { %718 = vmatprep.subr.bf16.mxu0 %v1264_v62  ;;  %1164 = vmatprep.subr.bf16.mxu1 %v1264_v62 }
  0x66   : > { %719 = vmatpush1.bf16.msra.mxu0 %v1266_v63  ;;  %1180 = vmatpush1.bf16.msra.mxu1 %v1266_v63 }
  0x67   : > { %720 = vmatprep.subr.bf16.mxu0 %v1267_v0  ;;  %1165 = vmatprep.subr.bf16.mxu1 %v1267_v0 }
  0x6a   : > { %721 = vmatpush1.bf16.msra.mxu0 %v1269_v1  ;;  %1181 = vmatpush1.bf16.msra.mxu1 %v1269_v1 }
  0x6d   : > { %723 = vmatmul.mubr.bf16.vlgmr.msra.gmra.mrb[0].mxu0 %v1270_v2  ;;  %743 = vmatmul.mubr.bf16.vlgmr.msra.gmra.mrb[0].mxu1 %v1273_v3 }
  0x6e   : > { %732 = vmatprep.mubr.bf16.mxu0 %v1276_v4  ;;  %752 = vmatprep.mubr.bf16.mxu1 %v1278_v5 }
  0x75   : > { %733 = vmatmul.mubr.bf16.gmra.mrb[4].mxu0 %v1280_v6  ;;  %753 = vmatmul.mubr.bf16.gmra.mrb[4].mxu1 %v1281_v7 }
 0x140   : > { %v724_v15 = vpop.f32.mrb[0].mxu0  ;;  %v744_v16 = vpop.f32.mrb[0].mxu1 }
 0x141   : > { %v826_v17 = vadd.f32 %v819_v13, %v724_v15  ;;  %v834_v18 = vadd.f32 %v819_v13, %v744_v16  ;;  %v726_v19 = vpop.f32.mrb[1].mxu0  ;;  %v746_v20 = vpop.f32.mrb[1].mxu1 }
 0x142   : > { %v827_v21 = vadd.f32 %v823_v14, %v726_v19  ;;  %v835_v22 = vadd.f32 %v823_v14, %v746_v20  ;;  %v728_v23 = vpop.f32.mrb[2].mxu0  ;;  %v748_v24 = vpop.f32.mrb[2].mxu1 }
 0x143   : > { %v828_v25 = vadd.f32 %v819_v13, %v728_v23  ;;  %v836_v26 = vadd.f32 %v819_v13, %v748_v24  ;;  %v730_v27 = vpop.f32.mrb[3].mxu0  ;;  %v750_v28 = vpop.f32.mrb[3].mxu1 }
 0x144   : > { %v1141_v29 = vpack.c.bf16 %v827_v21, %v826_v17  ;;  %v1145_v30 = vpack.c.bf16 %v835_v22, %v834_v18  ;;  %v829_v31 = vadd.f32 %v823_v14, %v730_v27  ;;  %v837_v32 = vadd.f32 %v823_v14, %v750_v28 }
 0x146   : > { %890 = vst [vmem:[%s1527_s9] sm:$0xff] %v1141_v29  ;;  %894 = vst [vmem:[%s1527_s9 + $0x20] sm:$0xff] %v1145_v30  ;;  %v1142_v33 = vpack.c.bf16 %v829_v31, %v828_v25  ;;  %v1146_v34 = vpack.c.bf16 %v837_v32, %v836_v26 }
 0x148   : > { %891 = vst [vmem:[%s1527_s9 + $0x8] sm:$0xff] %v1142_v33  ;;  %895 = vst [vmem:[%s1527_s9 + $0x28] sm:$0xff] %v1146_v34  ;;  %v734_v35 = vpop.f32.mrb[4].mxu0  ;;  %v754_v36 = vpop.f32.mrb[4].mxu1 }
 0x149   : > { %v830_v37 = vadd.f32 %v819_v13, %v734_v35  ;;  %v838_v38 = vadd.f32 %v819_v13, %v754_v36  ;;  %v736_v39 = vpop.f32.mrb[5].mxu0  ;;  %v756_v40 = vpop.f32.mrb[5].mxu1 }
 0x14a   : > { %v831_v41 = vadd.f32 %v823_v14, %v736_v39  ;;  %v839_v42 = vadd.f32 %v823_v14, %v756_v40  ;;  %v738_v43 = vpop.f32.mrb[6].mxu0  ;;  %v758_v44 = vpop.f32.mrb[6].mxu1  ;;  %904 = sbr.rel (!%p1377_p6) target bundleno = 346 (0x15a), region = 82 }
 0x14b   : > { %v832_v45 = vadd.f32 %v819_v13, %v738_v43  ;;  %v840_v46 = vadd.f32 %v819_v13, %v758_v44  ;;  %v740_v47 = vpop.f32.mrb[7].mxu0  ;;  %v760_v48 = vpop.f32.mrb[7].mxu1 }
 0x14c   : > { %v1143_v49 = vpack.c.bf16 %v831_v41, %v830_v37  ;;  %v1147_v50 = vpack.c.bf16 %v839_v42, %v838_v38  ;;  %v833_v51 = vadd.f32 %v823_v14, %v740_v47  ;;  %v841_v52 = vadd.f32 %v823_v14, %v760_v48 }
 0x14d   : > { %v952_v55 = vld [vmem:[%s1527_s9] sm:$0xff] (%p1377_p6) }
 0x14e   : > { %892 = vst [vmem:[%s1527_s9 + $0x10] sm:$0xff] %v1143_v49  ;;  %896 = vst [vmem:[%s1527_s9 + $0x30] sm:$0xff] %v1147_v50  ;;  %v1144_v53 = vpack.c.bf16 %v833_v51, %v832_v45  ;;  %v1148_v54 = vpack.c.bf16 %v841_v52, %v840_v46  ;;  %v960_v59 = vld [vmem:[%s1527_s9 + $0x20] sm:$0xff] (%p1377_p6) }
 0x14f   : > { %v954_v56 = vld [vmem:[%s1527_s9 + $0x8] sm:$0xff] (%p1377_p6)  ;;  %953 = vst [vmem:[%s910_s11] sm:$0xff] (%p1377_p6), %v952_v55  ;;  %961 = vst [vmem:[%s910_s11 + $0x60] sm:$0xff] (%p1377_p6), %v960_v59 }
 0x150   : > { %893 = vst [vmem:[%s1527_s9 + $0x18] sm:$0xff] %v1144_v53  ;;  %897 = vst [vmem:[%s1527_s9 + $0x38] sm:$0xff] %v1148_v54  ;;  %v962_v60 = vld [vmem:[%s1527_s9 + $0x28] sm:$0xff] (%p1377_p6) }
 0x151   : > { %955 = vst [vmem:[%s910_s11 + $0x18] sm:$0xff] %v954_v56  ;;  %963 = vst [vmem:[%s910_s11 + $0x78] sm:$0xff] %v962_v60 }
 0x155   : > { %v956_v57 = vld [vmem:[%s1527_s9 + $0x10] sm:$0xff] }
 0x156   : > { %957 = vst [vmem:[%s910_s11 + $0x30] sm:$0xff] %v956_v57  ;;  %v964_v61 = vld [vmem:[%s1527_s9 + $0x30] sm:$0xff] }
 0x157   : > { %v958_v58 = vld [vmem:[%s1527_s9 + $0x18] sm:$0xff]  ;;  %965 = vst [vmem:[%s910_s11 + $0x90] sm:$0xff] %v964_v61 }
 0x158   : > { %959 = vst [vmem:[%s910_s11 + $0x48] sm:$0xff] %v958_v58  ;;  %v966_v62 = vld [vmem:[%s1527_s9 + $0x38] sm:$0xff] }
 0x159   : > { %967 = vst [vmem:[%s910_s11 + $0xa8] sm:$0xff] %v966_v62 }
 0x15a PF: > { %s13_s16 = sadd.s32 1, %s1320_s16   ;;  %s1571_s12 = smov %s1308_s13 }
 0x15b   : > { %p10_p12 = scmp.ge.s32.totalorder %s13_s16, 5   ;;  %s1572_s13 = smov %s1382_s22 }
 0x15c   : > { %s1573_s14 = smov %s1316_s15  ;;  %s1574_s15 = smov %s1576_s17 }
 0x15d   :  { %12 = sbr.rel (!%p10_p12) target bundleno = 3 (0x3), region = 157 }

// kernel: bert_class_forward.19
= control target key start
LH: loop header
LB: loop body
LE: loop exit
PB: predicated region body
PF: predicated region fallthrough
CT: control target
= control target key end

     0   :  { %v425_v40 = vlaneseq  ;;  %s1336_s1 = inlined_call_operand.vmem [shape: bf16[256,256], index: 1, kind: input, shape index: {}]   ;;  %s1337_s0 = inlined_call_operand.vmem [shape: bf16[64,256], index: 0, kind: input, shape index: {}]   ;;  %s1338_s2 = inlined_call_operand.vmem [shape: f32[1,256], index: 2, kind: input, shape index: {}]   ;;  %s1339_s3 = inlined_call_operand.vmem [shape: bf16[64,256], index: 3, kind: input, shape index: {}]   ;;  %s1340_s5 = inlined_call_operand.vmem [shape: f32[1,256], index: 5, kind: input, shape index: {}]   ;;  %s1341_s4 = inlined_call_operand.vmem [shape: f32[1,256], index: 4, kind: input, shape index: {}]   ;;  %s1342_s6 = inlined_call_operand.vmem [shape: bf16[64,256], index: 6, kind: output, shape index: {}]  }
   0x1   :  { %v840_v0 = vld [vmem:[%s1336_s1 + $0x4] ss:$8 sps:$4 sm:$0xff]   ;;  %v842_v1 = vld [vmem:[%s1336_s1] ss:$8 sps:$4 sm:$0xff]   ;;  %v843_v2 = vld [vmem:[%s1336_s1 + $0x14] ss:$8 sps:$4 sm:$0xff]  }
   0x2   :  { %299 = vmatprep.subr.bf16.mxu0 %v840_v0  ;;  %808 = vmatprep.subr.bf16.mxu1 %v840_v0  ;;  %v845_v3 = vld [vmem:[%s1336_s1 + $0x10] ss:$8 sps:$4 sm:$0xff]   ;;  %v846_v4 = vld [vmem:[%s1336_s1 + $0x24] ss:$8 sps:$4 sm:$0xff]   ;;  %v848_v5 = vld [vmem:[%s1336_s1 + $0x20] ss:$8 sps:$4 sm:$0xff]  }
   0x3   :  { %300 = vmatpush1.bf16.msra.mxu0 %v842_v1  ;;  %824 = vmatpush1.bf16.msra.mxu1 %v842_v1  ;;  %v849_v6 = vld [vmem:[%s1336_s1 + $0x34] ss:$8 sps:$4 sm:$0xff]   ;;  %v851_v7 = vld [vmem:[%s1336_s1 + $0x30] ss:$8 sps:$4 sm:$0xff]   ;;  %v852_v8 = vld [vmem:[%s1336_s1 + $0x44] ss:$8 sps:$4 sm:$0xff]  }
   0x4   :  { %301 = vmatprep.subr.bf16.mxu0 %v843_v2  ;;  %809 = vmatprep.subr.bf16.mxu1 %v843_v2  ;;  %v854_v9 = vld [vmem:[%s1336_s1 + $0x40] ss:$8 sps:$4 sm:$0xff]   ;;  %v855_v10 = vld [vmem:[%s1336_s1 + $0x54] ss:$8 sps:$4 sm:$0xff]   ;;  %v857_v11 = vld [vmem:[%s1336_s1 + $0x50] ss:$8 sps:$4 sm:$0xff]  }
   0x5   :  { %v858_v12 = vld [vmem:[%s1336_s1 + $0x64] ss:$8 sps:$4 sm:$0xff]   ;;  %v860_v14 = vld [vmem:[%s1336_s1 + $0x60] ss:$8 sps:$4 sm:$0xff]   ;;  %v861_v16 = vld [vmem:[%s1336_s1 + $0x74] ss:$8 sps:$4 sm:$0xff]  }
   0x6   :  { %v890_v13 = vld [vmem:[%s1337_s0 + $0x4] ss:$8 sps:$4 sm:$0xff]   ;;  %v863_v17 = vld [vmem:[%s1336_s1 + $0x70] ss:$8 sps:$4 sm:$0xff]   ;;  %v866_v19 = vld [vmem:[%s1336_s1 + $0x80] ss:$8 sps:$4 sm:$0xff]  }
   0x7   :  { %302 = vmatpush1.bf16.msra.mxu0 %v845_v3  ;;  %825 = vmatpush1.bf16.msra.mxu1 %v845_v3  ;;  %v893_v15 = vld [vmem:[%s1337_s0 + $0x24] ss:$8 sps:$4 sm:$0xff]   ;;  %v867_v20 = vld [vmem:[%s1336_s1 + $0x94] ss:$8 sps:$4 sm:$0xff]   ;;  %v869_v21 = vld [vmem:[%s1336_s1 + $0x90] ss:$8 sps:$4 sm:$0xff]  }
   0x8   :  { %303 = vmatprep.subr.bf16.mxu0 %v846_v4  ;;  %810 = vmatprep.subr.bf16.mxu1 %v846_v4  ;;  %v864_v18 = vld [vmem:[%s1336_s1 + $0x84] ss:$8 sps:$4 sm:$0xff]   ;;  %v872_v23 = vld [vmem:[%s1336_s1 + $0xa0] ss:$8 sps:$4 sm:$0xff]   ;;  %v873_v24 = vld [vmem:[%s1336_s1 + $0xb4] ss:$8 sps:$4 sm:$0xff]  }
   0x9   :  { %331 = vmatprep.mubr.bf16.mxu0 %v890_v13  ;;  %351 = vmatprep.mubr.bf16.mxu1 %v893_v15  ;;  %v870_v22 = vld [vmem:[%s1336_s1 + $0xa4] ss:$8 sps:$4 sm:$0xff]   ;;  %v875_v25 = vld [vmem:[%s1336_s1 + $0xb0] ss:$8 sps:$4 sm:$0xff]   ;;  %v878_v27 = vld [vmem:[%s1336_s1 + $0xc0] ss:$8 sps:$4 sm:$0xff]  }
   0xa   :  { %v876_v26 = vld [vmem:[%s1336_s1 + $0xc4] ss:$8 sps:$4 sm:$0xff]   ;;  %v879_v28 = vld [vmem:[%s1336_s1 + $0xd4] ss:$8 sps:$4 sm:$0xff]   ;;  %v881_v29 = vld [vmem:[%s1336_s1 + $0xd0] ss:$8 sps:$4 sm:$0xff]  }
   0xb   :  { %304 = vmatpush1.bf16.msra.mxu0 %v848_v5  ;;  %826 = vmatpush1.bf16.msra.mxu1 %v848_v5  ;;  %v882_v30 = vld [vmem:[%s1336_s1 + $0xe4] ss:$8 sps:$4 sm:$0xff]   ;;  %v884_v31 = vld [vmem:[%s1336_s1 + $0xe0] ss:$8 sps:$4 sm:$0xff]   ;;  %v885_v32 = vld [vmem:[%s1336_s1 + $0xf4] ss:$8 sps:$4 sm:$0xff]  }
   0xc   :  { %305 = vmatprep.subr.bf16.mxu0 %v849_v6  ;;  %811 = vmatprep.subr.bf16.mxu1 %v849_v6  ;;  %v887_v33 = vld [vmem:[%s1336_s1 + $0xf0] ss:$8 sps:$4 sm:$0xff]   ;;  %v888_v34 = vld [vmem:[%s1337_s0] ss:$8 sps:$4 sm:$0xff]   ;;  %v894_v36 = vld [vmem:[%s1337_s0 + $0x14] ss:$8 sps:$4 sm:$0xff]  }
   0xd   :  { %v891_v35 = vld [vmem:[%s1337_s0 + $0x20] ss:$8 sps:$4 sm:$0xff]   ;;  %v897_v37 = vld [vmem:[%s1337_s0 + $0x34] ss:$8 sps:$4 sm:$0xff]   ;;  %v896_v38 = vld [vmem:[%s1337_s0 + $0x10] ss:$8 sps:$4 sm:$0xff]  }
   0xe   :  { %v899_v39 = vld [vmem:[%s1337_s0 + $0x30] ss:$8 sps:$4 sm:$0xff]   ;;  %v426_v41 = vshrl.u32 %v425_v40, 7  ;;  %v423_v43 = vld [vmem:[%s1338_s2] sm:$0x3]  ;;  %v452_v49 = vld [vmem:[%s1339_s3 + $0x8] sm:$0xff] }
   0xf   :  { %306 = vmatpush1.bf16.msra.mxu0 %v851_v7  ;;  %827 = vmatpush1.bf16.msra.mxu1 %v851_v7  ;;  %v451_v45 = vld [vmem:[%s1339_s3] sm:$0xff]  ;;  %v456_v50 = vld [vmem:[%s1339_s3 + $0x28] sm:$0xff]  ;;  %v461_v61 = vunpack.c.l.bf16 %v452_v49  ;;  %v462_v3 = vunpack.c.h.bf16 %v452_v49 }
  0x10   :  { %307 = vmatprep.subr.bf16.mxu0 %v852_v8  ;;  %812 = vmatprep.subr.bf16.mxu1 %v852_v8  ;;  %v1071_v42 = vsub.s32 0, %v426_v41  ;;  %v1076_v44 = vsub.s32 1, %v426_v41  ;;  %v455_v47 = vld [vmem:[%s1339_s3 + $0x20] sm:$0xff]  ;;  %v459_v51 = vunpack.c.l.bf16 %v451_v45  ;;  %v460_v55 = vunpack.c.h.bf16 %v451_v45 }
  0x11   :  { %v467_v54 = vunpack.c.l.bf16 %v455_v47  ;;  %v468_v56 = vunpack.c.h.bf16 %v455_v47  ;;  %v469_v62 = vunpack.c.l.bf16 %v456_v50  ;;  %v470_v4 = vunpack.c.h.bf16 %v456_v50 }
  0x12   :  { %v1082_v46 = vrot.slane %v423_v43, %v1071_v42  ;;  %v1088_v48 = vrot.slane %v423_v43, %v1076_v44 }
  0x13   :  { %308 = vmatpush1.bf16.msra.mxu0 %v854_v9  ;;  %828 = vmatpush1.bf16.msra.mxu1 %v854_v9 }
  0x14   :  { %309 = vmatprep.subr.bf16.mxu0 %v855_v10  ;;  %813 = vmatprep.subr.bf16.mxu1 %v855_v10 }
  0x17   :  { %310 = vmatpush1.bf16.msra.mxu0 %v857_v11  ;;  %829 = vmatpush1.bf16.msra.mxu1 %v857_v11 }
  0x18   :  { %311 = vmatprep.subr.bf16.mxu0 %v858_v12  ;;  %814 = vmatprep.subr.bf16.mxu1 %v858_v12 }
  0x1b   :  { %312 = vmatpush1.bf16.msra.mxu0 %v860_v14  ;;  %830 = vmatpush1.bf16.msra.mxu1 %v860_v14 }
  0x1c   :  { %313 = vmatprep.subr.bf16.mxu0 %v861_v16  ;;  %815 = vmatprep.subr.bf16.mxu1 %v861_v16 }
  0x1f   :  { %314 = vmatpush1.bf16.msra.mxu0 %v863_v17  ;;  %831 = vmatpush1.bf16.msra.mxu1 %v863_v17 }
  0x20   :  { %315 = vmatprep.subr.bf16.mxu0 %v864_v18  ;;  %816 = vmatprep.subr.bf16.mxu1 %v864_v18 }
  0x23   :  { %316 = vmatpush1.bf16.msra.mxu0 %v866_v19  ;;  %832 = vmatpush1.bf16.msra.mxu1 %v866_v19 }
  0x24   :  { %317 = vmatprep.subr.bf16.mxu0 %v867_v20  ;;  %817 = vmatprep.subr.bf16.mxu1 %v867_v20  ;;  %v453_v20 = vld [vmem:[%s1339_s3 + $0x10] sm:$0xff] }
  0x27   :  { %318 = vmatpush1.bf16.msra.mxu0 %v869_v21  ;;  %833 = vmatpush1.bf16.msra.mxu1 %v869_v21 }
  0x28   :  { %319 = vmatprep.subr.bf16.mxu0 %v870_v22  ;;  %818 = vmatprep.subr.bf16.mxu1 %v870_v22 }
  0x2b   :  { %320 = vmatpush1.bf16.msra.mxu0 %v872_v23  ;;  %834 = vmatpush1.bf16.msra.mxu1 %v872_v23 }
  0x2c   :  { %321 = vmatprep.subr.bf16.mxu0 %v873_v24  ;;  %819 = vmatprep.subr.bf16.mxu1 %v873_v24 }
  0x2f   :  { %322 = vmatpush1.bf16.msra.mxu0 %v875_v25  ;;  %835 = vmatpush1.bf16.msra.mxu1 %v875_v25 }
  0x30   :  { %323 = vmatprep.subr.bf16.mxu0 %v876_v26  ;;  %820 = vmatprep.subr.bf16.mxu1 %v876_v26  ;;  %v463_v26 = vunpack.c.l.bf16 %v453_v20 }
  0x33   :  { %324 = vmatpush1.bf16.msra.mxu0 %v878_v27  ;;  %836 = vmatpush1.bf16.msra.mxu1 %v878_v27 }
  0x34   :  { %325 = vmatprep.subr.bf16.mxu0 %v879_v28  ;;  %821 = vmatprep.subr.bf16.mxu1 %v879_v28 }
  0x37   :  { %326 = vmatpush1.bf16.msra.mxu0 %v881_v29  ;;  %837 = vmatpush1.bf16.msra.mxu1 %v881_v29 }
  0x38   :  { %327 = vmatprep.subr.bf16.mxu0 %v882_v30  ;;  %822 = vmatprep.subr.bf16.mxu1 %v882_v30 }
  0x3b   :  { %328 = vmatpush1.bf16.msra.mxu0 %v884_v31  ;;  %838 = vmatpush1.bf16.msra.mxu1 %v884_v31 }
  0x3c   :  { %329 = vmatprep.subr.bf16.mxu0 %v885_v32  ;;  %823 = vmatprep.subr.bf16.mxu1 %v885_v32  ;;  %v464_v32 = vunpack.c.h.bf16 %v453_v20 }
  0x3f   :  { %330 = vmatpush1.bf16.msra.mxu0 %v887_v33  ;;  %839 = vmatpush1.bf16.msra.mxu1 %v887_v33 }
  0x42   :  { %332 = vmatmul.mubr.bf16.vlgmr.msra.gmra.mrb[0].mxu0 %v888_v34  ;;  %352 = vmatmul.mubr.bf16.vlgmr.msra.gmra.mrb[0].mxu1 %v891_v35  ;;  %v454_v34 = vld [vmem:[%s1339_s3 + $0x18] sm:$0xff] }
  0x43   :  { %341 = vmatprep.mubr.bf16.mxu0 %v894_v36  ;;  %361 = vmatprep.mubr.bf16.mxu1 %v897_v37  ;;  %v465_v43 = vunpack.c.l.bf16 %v454_v34 }
  0x4a   :  { %342 = vmatmul.mubr.bf16.gmra.mrb[4].mxu0 %v896_v38  ;;  %362 = vmatmul.mubr.bf16.gmra.mrb[4].mxu1 %v899_v39  ;;  %v457_v39 = vld [vmem:[%s1339_s3 + $0x30] sm:$0xff] }
 0x115   :  { %v333_v52 = vpop.f32.mrb[0].mxu0  ;;  %v353_v53 = vpop.f32.mrb[0].mxu1 }
 0x116   :  { %v435_v57 = vadd.f32 %v1082_v46, %v333_v52  ;;  %v443_v58 = vadd.f32 %v1082_v46, %v353_v53  ;;  %v335_v59 = vpop.f32.mrb[1].mxu0  ;;  %v355_v60 = vpop.f32.mrb[1].mxu1  ;;  %v466_v52 = vunpack.c.h.bf16 %v454_v34 }
 0x117   :  { %v436_v63 = vadd.f32 %v1088_v48, %v335_v59  ;;  %v444_v0 = vadd.f32 %v1088_v48, %v355_v60  ;;  %v337_v1 = vpop.f32.mrb[2].mxu0  ;;  %v357_v2 = vpop.f32.mrb[2].mxu1  ;;  %v458_v60 = vld [vmem:[%s1339_s3 + $0x38] sm:$0xff] }
 0x118   :  { %v1100_v5 = vadd.f32 %v459_v51, %v435_v57  ;;  %v437_v6 = vadd.f32 %v1082_v46, %v337_v1  ;;  %v445_v7 = vadd.f32 %v1082_v46, %v357_v2  ;;  %v339_v8 = vpop.f32.mrb[3].mxu0  ;;  %v359_v9 = vpop.f32.mrb[3].mxu1  ;;  %v1108_v13 = vadd.f32 %v467_v54, %v443_v58 }
 0x119   :  { %v1104_v10 = vadd.f32 %v460_v55, %v436_v63  ;;  %v438_v11 = vadd.f32 %v1088_v48, %v339_v8  ;;  %v446_v12 = vadd.f32 %v1088_v48, %v359_v9  ;;  %v1114_v16 = vadd.f32 %v468_v56, %v444_v0 }
 0x11a   :  { %v1110_v14 = vadd.f32 %v461_v61, %v437_v6  ;;  %v1112_v15 = vadd.f32 %v469_v62, %v445_v7  ;;  %v524_v45 = vmul.f32 %v1100_v5, %v1100_v5  ;;  %v471_v54 = vunpack.c.l.bf16 %v457_v39 }
 0x11b   :  { %v1116_v17 = vadd.f32 %v462_v3, %v438_v11  ;;  %v1118_v18 = vadd.f32 %v470_v4, %v446_v12  ;;  %v491_v19 = vadd.f32 %v1104_v10, %v1100_v5  ;;  %v503_v30 = vadd.f32 %v1114_v16, %v1108_v13 }
 0x11c   :  { %v526_v23 = vmul.f32 %v1110_v14, %v1110_v14  ;;  %v534_v40 = vmul.f32 %v1112_v15, %v1112_v15  ;;  %v525_v51 = vmul.f32 %v1104_v10, %v1104_v10  ;;  %v472_v55 = vunpack.c.h.bf16 %v457_v39 }
 0x11d   :  { %492 = vadd.xlane.f32.xlu0 %v491_v19  ;;  %v506_v21 = vadd.f32 %v1118_v18, %v1112_v15  ;;  %v343_v22 = vpop.f32.mrb[4].mxu0  ;;  %v527_v24 = vmul.f32 %v1116_v17, %v1116_v17  ;;  %v363_v25 = vpop.f32.mrb[4].mxu1  ;;  %v535_v41 = vmul.f32 %v1118_v18, %v1118_v18  ;;  %v494_v50 = vadd.f32 %v1116_v17, %v1110_v14 }
 0x11e   :  { %v345_v27 = vpop.f32.mrb[5].mxu0  ;;  %v365_v28 = vpop.f32.mrb[5].mxu1  ;;  %v439_v29 = vadd.f32 %v1082_v46, %v343_v22  ;;  %v447_v53 = vadd.f32 %v1082_v46, %v363_v25  ;;  %v540_v61 = vadd.f32 %v525_v51, %v524_v45  ;;  %v532_v63 = vmul.f32 %v1108_v13, %v1108_v13 }
 0x11f   :  { %507 = vadd.xlane.f32.xlu1 %v506_v21  ;;  %v440_v31 = vadd.f32 %v1088_v48, %v345_v27  ;;  %v347_v33 = vpop.f32.mrb[6].mxu0  ;;  %v367_v35 = vpop.f32.mrb[6].mxu1  ;;  %v543_v38 = vadd.f32 %v527_v24, %v526_v23  ;;  %v448_v58 = vadd.f32 %v1088_v48, %v365_v28  ;;  %v555_v59 = vadd.f32 %v535_v41, %v534_v40 }
 0x120   :  { %v349_v36 = vpop.f32.mrb[7].mxu0  ;;  %v369_v37 = vpop.f32.mrb[7].mxu1  ;;  %v1147_v47 = vadd.f32 %v463_v26, %v439_v29  ;;  %v441_v56 = vadd.f32 %v1082_v46, %v347_v33  ;;  %v533_v0 = vmul.f32 %v1114_v16, %v1114_v16  ;;  %v1168_v1 = vadd.f32 %v471_v54, %v447_v53 }
 0x121   :  { %504 = vadd.xlane.f32.xlu0 %v503_v30  ;;  %v1149_v49 = vadd.f32 %v464_v32, %v440_v31  ;;  %v442_v57 = vadd.f32 %v1088_v48, %v349_v36  ;;  %v449_v2 = vadd.f32 %v1082_v46, %v367_v35  ;;  %v473_v3 = vunpack.c.l.bf16 %v458_v60 }
 0x122   :  { %v474_v4 = vunpack.c.h.bf16 %v458_v60  ;;  %v1171_v6 = vadd.f32 %v465_v43, %v441_v56  ;;  %v1175_v8 = vadd.f32 %v472_v55, %v448_v58  ;;  %v450_v9 = vadd.f32 %v1088_v48, %v369_v37 }
 0x123   :  { %544 = vadd.xlane.f32.xlu1 %v543_v38  ;;  %v497_v62 = vadd.f32 %v1149_v49, %v1147_v47  ;;  %v1173_v7 = vadd.f32 %v466_v52, %v442_v57  ;;  %v552_v11 = vadd.f32 %v533_v0, %v532_v63  ;;  %v1178_v12 = vadd.f32 %v473_v3, %v449_v2 }
 0x124   :  { %v1180_v19 = vadd.f32 %v474_v4, %v450_v9  ;;  %v509_v20 = vadd.f32 %v1175_v8, %v1168_v1  ;;  %v528_v21 = vmul.f32 %v1147_v47, %v1147_v47  ;;  %v529_v48 = vmul.f32 %v1149_v49, %v1149_v49  ;;  %v664_v4 = vld [vmem:[%s1340_s5] sm:$0x3] }
 0x125   :  { %495 = vadd.xlane.f32.xlu0 %v494_v50  ;;  %v500_v46 = vadd.f32 %v1173_v7, %v1171_v6  ;;  %v530_v23 = vmul.f32 %v1171_v6, %v1171_v6  ;;  %v531_v24 = vmul.f32 %v1173_v7, %v1173_v7  ;;  %v536_v26 = vmul.f32 %v1168_v1, %v1168_v1  ;;  %v636_v9 = vld [vmem:[%s1341_s4] sm:$0x3] }
 0x126   :  { %v512_v22 = vadd.f32 %v1180_v19, %v1178_v12  ;;  %v546_v25 = vadd.f32 %v529_v48, %v528_v21  ;;  %v537_v27 = vmul.f32 %v1175_v8, %v1175_v8  ;;  %v538_v29 = vmul.f32 %v1178_v12, %v1178_v12 }
 0x127   :  { %556 = vadd.xlane.f32.xlu1 %v555_v59  ;;  %v549_v28 = vadd.f32 %v531_v24, %v530_v23  ;;  %v539_v30 = vmul.f32 %v1180_v19, %v1180_v19  ;;  %v1225_v21 = vrot.slane %v664_v4, %v1071_v42  ;;  %v1228_v23 = vrot.slane %v664_v4, %v1076_v44 }
 0x128   :  { %v558_v31 = vadd.f32 %v537_v27, %v536_v26  ;;  %v1231_v24 = vrot.slane %v636_v9, %v1071_v42 }
 0x129   :  { %541 = vadd.xlane.f32.xlu0 %v540_v61  ;;  %v561_v32 = vadd.f32 %v539_v30, %v538_v29 }
 0x12b   :  { %498 = vadd.xlane.f32.xlu1 %v497_v62 }
 0x12d   :  { %553 = vadd.xlane.f32.xlu0 %v552_v11 }
 0x12f   :  { %501 = vadd.xlane.f32.xlu1 %v500_v46 }
 0x131   :  { %510 = vadd.xlane.f32.xlu0 %v509_v20 }
 0x133   :  { %513 = vadd.xlane.f32.xlu1 %v512_v22 }
 0x135   :  { %547 = vadd.xlane.f32.xlu0 %v546_v25  ;;  %v1234_v25 = vrot.slane %v636_v9, %v1076_v44 }
 0x137   :  { %550 = vadd.xlane.f32.xlu1 %v549_v28 }
 0x139   :  { %559 = vadd.xlane.f32.xlu0 %v558_v31 }
 0x13b   :  { %562 = vadd.xlane.f32.xlu1 %v561_v32 }
 0x1aa   :  { %v493_v33 = vpop.xlane.xlu0 %492 }
 0x1ab   :  { %v1206_v39 = vmul.f32 0.00390625, %v493_v33 }
 0x1ac   :  { %v508_v34 = vpop.xlane.xlu1 %507 }
 0x1ad   :  { %v1204_v37 = vmul.f32 0.00390625, %v508_v34  ;;  %v572_v55 = vmul.f32 %v1206_v39, %v1206_v39  ;;  %v588_v27 = vsub.f32 %v1100_v5, %v1206_v39  ;;  %v589_v31 = vsub.f32 %v1104_v10, %v1206_v39 }
 0x1ae   :  { %v505_v35 = vpop.xlane.xlu0 %504 }
 0x1af   :  { %v577_v50 = vmul.f32 %v1204_v37, %v1204_v37  ;;  %v1212_v57 = vmul.f32 0.00390625, %v505_v35  ;;  %v598_v42 = vsub.f32 %v1112_v15, %v1204_v37  ;;  %v599_v33 = vsub.f32 %v1118_v18, %v1204_v37 }
 0x1b0   :  { %v545_v36 = vpop.xlane.xlu1 %544 }
 0x1b1   :  { %v565_v43 = vmul.f32 0.00390625, %v545_v36  ;;  %v576_v0 = vmul.f32 %v1212_v57, %v1212_v57  ;;  %v596_v5 = vsub.f32 %v1108_v13, %v1212_v57  ;;  %v597_v10 = vsub.f32 %v1114_v16, %v1212_v57 }
 0x1b2   :  { %v496_v38 = vpop.xlane.xlu0 %495 }
 0x1b3   :  { %v517_v40 = vmul.f32 0.00390625, %v496_v38 }
 0x1b4   :  { %v557_v41 = vpop.xlane.xlu1 %556 }
 0x1b5   :  { %v573_v45 = vmul.f32 %v517_v40, %v517_v40  ;;  %v569_v51 = vmul.f32 0.00390625, %v557_v41  ;;  %v590_v34 = vsub.f32 %v1110_v14, %v517_v40  ;;  %v591_v35 = vsub.f32 %v1116_v17, %v517_v40 }
 0x1b6   :  { %v542_v52 = vpop.xlane.xlu0 %541 }
 0x1b7   :  { %v581_v53 = vsub.f32 %v565_v43, %v573_v45  ;;  %v585_v54 = vsub.f32 %v569_v51, %v577_v50  ;;  %v564_v56 = vmul.f32 0.00390625, %v542_v52 }
 0x1b8   :  { %v499_v58 = vpop.xlane.xlu1 %498 }
 0x1b9   :  { %v605_v59 = vadd.f32 1e-05, %v581_v53  ;;  %v609_v60 = vadd.f32 1e-05, %v585_v54  ;;  %v580_v61 = vsub.f32 %v564_v56, %v572_v55  ;;  %v1222_v20 = vmul.f32 0.00390625, %v499_v58 }
 0x1ba   :  { %v554_v62 = vpop.xlane.xlu0 %553 }
 0x1bb   :  { %900 = vrsqrt.f32 %v605_v59  ;;  %v604_v63 = vadd.f32 1e-05, %v580_v61  ;;  %v568_v2 = vmul.f32 0.00390625, %v554_v62  ;;  %v574_v44 = vmul.f32 %v1222_v20, %v1222_v20 }
 0x1bc   :  { %902 = vrsqrt.f32 %v609_v60  ;;  %v502_v3 = vpop.xlane.xlu1 %501 }
 0x1bd   :  { %904 = vrsqrt.f32 %v604_v63  ;;  %v584_v11 = vsub.f32 %v568_v2, %v576_v0  ;;  %v1236_v26 = vmul.f32 0.00390625, %v502_v3 }
 0x1be   :  { %v511_v46 = vpop.xlane.xlu0 %510 }
 0x1bf   :  { %v608_v48 = vadd.f32 1e-05, %v584_v11  ;;  %v1240_v28 = vmul.f32 0.00390625, %v511_v46  ;;  %v575_v39 = vmul.f32 %v1236_v26, %v1236_v26 }
 0x1c0   :  { %v514_v22 = vpop.xlane.xlu1 %513 }
 0x1c1   :  { %906 = vrsqrt.f32 %v608_v48  ;;  %v1242_v29 = vmul.f32 0.00390625, %v514_v22  ;;  %v578_v13 = vmul.f32 %v1240_v28, %v1240_v28 }
 0x1c2   :  { %v548_v30 = vpop.xlane.xlu0 %547 }
 0x1c3   :  { %v566_v32 = vmul.f32 0.00390625, %v548_v30  ;;  %v579_v14 = vmul.f32 %v1242_v29, %v1242_v29 }
 0x1c4   :  { %v551_v36 = vpop.xlane.xlu1 %550 }
 0x1c5   :  { %v901_v38 = vpop.eup %900  ;;  %v582_v15 = vsub.f32 %v566_v32, %v574_v44  ;;  %v567_v41 = vmul.f32 0.00390625, %v551_v36 }
 0x1c6   :  { %v903_v43 = vpop.eup %902  ;;  %v622_v45 = vmul.f32 %v901_v38, %v590_v34  ;;  %v623_v18 = vmul.f32 %v901_v38, %v591_v35  ;;  %v560_v55 = vpop.xlane.xlu0 %559  ;;  %v592_v38 = vsub.f32 %v1147_v47, %v1222_v20 }
 0x1c7   :  { %v905_v17 = vpop.eup %904  ;;  %v630_v37 = vmul.f32 %v903_v43, %v598_v42  ;;  %v631_v40 = vmul.f32 %v903_v43, %v599_v33  ;;  %v606_v50 = vadd.f32 1e-05, %v582_v15  ;;  %v583_v51 = vsub.f32 %v567_v41, %v575_v39 }
 0x1c8   :  { %v650_v16 = vmul.f32 %v1231_v24, %v622_v45  ;;  %v651_v52 = vmul.f32 %v1234_v25, %v623_v18  ;;  %v620_v53 = vmul.f32 %v905_v17, %v588_v27  ;;  %v621_v54 = vmul.f32 %v905_v17, %v589_v31  ;;  %v563_v59 = vpop.xlane.xlu1 %562 }
 0x1c9   :  { %v658_v56 = vmul.f32 %v1231_v24, %v630_v37  ;;  %v659_v57 = vmul.f32 %v1234_v25, %v631_v40  ;;  %908 = vrsqrt.f32 %v606_v50  ;;  %v607_v58 = vadd.f32 1e-05, %v583_v51 }
 0x1ca   :  { %v678_v60 = vadd.f32 %v1225_v21, %v650_v16  ;;  %v679_v61 = vadd.f32 %v1228_v23, %v651_v52  ;;  %v648_v62 = vmul.f32 %v1231_v24, %v620_v53  ;;  %v649_v63 = vmul.f32 %v1234_v25, %v621_v54 }
 0x1cb   :  { %v686_v0 = vadd.f32 %v1225_v21, %v658_v56  ;;  %v687_v2 = vadd.f32 %v1228_v23, %v659_v57  ;;  %910 = vrsqrt.f32 %v607_v58  ;;  %v570_v3 = vmul.f32 0.00390625, %v560_v55  ;;  %v907_v4 = vpop.eup %906 }
 0x1cc   :  { %v801_v9 = vpack.c.bf16 %v679_v61, %v678_v60  ;;  %v676_v11 = vadd.f32 %v1225_v21, %v648_v62  ;;  %v677_v46 = vadd.f32 %v1228_v23, %v649_v63  ;;  %v571_v48 = vmul.f32 0.00390625, %v563_v59 }
 0x1cd   :  { %v805_v22 = vpack.c.bf16 %v687_v2, %v686_v0  ;;  %v628_v27 = vmul.f32 %v907_v4, %v596_v5  ;;  %v629_v30 = vmul.f32 %v907_v4, %v597_v10  ;;  %v586_v31 = vsub.f32 %v570_v3, %v578_v13 }
 0x1ce   :  { %741 = vst [vmem:[%s1342_s6 + $0x8] sm:$0xff] %v801_v9  ;;  %v800_v42 = vpack.c.bf16 %v677_v46, %v676_v11  ;;  %v587_v32 = vsub.f32 %v571_v48, %v579_v14  ;;  %v593_v10 = vsub.f32 %v1149_v49, %v1222_v20  ;;  %v594_v41 = vsub.f32 %v1171_v6, %v1236_v26 }
 0x1cf   :  { %745 = vst [vmem:[%s1342_s6 + $0x28] sm:$0xff] %v805_v22  ;;  %v656_v44 = vmul.f32 %v1231_v24, %v628_v27  ;;  %v657_v33 = vmul.f32 %v1234_v25, %v629_v30  ;;  %v610_v34 = vadd.f32 1e-05, %v586_v31  ;;  %v595_v43 = vsub.f32 %v1173_v7, %v1236_v26 }
 0x1d0   :  { %740 = vst [vmem:[%s1342_s6] sm:$0xff] %v800_v42  ;;  %v611_v5 = vadd.f32 1e-05, %v587_v32  ;;  %v600_v26 = vsub.f32 %v1168_v1, %v1240_v28  ;;  %v601_v40 = vsub.f32 %v1175_v8, %v1240_v28  ;;  %v602_v53 = vsub.f32 %v1178_v12, %v1242_v29 }
 0x1d1   :  { %v684_v35 = vadd.f32 %v1225_v21, %v656_v44  ;;  %v685_v36 = vadd.f32 %v1228_v23, %v657_v33  ;;  %912 = vrsqrt.f32 %v610_v34  ;;  %v603_v54 = vsub.f32 %v1180_v19, %v1242_v29 }
 0x1d2   :  { %914 = vrsqrt.f32 %v611_v5 }
 0x1d3   :  { %v909_v15 = vpop.eup %908  ;;  %v804_v39 = vpack.c.bf16 %v685_v36, %v684_v35 }
 0x1d4   :  { %v624_v45 = vmul.f32 %v909_v15, %v592_v38  ;;  %v625_v18 = vmul.f32 %v909_v15, %v593_v10 }
 0x1d5   :  { %v911_v13 = vpop.eup %910  ;;  %744 = vst [vmem:[%s1342_s6 + $0x20] sm:$0xff] %v804_v39 }
 0x1d6   :  { %v652_v47 = vmul.f32 %v1231_v24, %v624_v45  ;;  %v653_v49 = vmul.f32 %v1234_v25, %v625_v18  ;;  %v626_v20 = vmul.f32 %v911_v13, %v594_v41  ;;  %v627_v14 = vmul.f32 %v911_v13, %v595_v43 }
 0x1d8   :  { %v680_v17 = vadd.f32 %v1225_v21, %v652_v47  ;;  %v681_v6 = vadd.f32 %v1228_v23, %v653_v49  ;;  %v654_v37 = vmul.f32 %v1231_v24, %v626_v20  ;;  %v655_v7 = vmul.f32 %v1234_v25, %v627_v14 }
 0x1da   :  { %v802_v50 = vpack.c.bf16 %v681_v6, %v680_v17  ;;  %v682_v51 = vadd.f32 %v1225_v21, %v654_v37  ;;  %v683_v16 = vadd.f32 %v1228_v23, %v655_v7 }
 0x1db   :  { %v913_v52 = vpop.eup %912 }
 0x1dc   :  { %v915_v55 = vpop.eup %914  ;;  %742 = vst [vmem:[%s1342_s6 + $0x10] sm:$0xff] %v802_v50  ;;  %v803_v1 = vpack.c.bf16 %v683_v16, %v682_v51  ;;  %v632_v56 = vmul.f32 %v913_v52, %v600_v26  ;;  %v633_v8 = vmul.f32 %v913_v52, %v601_v40 }
 0x1dd   :  { %v634_v28 = vmul.f32 %v915_v55, %v602_v53  ;;  %v635_v57 = vmul.f32 %v915_v55, %v603_v54 }
 0x1de   :  { %743 = vst [vmem:[%s1342_s6 + $0x18] sm:$0xff] %v803_v1  ;;  %v660_v58 = vmul.f32 %v1231_v24, %v632_v56  ;;  %v661_v12 = vmul.f32 %v1234_v25, %v633_v8 }
 0x1df   :  { %v662_v19 = vmul.f32 %v1231_v24, %v634_v28  ;;  %v663_v29 = vmul.f32 %v1234_v25, %v635_v57 }
 0x1e0   :  { %v688_v59 = vadd.f32 %v1225_v21, %v660_v58  ;;  %v689_v60 = vadd.f32 %v1228_v23, %v661_v12 }
 0x1e1   :  { %v690_v61 = vadd.f32 %v1225_v21, %v662_v19  ;;  %v691_v62 = vadd.f32 %v1228_v23, %v663_v29 }
 0x1e2   :  { %v806_v63 = vpack.c.bf16 %v689_v60, %v688_v59 }
 0x1e3   :  { %v807_v0 = vpack.c.bf16 %v691_v62, %v690_v61 }
 0x1e4   :  { %746 = vst [vmem:[%s1342_s6 + $0x30] sm:$0xff] %v806_v63 }
 0x1e5   :  { %747 = vst [vmem:[%s1342_s6 + $0x38] sm:$0xff] %v807_v0 }

// kernel: bert_class_forward.21
= control target key start
LH: loop header
LB: loop body
LE: loop exit
PB: predicated region body
PF: predicated region fallthrough
CT: control target
= control target key end

     0   :  { %s1853_s1 = inlined_call_operand.vmem [shape: bf16[512,256], index: 1, kind: input, shape index: {}]   ;;  %s1854_s0 = inlined_call_operand.vmem [shape: bf16[64,512], index: 0, kind: input, shape index: {}]   ;;  %s1855_s2 = inlined_call_operand.vmem [shape: f32[1,256], index: 2, kind: input, shape index: {}]   ;;  %s1856_s3 = inlined_call_operand.vmem [shape: bf16[64,256], index: 3, kind: input, shape index: {}]   ;;  %s1857_s4 = inlined_call_operand.vmem [shape: f32[1,256], index: 4, kind: input, shape index: {}]   ;;  %s1858_s5 = inlined_call_operand.vmem [shape: f32[1,256], index: 5, kind: input, shape index: {}]   ;;  %s1859_s6 = inlined_call_operand.vmem [shape: bf16[64,256], index: 6, kind: output, shape index: {}]  }
   0x1   :  { %v1177_v0 = vld [vmem:[%s1853_s1 + $0x4] ss:$8 sps:$4 sm:$0xff]   ;;  %v1181_v2 = vld [vmem:[%s1853_s1] ss:$8 sps:$4 sm:$0xff]   ;;  %v1183_v4 = vld [vmem:[%s1853_s1 + $0x14] ss:$8 sps:$4 sm:$0xff]  }
   0x2   :  { %v1179_v1 = vld [vmem:[%s1853_s1 + $0x104] ss:$8 sps:$4 sm:$0xff]   ;;  %539 = vmatprep.subr.bf16.mxu1 %v1177_v0  ;;  %v1182_v3 = vld [vmem:[%s1853_s1 + $0x100] ss:$8 sps:$4 sm:$0xff]   ;;  %v1185_v5 = vld [vmem:[%s1853_s1 + $0x114] ss:$8 sps:$4 sm:$0xff]  }
   0x3   :  { %612 = vmatprep.subr.bf16.mxu0 %v1179_v1  ;;  %540 = vmatpush1.bf16.msra.mxu1 %v1181_v2  ;;  %v1187_v6 = vld [vmem:[%s1853_s1 + $0x10] ss:$8 sps:$4 sm:$0xff]   ;;  %v1189_v8 = vld [vmem:[%s1853_s1 + $0x24] ss:$8 sps:$4 sm:$0xff]   ;;  %v1193_v10 = vld [vmem:[%s1853_s1 + $0x20] ss:$8 sps:$4 sm:$0xff]  }
   0x4   :  { %613 = vmatpush1.bf16.msra.mxu0 %v1182_v3  ;;  %541 = vmatprep.subr.bf16.mxu1 %v1183_v4  ;;  %v1188_v7 = vld [vmem:[%s1853_s1 + $0x110] ss:$8 sps:$4 sm:$0xff]   ;;  %v1191_v9 = vld [vmem:[%s1853_s1 + $0x124] ss:$8 sps:$4 sm:$0xff]   ;;  %v1194_v11 = vld [vmem:[%s1853_s1 + $0x120] ss:$8 sps:$4 sm:$0xff]  }
   0x5   :  { %614 = vmatprep.subr.bf16.mxu0 %v1185_v5  ;;  %v1195_v12 = vld [vmem:[%s1853_s1 + $0x34] ss:$8 sps:$4 sm:$0xff]   ;;  %v1199_v14 = vld [vmem:[%s1853_s1 + $0x30] ss:$8 sps:$4 sm:$0xff]   ;;  %v1201_v16 = vld [vmem:[%s1853_s1 + $0x44] ss:$8 sps:$4 sm:$0xff]  }
   0x6   :  { %v1197_v13 = vld [vmem:[%s1853_s1 + $0x134] ss:$8 sps:$4 sm:$0xff]   ;;  %v1200_v15 = vld [vmem:[%s1853_s1 + $0x130] ss:$8 sps:$4 sm:$0xff]   ;;  %v1203_v17 = vld [vmem:[%s1853_s1 + $0x144] ss:$8 sps:$4 sm:$0xff]  }
   0x7   :  { %542 = vmatpush1.bf16.msra.mxu1 %v1187_v6  ;;  %v1205_v18 = vld [vmem:[%s1853_s1 + $0x40] ss:$8 sps:$4 sm:$0xff]   ;;  %v1207_v20 = vld [vmem:[%s1853_s1 + $0x54] ss:$8 sps:$4 sm:$0xff]   ;;  %v1211_v22 = vld [vmem:[%s1853_s1 + $0x50] ss:$8 sps:$4 sm:$0xff]  }
   0x8   :  { %615 = vmatpush1.bf16.msra.mxu0 %v1188_v7  ;;  %543 = vmatprep.subr.bf16.mxu1 %v1189_v8  ;;  %v1206_v19 = vld [vmem:[%s1853_s1 + $0x140] ss:$8 sps:$4 sm:$0xff]   ;;  %v1209_v21 = vld [vmem:[%s1853_s1 + $0x154] ss:$8 sps:$4 sm:$0xff]   ;;  %v1212_v23 = vld [vmem:[%s1853_s1 + $0x150] ss:$8 sps:$4 sm:$0xff]  }
   0x9   :  { %616 = vmatprep.subr.bf16.mxu0 %v1191_v9  ;;  %v1213_v24 = vld [vmem:[%s1853_s1 + $0x64] ss:$8 sps:$4 sm:$0xff]   ;;  %v1217_v26 = vld [vmem:[%s1853_s1 + $0x60] ss:$8 sps:$4 sm:$0xff]   ;;  %v1219_v28 = vld [vmem:[%s1853_s1 + $0x74] ss:$8 sps:$4 sm:$0xff]  }
   0xa   :  { %v1215_v25 = vld [vmem:[%s1853_s1 + $0x164] ss:$8 sps:$4 sm:$0xff]   ;;  %v1218_v27 = vld [vmem:[%s1853_s1 + $0x160] ss:$8 sps:$4 sm:$0xff]   ;;  %v1221_v29 = vld [vmem:[%s1853_s1 + $0x174] ss:$8 sps:$4 sm:$0xff]  }
   0xb   :  { %544 = vmatpush1.bf16.msra.mxu1 %v1193_v10  ;;  %v1223_v30 = vld [vmem:[%s1853_s1 + $0x70] ss:$8 sps:$4 sm:$0xff]   ;;  %v1225_v32 = vld [vmem:[%s1853_s1 + $0x84] ss:$8 sps:$4 sm:$0xff]   ;;  %v1229_v34 = vld [vmem:[%s1853_s1 + $0x80] ss:$8 sps:$4 sm:$0xff]  }
   0xc   :  { %617 = vmatpush1.bf16.msra.mxu0 %v1194_v11  ;;  %545 = vmatprep.subr.bf16.mxu1 %v1195_v12  ;;  %v1224_v31 = vld [vmem:[%s1853_s1 + $0x170] ss:$8 sps:$4 sm:$0xff]   ;;  %v1227_v33 = vld [vmem:[%s1853_s1 + $0x184] ss:$8 sps:$4 sm:$0xff]   ;;  %v1230_v35 = vld [vmem:[%s1853_s1 + $0x180] ss:$8 sps:$4 sm:$0xff]  }
   0xd   :  { %618 = vmatprep.subr.bf16.mxu0 %v1197_v13  ;;  %v1231_v36 = vld [vmem:[%s1853_s1 + $0x94] ss:$8 sps:$4 sm:$0xff]   ;;  %v1235_v38 = vld [vmem:[%s1853_s1 + $0x90] ss:$8 sps:$4 sm:$0xff]   ;;  %v1237_v40 = vld [vmem:[%s1853_s1 + $0xa4] ss:$8 sps:$4 sm:$0xff]  }
   0xe   :  { %v1233_v37 = vld [vmem:[%s1853_s1 + $0x194] ss:$8 sps:$4 sm:$0xff]   ;;  %v1236_v39 = vld [vmem:[%s1853_s1 + $0x190] ss:$8 sps:$4 sm:$0xff]   ;;  %v1239_v41 = vld [vmem:[%s1853_s1 + $0x1a4] ss:$8 sps:$4 sm:$0xff]  }
   0xf   :  { %546 = vmatpush1.bf16.msra.mxu1 %v1199_v14  ;;  %v1241_v42 = vld [vmem:[%s1853_s1 + $0xa0] ss:$8 sps:$4 sm:$0xff]   ;;  %v1243_v44 = vld [vmem:[%s1853_s1 + $0xb4] ss:$8 sps:$4 sm:$0xff]   ;;  %v1247_v46 = vld [vmem:[%s1853_s1 + $0xb0] ss:$8 sps:$4 sm:$0xff]  }
  0x10   :  { %619 = vmatpush1.bf16.msra.mxu0 %v1200_v15  ;;  %547 = vmatprep.subr.bf16.mxu1 %v1201_v16  ;;  %v1242_v43 = vld [vmem:[%s1853_s1 + $0x1a0] ss:$8 sps:$4 sm:$0xff]   ;;  %v1245_v45 = vld [vmem:[%s1853_s1 + $0x1b4] ss:$8 sps:$4 sm:$0xff]   ;;  %v1248_v47 = vld [vmem:[%s1853_s1 + $0x1b0] ss:$8 sps:$4 sm:$0xff]   ;;  %v738_v16 = vlaneseq }
  0x11   :  { %620 = vmatprep.subr.bf16.mxu0 %v1203_v17  ;;  %v1249_v48 = vld [vmem:[%s1853_s1 + $0xc4] ss:$8 sps:$4 sm:$0xff]   ;;  %v1253_v52 = vld [vmem:[%s1853_s1 + $0xc0] ss:$8 sps:$4 sm:$0xff]   ;;  %v1255_v54 = vld [vmem:[%s1853_s1 + $0xd4] ss:$8 sps:$4 sm:$0xff]  }
  0x12   :  { %v1275_v49 = vld [vmem:[%s1854_s0 + $0x4] ss:$16 sps:$4 sm:$0xff]   ;;  %v1278_v51 = vld [vmem:[%s1854_s0 + $0xc] ss:$16 sps:$4 sm:$0xff]   ;;  %v1254_v53 = vld [vmem:[%s1853_s1 + $0x1c0] ss:$8 sps:$4 sm:$0xff]  }
  0x13   :  { %548 = vmatpush1.bf16.msra.mxu1 %v1205_v18  ;;  %v1251_v50 = vld [vmem:[%s1853_s1 + $0x1c4] ss:$8 sps:$4 sm:$0xff]   ;;  %571 = vmatprep.mubr.bf16.mxu1 %v1275_v49  ;;  %v1257_v55 = vld [vmem:[%s1853_s1 + $0x1d4] ss:$8 sps:$4 sm:$0xff]   ;;  %v1259_v56 = vld [vmem:[%s1853_s1 + $0xd0] ss:$8 sps:$4 sm:$0xff]  }
  0x14   :  { %621 = vmatpush1.bf16.msra.mxu0 %v1206_v19  ;;  %549 = vmatprep.subr.bf16.mxu1 %v1207_v20  ;;  %v1260_v57 = vld [vmem:[%s1853_s1 + $0x1d0] ss:$8 sps:$4 sm:$0xff]   ;;  %v1261_v58 = vld [vmem:[%s1853_s1 + $0xe4] ss:$8 sps:$4 sm:$0xff]   ;;  %v1265_v60 = vld [vmem:[%s1853_s1 + $0xe0] ss:$8 sps:$4 sm:$0xff]  }
  0x15   :  { %622 = vmatprep.subr.bf16.mxu0 %v1209_v21  ;;  %644 = vmatprep.mubr.bf16.mxu0 %v1278_v51  ;;  %v1263_v59 = vld [vmem:[%s1853_s1 + $0x1e4] ss:$8 sps:$4 sm:$0xff]   ;;  %v1266_v61 = vld [vmem:[%s1853_s1 + $0x1e0] ss:$8 sps:$4 sm:$0xff]   ;;  %v1267_v62 = vld [vmem:[%s1853_s1 + $0xf4] ss:$8 sps:$4 sm:$0xff]  }
  0x16   :  { %v1269_v63 = vld [vmem:[%s1853_s1 + $0x1f4] ss:$8 sps:$4 sm:$0xff]   ;;  %v1271_v0 = vld [vmem:[%s1853_s1 + $0xf0] ss:$8 sps:$4 sm:$0xff]   ;;  %v739_v17 = vshrl.u32 %v738_v16, 7  ;;  %v764_v21 = vld [vmem:[%s1856_s3] sm:$0xff] }
  0x17   :  { %550 = vmatpush1.bf16.msra.mxu1 %v1211_v22  ;;  %v1272_v1 = vld [vmem:[%s1853_s1 + $0x1f0] ss:$8 sps:$4 sm:$0xff]   ;;  %v1279_v4 = vld [vmem:[%s1854_s0 + $0x24] ss:$16 sps:$4 sm:$0xff]   ;;  %v1281_v5 = vld [vmem:[%s1854_s0 + $0x2c] ss:$16 sps:$4 sm:$0xff]  }
  0x18   :  { %623 = vmatpush1.bf16.msra.mxu0 %v1212_v23  ;;  %551 = vmatprep.subr.bf16.mxu1 %v1213_v24  ;;  %v1273_v2 = vld [vmem:[%s1854_s0] ss:$16 sps:$4 sm:$0xff]   ;;  %v1276_v3 = vld [vmem:[%s1854_s0 + $0x8] ss:$16 sps:$4 sm:$0xff]   ;;  %v1285_v8 = vld [vmem:[%s1854_s0 + $0x44] ss:$16 sps:$4 sm:$0xff]  }
  0x19   :  { %624 = vmatprep.subr.bf16.mxu0 %v1215_v25  ;;  %v1283_v6 = vld [vmem:[%s1854_s0 + $0x20] ss:$16 sps:$4 sm:$0xff]   ;;  %v1284_v7 = vld [vmem:[%s1854_s0 + $0x28] ss:$16 sps:$4 sm:$0xff]   ;;  %v1287_v9 = vld [vmem:[%s1854_s0 + $0x4c] ss:$16 sps:$4 sm:$0xff]  }
  0x1a   :  { %v1289_v10 = vld [vmem:[%s1854_s0 + $0x40] ss:$16 sps:$4 sm:$0xff]   ;;  %v1290_v11 = vld [vmem:[%s1854_s0 + $0x48] ss:$16 sps:$4 sm:$0xff]   ;;  %v1291_v12 = vld [vmem:[%s1854_s0 + $0x64] ss:$16 sps:$4 sm:$0xff]  }
  0x1b   :  { %552 = vmatpush1.bf16.msra.mxu1 %v1217_v26  ;;  %v1293_v13 = vld [vmem:[%s1854_s0 + $0x6c] ss:$16 sps:$4 sm:$0xff]   ;;  %v1295_v14 = vld [vmem:[%s1854_s0 + $0x60] ss:$16 sps:$4 sm:$0xff]   ;;  %v1296_v15 = vld [vmem:[%s1854_s0 + $0x68] ss:$16 sps:$4 sm:$0xff]  }
  0x1c   :  { %625 = vmatpush1.bf16.msra.mxu0 %v1218_v27  ;;  %553 = vmatprep.subr.bf16.mxu1 %v1219_v28  ;;  %v1588_v18 = vsub.s32 0, %v739_v17  ;;  %v736_v19 = vld [vmem:[%s1855_s2] sm:$0x3]  ;;  %v1593_v20 = vsub.s32 1, %v739_v17  ;;  %v765_v26 = vld [vmem:[%s1856_s3 + $0x8] sm:$0xff]  ;;  %v767_v49 = vld [vmem:[%s1856_s3 + $0x18] sm:$0xff] }
  0x1d   :  { %626 = vmatprep.subr.bf16.mxu0 %v1221_v29  ;;  %v768_v16 = vld [vmem:[%s1856_s3 + $0x20] sm:$0xff] }
  0x1e   :  { %v1599_v22 = vrot.slane %v736_v19, %v1588_v18  ;;  %v1602_v25 = vrot.slane %v736_v19, %v1593_v20  ;;  %v769_v19 = vld [vmem:[%s1856_s3 + $0x28] sm:$0xff] }
  0x1f   :  { %554 = vmatpush1.bf16.msra.mxu1 %v1223_v30  ;;  %v772_v30 = vunpack.c.l.bf16 %v764_v21 }
  0x20   :  { %627 = vmatpush1.bf16.msra.mxu0 %v1224_v31  ;;  %555 = vmatprep.subr.bf16.mxu1 %v1225_v32 }
  0x21   :  { %628 = vmatprep.subr.bf16.mxu0 %v1227_v33 }
  0x23   :  { %556 = vmatpush1.bf16.msra.mxu1 %v1229_v34  ;;  %v773_v34 = vunpack.c.h.bf16 %v764_v21 }
  0x24   :  { %629 = vmatpush1.bf16.msra.mxu0 %v1230_v35  ;;  %557 = vmatprep.subr.bf16.mxu1 %v1231_v36 }
  0x25   :  { %630 = vmatprep.subr.bf16.mxu0 %v1233_v37  ;;  %v774_v37 = vunpack.c.l.bf16 %v765_v26 }
  0x27   :  { %558 = vmatpush1.bf16.msra.mxu1 %v1235_v38 }
  0x28   :  { %631 = vmatpush1.bf16.msra.mxu0 %v1236_v39  ;;  %559 = vmatprep.subr.bf16.mxu1 %v1237_v40 }
  0x29   :  { %632 = vmatprep.subr.bf16.mxu0 %v1239_v41 }
  0x2b   :  { %560 = vmatpush1.bf16.msra.mxu1 %v1241_v42  ;;  %v775_v42 = vunpack.c.h.bf16 %v765_v26 }
  0x2c   :  { %633 = vmatpush1.bf16.msra.mxu0 %v1242_v43  ;;  %561 = vmatprep.subr.bf16.mxu1 %v1243_v44 }
  0x2d   :  { %634 = vmatprep.subr.bf16.mxu0 %v1245_v45 }
  0x2f   :  { %562 = vmatpush1.bf16.msra.mxu1 %v1247_v46  ;;  %v766_v46 = vld [vmem:[%s1856_s3 + $0x10] sm:$0xff] }
  0x30   :  { %635 = vmatpush1.bf16.msra.mxu0 %v1248_v47  ;;  %563 = vmatprep.subr.bf16.mxu1 %v1249_v48 }
  0x31   :  { %636 = vmatprep.subr.bf16.mxu0 %v1251_v50 }
  0x33   :  { %564 = vmatpush1.bf16.msra.mxu1 %v1253_v52 }
  0x34   :  { %637 = vmatpush1.bf16.msra.mxu0 %v1254_v53  ;;  %565 = vmatprep.subr.bf16.mxu1 %v1255_v54 }
  0x35   :  { %638 = vmatprep.subr.bf16.mxu0 %v1257_v55  ;;  %v776_v55 = vunpack.c.l.bf16 %v766_v46 }
  0x37   :  { %566 = vmatpush1.bf16.msra.mxu1 %v1259_v56 }
  0x38   :  { %639 = vmatpush1.bf16.msra.mxu0 %v1260_v57  ;;  %567 = vmatprep.subr.bf16.mxu1 %v1261_v58  ;;  %v777_v58 = vunpack.c.h.bf16 %v766_v46 }
  0x39   :  { %640 = vmatprep.subr.bf16.mxu0 %v1263_v59 }
  0x3b   :  { %568 = vmatpush1.bf16.msra.mxu1 %v1265_v60 }
  0x3c   :  { %641 = vmatpush1.bf16.msra.mxu0 %v1266_v61  ;;  %569 = vmatprep.subr.bf16.mxu1 %v1267_v62 }
  0x3d   :  { %642 = vmatprep.subr.bf16.mxu0 %v1269_v63  ;;  %v778_v63 = vunpack.c.l.bf16 %v767_v49 }
  0x3f   :  { %570 = vmatpush1.bf16.msra.mxu1 %v1271_v0  ;;  %v779_v0 = vunpack.c.h.bf16 %v767_v49 }
  0x40   :  { %643 = vmatpush1.bf16.msra.mxu0 %v1272_v1 }
  0x42   :  { %572 = vmatmul.mubr.bf16.vlgmr.msra.gmra.mrb[0].mxu1 %v1273_v2 }
  0x43   :  { %645 = vmatmul.mubr.bf16.vlgmr.msra.gmra.mrb[0].mxu0 %v1276_v3  ;;  %581 = vmatprep.mubr.bf16.mxu1 %v1279_v4 }
  0x44   :  { %654 = vmatprep.mubr.bf16.mxu0 %v1281_v5 }
  0x4a   :  { %582 = vmatmul.mubr.bf16.gmra.mrb[4].mxu1 %v1283_v6 }
  0x4b   :  { %655 = vmatmul.mubr.bf16.gmra.mrb[4].mxu0 %v1284_v7  ;;  %591 = vmatprep.mubr.bf16.mxu1 %v1285_v8 }
  0x4c   :  { %664 = vmatprep.mubr.bf16.mxu0 %v1287_v9 }
  0x52   :  { %592 = vmatmul.mubr.bf16.gmra.mrb[8].mxu1 %v1289_v10 }
  0x53   :  { %665 = vmatmul.mubr.bf16.gmra.mrb[8].mxu0 %v1290_v11  ;;  %601 = vmatprep.mubr.bf16.mxu1 %v1291_v12 }
  0x54   :  { %674 = vmatprep.mubr.bf16.mxu0 %v1293_v13 }
  0x5a   :  { %602 = vmatmul.mubr.bf16.gmra.mrb[12].mxu1 %v1295_v14 }
  0x5b   :  { %675 = vmatmul.mubr.bf16.gmra.mrb[12].mxu0 %v1296_v15 }
 0x115   :  { %v573_v23 = vpop.f32.mrb[0].mxu1 }
 0x116   :  { %v646_v24 = vpop.f32.mrb[0].mxu0  ;;  %v575_v28 = vpop.f32.mrb[1].mxu1 }
 0x117   :  { %v647_v27 = vadd.f32 %v646_v24, %v573_v23  ;;  %v648_v29 = vpop.f32.mrb[1].mxu0  ;;  %v577_v32 = vpop.f32.mrb[2].mxu1 }
 0x118   :  { %v649_v31 = vadd.f32 %v648_v29, %v575_v28  ;;  %v650_v33 = vpop.f32.mrb[2].mxu0  ;;  %v579_v38 = vpop.f32.mrb[3].mxu1 }
 0x119   :  { %v748_v35 = vadd.f32 %v1599_v22, %v647_v27  ;;  %v651_v36 = vadd.f32 %v650_v33, %v577_v32  ;;  %v652_v39 = vpop.f32.mrb[3].mxu0 }
 0x11a   :  { %v749_v40 = vadd.f32 %v1602_v25, %v649_v31  ;;  %v653_v41 = vadd.f32 %v652_v39, %v579_v38  ;;  %v780_v31 = vunpack.c.l.bf16 %v768_v16  ;;  %v782_v38 = vunpack.c.l.bf16 %v769_v19 }
 0x11b   :  { %v750_v43 = vadd.f32 %v1599_v22, %v651_v36  ;;  %v1610_v44 = vadd.f32 %v772_v30, %v748_v35  ;;  %v781_v35 = vunpack.c.h.bf16 %v768_v16  ;;  %v783_v39 = vunpack.c.h.bf16 %v769_v19 }
 0x11c   :  { %v751_v45 = vadd.f32 %v1602_v25, %v653_v41  ;;  %v1616_v47 = vadd.f32 %v773_v34, %v749_v40 }
 0x11d   :  { %v1618_v48 = vadd.f32 %v774_v37, %v750_v43  ;;  %v583_v51 = vpop.f32.mrb[4].mxu1  ;;  %v837_v6 = vmul.f32 %v1610_v44, %v1610_v44 }
 0x11e   :  { %v1623_v50 = vadd.f32 %v775_v42, %v751_v45  ;;  %v656_v52 = vpop.f32.mrb[4].mxu0  ;;  %v804_v53 = vadd.f32 %v1616_v47, %v1610_v44  ;;  %v585_v56 = vpop.f32.mrb[5].mxu1  ;;  %v838_v7 = vmul.f32 %v1616_v47, %v1616_v47 }
 0x11f   :  { %v657_v54 = vadd.f32 %v656_v52, %v583_v51  ;;  %v658_v57 = vpop.f32.mrb[5].mxu0  ;;  %v839_v59 = vmul.f32 %v1618_v48, %v1618_v48  ;;  %v587_v62 = vpop.f32.mrb[6].mxu1 }
 0x120   :  { %v659_v60 = vadd.f32 %v658_v57, %v585_v56  ;;  %v660_v61 = vpop.f32.mrb[6].mxu0  ;;  %805 = vadd.xlane.f32.xlu0 %v804_v53  ;;  %v840_v1 = vmul.f32 %v1623_v50, %v1623_v50  ;;  %v589_v4 = vpop.f32.mrb[7].mxu1  ;;  %v807_v11 = vadd.f32 %v1623_v50, %v1618_v48  ;;  %v853_v27 = vadd.f32 %v838_v7, %v837_v6 }
 0x121   :  { %v752_v2 = vadd.f32 %v1599_v22, %v657_v54  ;;  %v661_v3 = vadd.f32 %v660_v61, %v587_v62  ;;  %v662_v5 = vpop.f32.mrb[7].mxu0 }
 0x122   :  { %v753_v8 = vadd.f32 %v1602_v25, %v659_v60  ;;  %v663_v9 = vadd.f32 %v662_v5, %v589_v4  ;;  %v856_v10 = vadd.f32 %v840_v1, %v839_v59  ;;  %v771_v60 = vld [vmem:[%s1856_s3 + $0x38] sm:$0xff] }
 0x123   :  { %v1639_v12 = vadd.f32 %v776_v55, %v752_v2  ;;  %v754_v13 = vadd.f32 %v1599_v22, %v661_v3 }
 0x124   :  { %v1642_v14 = vadd.f32 %v777_v58, %v753_v8  ;;  %v755_v15 = vadd.f32 %v1602_v25, %v663_v9  ;;  %857 = vadd.xlane.f32.xlu1 %v856_v10  ;;  %808 = vadd.xlane.f32.xlu0 %v807_v11  ;;  %v770_v58 = vld [vmem:[%s1856_s3 + $0x30] sm:$0xff] }
 0x125   :  { %v1648_v17 = vadd.f32 %v778_v63, %v754_v13  ;;  %v841_v21 = vmul.f32 %v1639_v12, %v1639_v12  ;;  %v593_v24 = vpop.f32.mrb[8].mxu1  ;;  %v784_v5 = vunpack.c.l.bf16 %v770_v58  ;;  %v785_v9 = vunpack.c.h.bf16 %v770_v58 }
 0x126   :  { %v1655_v23 = vadd.f32 %v779_v0, %v755_v15  ;;  %v666_v26 = vpop.f32.mrb[8].mxu0  ;;  %v810_v28 = vadd.f32 %v1642_v14, %v1639_v12  ;;  %v842_v29 = vmul.f32 %v1642_v14, %v1642_v14  ;;  %v595_v32 = vpop.f32.mrb[9].mxu1  ;;  %v786_v13 = vunpack.c.l.bf16 %v771_v60 }
 0x127   :  { %v667_v30 = vadd.f32 %v666_v26, %v593_v24  ;;  %v668_v33 = vpop.f32.mrb[9].mxu0  ;;  %v597_v37 = vpop.f32.mrb[10].mxu1  ;;  %v843_v46 = vmul.f32 %v1648_v17, %v1648_v17 }
 0x128   :  { %v669_v34 = vadd.f32 %v668_v33, %v595_v32  ;;  %v670_v36 = vpop.f32.mrb[10].mxu0  ;;  %854 = vadd.xlane.f32.xlu0 %v853_v27  ;;  %811 = vadd.xlane.f32.xlu1 %v810_v28  ;;  %v599_v42 = vpop.f32.mrb[11].mxu1  ;;  %v859_v45 = vadd.f32 %v842_v29, %v841_v21  ;;  %v813_v52 = vadd.f32 %v1655_v23, %v1648_v17 }
 0x129   :  { %v756_v40 = vadd.f32 %v1599_v22, %v667_v30  ;;  %v671_v41 = vadd.f32 %v670_v36, %v597_v37  ;;  %v672_v43 = vpop.f32.mrb[11].mxu0  ;;  %v844_v53 = vmul.f32 %v1655_v23, %v1655_v23  ;;  %v787_v30 = vunpack.c.h.bf16 %v771_v60 }
 0x12a   :  { %v757_v49 = vadd.f32 %v1602_v25, %v669_v34  ;;  %v673_v51 = vadd.f32 %v672_v43, %v599_v42 }
 0x12b   :  { %v1669_v54 = vadd.f32 %v780_v31, %v756_v40  ;;  %v758_v55 = vadd.f32 %v1599_v22, %v671_v41  ;;  %v862_v1 = vadd.f32 %v844_v53, %v843_v46 }
 0x12c   :  { %v1672_v56 = vadd.f32 %v781_v35, %v757_v49  ;;  %v759_v57 = vadd.f32 %v1602_v25, %v673_v51  ;;  %860 = vadd.xlane.f32.xlu0 %v859_v45  ;;  %814 = vadd.xlane.f32.xlu1 %v813_v52 }
 0x12d   :  { %v1678_v59 = vadd.f32 %v782_v38, %v758_v55  ;;  %v845_v61 = vmul.f32 %v1669_v54, %v1669_v54  ;;  %v603_v63 = vpop.f32.mrb[12].mxu1 }
 0x12e   :  { %v1685_v62 = vadd.f32 %v783_v39, %v759_v57  ;;  %v676_v0 = vpop.f32.mrb[12].mxu0  ;;  %v816_v2 = vadd.f32 %v1672_v56, %v1669_v54  ;;  %v846_v3 = vmul.f32 %v1672_v56, %v1672_v56  ;;  %v605_v6 = vpop.f32.mrb[13].mxu1 }
 0x12f   :  { %v677_v4 = vadd.f32 %v676_v0, %v603_v63  ;;  %v678_v7 = vpop.f32.mrb[13].mxu0  ;;  %v607_v11 = vpop.f32.mrb[14].mxu1  ;;  %v847_v26 = vmul.f32 %v1678_v59, %v1678_v59 }
 0x130   :  { %v679_v8 = vadd.f32 %v678_v7, %v605_v6  ;;  %v680_v10 = vpop.f32.mrb[14].mxu0  ;;  %863 = vadd.xlane.f32.xlu1 %v862_v1  ;;  %817 = vadd.xlane.f32.xlu0 %v816_v2  ;;  %v865_v15 = vadd.f32 %v846_v3, %v845_v61  ;;  %v609_v21 = vpop.f32.mrb[15].mxu1  ;;  %v848_v27 = vmul.f32 %v1685_v62, %v1685_v62 }
 0x131   :  { %v760_v16 = vadd.f32 %v1599_v22, %v677_v4  ;;  %v681_v19 = vadd.f32 %v680_v10, %v607_v11  ;;  %v682_v24 = vpop.f32.mrb[15].mxu0  ;;  %v819_v31 = vadd.f32 %v1685_v62, %v1678_v59 }
 0x132   :  { %v761_v28 = vadd.f32 %v1602_v25, %v679_v8  ;;  %v683_v29 = vadd.f32 %v682_v24, %v609_v21  ;;  %v868_v36 = vadd.f32 %v848_v27, %v847_v26  ;;  %v949_v24 = vld [vmem:[%s1857_s4] sm:$0x3] }
 0x133   :  { %v1699_v32 = vadd.f32 %v784_v5, %v760_v16  ;;  %v762_v33 = vadd.f32 %v1599_v22, %v681_v19  ;;  %v977_v27 = vld [vmem:[%s1858_s5] sm:$0x3] }
 0x134   :  { %v1702_v34 = vadd.f32 %v785_v9, %v761_v28  ;;  %v763_v35 = vadd.f32 %v1602_v25, %v683_v29  ;;  %866 = vadd.xlane.f32.xlu0 %v865_v15  ;;  %820 = vadd.xlane.f32.xlu1 %v819_v31 }
 0x135   :  { %v849_v37 = vmul.f32 %v1699_v32, %v1699_v32  ;;  %v1707_v38 = vadd.f32 %v786_v13, %v762_v33 }
 0x136   :  { %v1709_v39 = vadd.f32 %v787_v30, %v763_v35  ;;  %v822_v40 = vadd.f32 %v1702_v34, %v1699_v32  ;;  %v850_v22 = vmul.f32 %v1702_v34, %v1702_v34 }
 0x137   :  { %v851_v42 = vmul.f32 %v1707_v38, %v1707_v38 }
 0x138   :  { %869 = vadd.xlane.f32.xlu1 %v868_v36  ;;  %823 = vadd.xlane.f32.xlu0 %v822_v40  ;;  %v871_v41 = vadd.f32 %v850_v22, %v849_v37  ;;  %v825_v25 = vadd.f32 %v1709_v39, %v1707_v38  ;;  %v852_v43 = vmul.f32 %v1709_v39, %v1709_v39 }
 0x139   :  { %v1746_v36 = vrot.slane %v949_v24, %v1588_v18  ;;  %v1749_v37 = vrot.slane %v949_v24, %v1593_v20 }
 0x13a   :  { %v874_v45 = vadd.f32 %v852_v43, %v851_v42  ;;  %v1757_v42 = vrot.slane %v977_v27, %v1593_v20 }
 0x13c   :  { %872 = vadd.xlane.f32.xlu0 %v871_v41  ;;  %826 = vadd.xlane.f32.xlu1 %v825_v25  ;;  %v1754_v25 = vrot.slane %v977_v27, %v1588_v18 }
 0x140   :  { %875 = vadd.xlane.f32.xlu1 %v874_v45 }
 0x1ad   :  { %v806_v46 = vpop.xlane.xlu0 %805 }
 0x1ae   :  { %v1721_v52 = vmul.f32 0.00390625, %v806_v46 }
 0x1b0   :  { %v885_v63 = vmul.f32 %v1721_v52, %v1721_v52  ;;  %v901_v45 = vsub.f32 %v1610_v44, %v1721_v52  ;;  %v902_v46 = vsub.f32 %v1616_v47, %v1721_v52 }
 0x1b1   :  { %v858_v49 = vpop.xlane.xlu1 %857  ;;  %v809_v51 = vpop.xlane.xlu0 %808 }
 0x1b2   :  { %v830_v53 = vmul.f32 0.00390625, %v809_v51  ;;  %v878_v55 = vmul.f32 0.00390625, %v858_v49 }
 0x1b4   :  { %v886_v57 = vmul.f32 %v830_v53, %v830_v53  ;;  %v903_v40 = vsub.f32 %v1618_v48, %v830_v53  ;;  %v904_v22 = vsub.f32 %v1623_v50, %v830_v53 }
 0x1b5   :  { %v855_v58 = vpop.xlane.xlu0 %854  ;;  %v812_v60 = vpop.xlane.xlu1 %811 }
 0x1b6   :  { %v894_v61 = vsub.f32 %v878_v55, %v886_v57  ;;  %v877_v0 = vmul.f32 0.00390625, %v855_v58  ;;  %v1725_v1 = vmul.f32 0.00390625, %v812_v60 }
 0x1b8   :  { %v918_v2 = vadd.f32 1e-05, %v894_v61  ;;  %v893_v3 = vsub.f32 %v877_v0, %v885_v63  ;;  %v887_v5 = vmul.f32 %v1725_v1, %v1725_v1  ;;  %v905_v47 = vsub.f32 %v1639_v12, %v1725_v1 }
 0x1b9   :  { %v861_v4 = vpop.xlane.xlu0 %860  ;;  %v815_v6 = vpop.xlane.xlu1 %814  ;;  %v906_v52 = vsub.f32 %v1642_v14, %v1725_v1 }
 0x1ba   :  { %1297 = vrsqrt.f32 %v918_v2  ;;  %v917_v7 = vadd.f32 1e-05, %v893_v3  ;;  %v879_v8 = vmul.f32 0.00390625, %v861_v4  ;;  %v1729_v9 = vmul.f32 0.00390625, %v815_v6 }
 0x1bc   :  { %1299 = vrsqrt.f32 %v917_v7  ;;  %v895_v10 = vsub.f32 %v879_v8, %v887_v5  ;;  %v888_v16 = vmul.f32 %v1729_v9, %v1729_v9  ;;  %v907_v27 = vsub.f32 %v1648_v17, %v1729_v9 }
 0x1bd   :  { %v864_v11 = vpop.xlane.xlu1 %863  ;;  %v818_v13 = vpop.xlane.xlu0 %817 }
 0x1be   :  { %v919_v15 = vadd.f32 1e-05, %v895_v10  ;;  %v880_v19 = vmul.f32 0.00390625, %v864_v11  ;;  %v1733_v21 = vmul.f32 0.00390625, %v818_v13 }
 0x1c0   :  { %1301 = vrsqrt.f32 %v919_v15  ;;  %v896_v26 = vsub.f32 %v880_v19, %v888_v16  ;;  %v889_v28 = vmul.f32 %v1733_v21, %v1733_v21 }
 0x1c1   :  { %v867_v29 = vpop.xlane.xlu0 %866  ;;  %v821_v30 = vpop.xlane.xlu1 %820 }
 0x1c2   :  { %v920_v31 = vadd.f32 1e-05, %v896_v26  ;;  %v881_v33 = vmul.f32 0.00390625, %v867_v29  ;;  %v1743_v35 = vmul.f32 0.00390625, %v821_v30 }
 0x1c4   :  { %v1298_v41 = vpop.eup %1297  ;;  %1303 = vrsqrt.f32 %v920_v31  ;;  %v897_v43 = vsub.f32 %v881_v33, %v889_v28  ;;  %v890_v18 = vmul.f32 %v1743_v35, %v1743_v35  ;;  %v908_v28 = vsub.f32 %v1655_v23, %v1729_v9 }
 0x1c5   :  { %v935_v49 = vmul.f32 %v1298_v41, %v903_v40  ;;  %v936_v51 = vmul.f32 %v1298_v41, %v904_v22  ;;  %v870_v48 = vpop.xlane.xlu1 %869  ;;  %v824_v55 = vpop.xlane.xlu0 %823 }
 0x1c6   :  { %v1300_v50 = vpop.eup %1299  ;;  %v921_v53 = vadd.f32 1e-05, %v897_v43  ;;  %v882_v57 = vmul.f32 0.00390625, %v870_v48  ;;  %v1765_v20 = vmul.f32 0.00390625, %v824_v55 }
 0x1c7   :  { %v963_v58 = vmul.f32 %v1746_v36, %v935_v49  ;;  %v964_v60 = vmul.f32 %v1749_v37, %v936_v51  ;;  %v933_v44 = vmul.f32 %v1300_v50, %v901_v45  ;;  %v934_v61 = vmul.f32 %v1300_v50, %v902_v46 }
 0x1c8   :  { %1305 = vrsqrt.f32 %v921_v53  ;;  %v898_v63 = vsub.f32 %v882_v57, %v890_v18  ;;  %v891_v12 = vmul.f32 %v1765_v20, %v1765_v20  ;;  %v909_v49 = vsub.f32 %v1669_v54, %v1733_v21 }
 0x1c9   :  { %v991_v0 = vadd.f32 %v1754_v25, %v963_v58  ;;  %v992_v2 = vadd.f32 %v1757_v42, %v964_v60  ;;  %v961_v3 = vmul.f32 %v1746_v36, %v933_v44  ;;  %v962_v4 = vmul.f32 %v1749_v37, %v934_v61  ;;  %v873_v5 = vpop.xlane.xlu0 %872  ;;  %v827_v6 = vpop.xlane.xlu1 %826 }
 0x1ca   :  { %v1302_v7 = vpop.eup %1301  ;;  %v922_v8 = vadd.f32 1e-05, %v898_v63  ;;  %v883_v10 = vmul.f32 0.00390625, %v873_v5  ;;  %v1779_v11 = vmul.f32 0.00390625, %v827_v6  ;;  %v910_v51 = vsub.f32 %v1672_v56, %v1733_v21 }
 0x1cb   :  { %v1154_v14 = vpack.c.bf16 %v992_v2, %v991_v0  ;;  %v989_v1 = vadd.f32 %v1754_v25, %v961_v3  ;;  %v990_v13 = vadd.f32 %v1757_v42, %v962_v4  ;;  %v937_v15 = vmul.f32 %v1302_v7, %v905_v47 }
 0x1cc   :  { %v938_v16 = vmul.f32 %v1302_v7, %v906_v52  ;;  %1307 = vrsqrt.f32 %v922_v8  ;;  %v899_v19 = vsub.f32 %v883_v10, %v891_v12  ;;  %v892_v40 = vmul.f32 %v1779_v11, %v1779_v11 }
 0x1cd   :  { %1054 = vst [vmem:[%s1859_s6 + $0x8] sm:$0xff] %v1154_v14  ;;  %v1153_v24 = vpack.c.bf16 %v990_v13, %v989_v1  ;;  %v965_v26 = vmul.f32 %v1746_v36, %v937_v15  ;;  %v876_v29 = vpop.xlane.xlu1 %875  ;;  %v911_v60 = vsub.f32 %v1678_v59, %v1743_v35  ;;  %v912_v44 = vsub.f32 %v1685_v62, %v1743_v35 }
 0x1ce   :  { %v1304_v30 = vpop.eup %1303  ;;  %v966_v31 = vmul.f32 %v1749_v37, %v938_v16  ;;  %v923_v33 = vadd.f32 1e-05, %v899_v19  ;;  %v884_v22 = vmul.f32 0.00390625, %v876_v29  ;;  %v913_v0 = vsub.f32 %v1699_v32, %v1765_v20 }
 0x1cf   :  { %1053 = vst [vmem:[%s1859_s6] sm:$0xff] %v1153_v24  ;;  %v993_v41 = vadd.f32 %v1754_v25, %v965_v26  ;;  %v939_v43 = vmul.f32 %v1304_v30, %v907_v27  ;;  %v940_v17 = vmul.f32 %v1304_v30, %v908_v28  ;;  %v914_v62 = vsub.f32 %v1702_v34, %v1765_v20 }
 0x1d0   :  { %v994_v45 = vadd.f32 %v1757_v42, %v966_v31  ;;  %1309 = vrsqrt.f32 %v923_v33  ;;  %v900_v23 = vsub.f32 %v884_v22, %v892_v40  ;;  %v915_v32 = vsub.f32 %v1707_v38, %v1779_v11 }
 0x1d1   :  { %v967_v9 = vmul.f32 %v1746_v36, %v939_v43  ;;  %v968_v46 = vmul.f32 %v1749_v37, %v940_v17  ;;  %v916_v34 = vsub.f32 %v1709_v39, %v1779_v11 }
 0x1d2   :  { %v1306_v48 = vpop.eup %1305  ;;  %v1155_v55 = vpack.c.bf16 %v994_v45, %v993_v41  ;;  %v924_v50 = vadd.f32 1e-05, %v900_v23 }
 0x1d3   :  { %v995_v53 = vadd.f32 %v1754_v25, %v967_v9  ;;  %v996_v18 = vadd.f32 %v1757_v42, %v968_v46  ;;  %v941_v57 = vmul.f32 %v1306_v48, %v909_v49  ;;  %v942_v58 = vmul.f32 %v1306_v48, %v910_v51 }
 0x1d4   :  { %1055 = vst [vmem:[%s1859_s6 + $0x10] sm:$0xff] %v1155_v55  ;;  %1311 = vrsqrt.f32 %v924_v50 }
 0x1d5   :  { %v1156_v54 = vpack.c.bf16 %v996_v18, %v995_v53  ;;  %v969_v56 = vmul.f32 %v1746_v36, %v941_v57  ;;  %v970_v21 = vmul.f32 %v1749_v37, %v942_v58 }
 0x1d6   :  { %v1308_v61 = vpop.eup %1307 }
 0x1d7   :  { %1056 = vst [vmem:[%s1859_s6 + $0x18] sm:$0xff] %v1156_v54  ;;  %v997_v47 = vadd.f32 %v1754_v25, %v969_v56  ;;  %v998_v52 = vadd.f32 %v1757_v42, %v970_v21  ;;  %v943_v63 = vmul.f32 %v1308_v61, %v911_v60  ;;  %v944_v59 = vmul.f32 %v1308_v61, %v912_v44 }
 0x1d9   :  { %v1157_v2 = vpack.c.bf16 %v998_v52, %v997_v47  ;;  %v971_v3 = vmul.f32 %v1746_v36, %v943_v63  ;;  %v972_v4 = vmul.f32 %v1749_v37, %v944_v59 }
 0x1da   :  { %v1310_v35 = vpop.eup %1309 }
 0x1db   :  { %1057 = vst [vmem:[%s1859_s6 + $0x20] sm:$0xff] %v1157_v2  ;;  %v999_v5 = vadd.f32 %v1754_v25, %v971_v3  ;;  %v1000_v6 = vadd.f32 %v1757_v42, %v972_v4  ;;  %v945_v7 = vmul.f32 %v1310_v35, %v913_v0  ;;  %v946_v8 = vmul.f32 %v1310_v35, %v914_v62 }
 0x1dd   :  { %v1158_v12 = vpack.c.bf16 %v1000_v6, %v999_v5  ;;  %v973_v10 = vmul.f32 %v1746_v36, %v945_v7  ;;  %v974_v14 = vmul.f32 %v1749_v37, %v946_v8 }
 0x1de   :  { %v1312_v20 = vpop.eup %1311 }
 0x1df   :  { %1058 = vst [vmem:[%s1859_s6 + $0x28] sm:$0xff] %v1158_v12  ;;  %v1001_v1 = vadd.f32 %v1754_v25, %v973_v10  ;;  %v1002_v13 = vadd.f32 %v1757_v42, %v974_v14  ;;  %v947_v15 = vmul.f32 %v1312_v20, %v915_v32  ;;  %v948_v16 = vmul.f32 %v1312_v20, %v916_v34 }
 0x1e1   :  { %v1159_v38 = vpack.c.bf16 %v1002_v13, %v1001_v1  ;;  %v975_v19 = vmul.f32 %v1746_v36, %v947_v15  ;;  %v976_v24 = vmul.f32 %v1749_v37, %v948_v16 }
 0x1e3   :  { %1059 = vst [vmem:[%s1859_s6 + $0x30] sm:$0xff] %v1159_v38  ;;  %v1003_v39 = vadd.f32 %v1754_v25, %v975_v19  ;;  %v1004_v11 = vadd.f32 %v1757_v42, %v976_v24 }
 0x1e5   :  { %v1160_v26 = vpack.c.bf16 %v1004_v11, %v1003_v39 }
 0x1e7   :  { %1060 = vst [vmem:[%s1859_s6 + $0x38] sm:$0xff] %v1160_v26 }

// kernel: bert_class_forward.15
= control target key start
LH: loop header
LB: loop body
LE: loop exit
PB: predicated region body
PF: predicated region fallthrough
CT: control target
= control target key end

     0   :  { %v307_v3 = vmov 0.0   ;;  %s547_s1 = inlined_call_operand.vmem [shape: f32[256,256], index: 1, kind: input, shape index: {}]   ;;  %s548_s0 = inlined_call_operand.vmem [shape: f32[14,256], index: 0, kind: input, shape index: {}]   ;;  %s549_s2 = inlined_call_operand.vmem [shape: f32[1,256], index: 2, kind: input, shape index: {}]   ;;  %s550_s3 = inlined_call_operand.vmem [shape: f32[14,256], index: 3, kind: output, shape index: {}]  }
   0x1   :  { %v31_v0 = vld [vmem:[%s547_s1 + $0x8] sm:$0xff]  ;;  %v33_v1 = vld [vmem:[%s547_s1 + $0x18] sm:$0xff]  ;;  %v30_v2 = vld [vmem:[%s547_s1] sm:$0xff]  ;;  %20 = vst [vmem:[#allocation2 + $0x10] sm:$0x3f] %v307_v3 }
   0x2   :  { %21 = vst [vmem:[#allocation2 + $0x18] sm:$0x3f] %v307_v3  ;;  %v210_v4 = vpack.c.bf16 %v33_v1, %v31_v0  ;;  %v32_v5 = vld [vmem:[%s547_s1 + $0x10] sm:$0xff]  ;;  %v35_v6 = vld [vmem:[%s547_s1 + $0x28] sm:$0xff]  ;;  %v37_v7 = vld [vmem:[%s547_s1 + $0x38] sm:$0xff] }
   0x3   :  { %v212_v8 = vpack.c.bf16 %v32_v5, %v30_v2  ;;  %v214_v9 = vpack.c.bf16 %v37_v7, %v35_v6  ;;  %v34_v10 = vld [vmem:[%s547_s1 + $0x20] sm:$0xff]  ;;  %v36_v11 = vld [vmem:[%s547_s1 + $0x30] sm:$0xff]  ;;  %v39_v12 = vld [vmem:[%s547_s1 + $0x48] sm:$0xff] }
   0x4   :  { %211 = vmatprep.subr.bf16.mxu0 %v210_v4  ;;  %274 = vmatprep.subr.bf16.mxu1 %v210_v4  ;;  %v41_v13 = vld [vmem:[%s547_s1 + $0x58] sm:$0xff]  ;;  %v216_v14 = vpack.c.bf16 %v36_v11, %v34_v10  ;;  %v38_v16 = vld [vmem:[%s547_s1 + $0x40] sm:$0xff]  ;;  %v40_v17 = vld [vmem:[%s547_s1 + $0x50] sm:$0xff] }
   0x5   :  { %213 = vmatpush1.bf16.msra.mxu0 %v212_v8  ;;  %290 = vmatpush1.bf16.msra.mxu1 %v212_v8  ;;  %v218_v15 = vpack.c.bf16 %v41_v13, %v39_v12  ;;  %v43_v18 = vld [vmem:[%s547_s1 + $0x68] sm:$0xff]  ;;  %v45_v19 = vld [vmem:[%s547_s1 + $0x78] sm:$0xff]  ;;  %v220_v20 = vpack.c.bf16 %v40_v17, %v38_v16  ;;  %v42_v22 = vld [vmem:[%s547_s1 + $0x60] sm:$0xff] }
   0x6   :  { %215 = vmatprep.subr.bf16.mxu0 %v214_v9  ;;  %275 = vmatprep.subr.bf16.mxu1 %v214_v9  ;;  %v222_v21 = vpack.c.bf16 %v45_v19, %v43_v18  ;;  %v44_v23 = vld [vmem:[%s547_s1 + $0x70] sm:$0xff]  ;;  %v47_v24 = vld [vmem:[%s547_s1 + $0x88] sm:$0xff]  ;;  %v49_v25 = vld [vmem:[%s547_s1 + $0x98] sm:$0xff] }
   0x7   :  { %v224_v26 = vpack.c.bf16 %v44_v23, %v42_v22  ;;  %v226_v27 = vpack.c.bf16 %v49_v25, %v47_v24  ;;  %v46_v28 = vld [vmem:[%s547_s1 + $0x80] sm:$0xff]  ;;  %v48_v29 = vld [vmem:[%s547_s1 + $0x90] sm:$0xff]  ;;  %v51_v30 = vld [vmem:[%s547_s1 + $0xa8] sm:$0xff] }
   0x8   :  { %v53_v31 = vld [vmem:[%s547_s1 + $0xb8] sm:$0xff]  ;;  %v228_v32 = vpack.c.bf16 %v48_v29, %v46_v28  ;;  %v50_v34 = vld [vmem:[%s547_s1 + $0xa0] sm:$0xff]  ;;  %v52_v35 = vld [vmem:[%s547_s1 + $0xb0] sm:$0xff] }
   0x9   :  { %217 = vmatpush1.bf16.msra.mxu0 %v216_v14  ;;  %291 = vmatpush1.bf16.msra.mxu1 %v216_v14  ;;  %v230_v33 = vpack.c.bf16 %v53_v31, %v51_v30  ;;  %v55_v36 = vld [vmem:[%s547_s1 + $0xc8] sm:$0xff]  ;;  %v57_v37 = vld [vmem:[%s547_s1 + $0xd8] sm:$0xff]  ;;  %v232_v38 = vpack.c.bf16 %v52_v35, %v50_v34  ;;  %v54_v39 = vld [vmem:[%s547_s1 + $0xc0] sm:$0xff] }
   0xa   :  { %219 = vmatprep.subr.bf16.mxu0 %v218_v15  ;;  %276 = vmatprep.subr.bf16.mxu1 %v218_v15  ;;  %v234_v40 = vpack.c.bf16 %v57_v37, %v55_v36  ;;  %v56_v41 = vld [vmem:[%s547_s1 + $0xd0] sm:$0xff]  ;;  %v27_v42 = vld [vmem:[%s548_s0 + $0x8] sm:$0xff]  ;;  %v29_v43 = vld [vmem:[%s548_s0 + $0x18] sm:$0x3f]  ;;  %v188_v37 = vlaneseq }
   0xb   :  { %v59_v44 = vld [vmem:[%s547_s1 + $0xe8] sm:$0xff]  ;;  %v61_v45 = vld [vmem:[%s547_s1 + $0xf8] sm:$0xff]  ;;  %158 = vmatprep.mubr.f32.mxu0 %v27_v42  ;;  %164 = vmatprep.mubr.f32.mxu1 %v29_v43  ;;  %v236_v46 = vpack.c.bf16 %v56_v41, %v54_v39  ;;  %v58_v48 = vld [vmem:[%s547_s1 + $0xe0] sm:$0xff] }
   0xc   :  { %v238_v47 = vpack.c.bf16 %v61_v45, %v59_v44  ;;  %v60_v49 = vld [vmem:[%s547_s1 + $0xf0] sm:$0xff]  ;;  %v63_v50 = vld [vmem:[%s547_s1 + $0x108] sm:$0xff]  ;;  %v65_v51 = vld [vmem:[%s547_s1 + $0x118] sm:$0xff] }
   0xd   :  { %221 = vmatpush1.bf16.msra.mxu0 %v220_v20  ;;  %292 = vmatpush1.bf16.msra.mxu1 %v220_v20  ;;  %v240_v52 = vpack.c.bf16 %v60_v49, %v58_v48  ;;  %v242_v53 = vpack.c.bf16 %v65_v51, %v63_v50  ;;  %v62_v54 = vld [vmem:[%s547_s1 + $0x100] sm:$0xff]  ;;  %v64_v55 = vld [vmem:[%s547_s1 + $0x110] sm:$0xff]  ;;  %v67_v56 = vld [vmem:[%s547_s1 + $0x128] sm:$0xff] }
   0xe   :  { %223 = vmatprep.subr.bf16.mxu0 %v222_v21  ;;  %277 = vmatprep.subr.bf16.mxu1 %v222_v21  ;;  %v69_v57 = vld [vmem:[%s547_s1 + $0x138] sm:$0xff]  ;;  %v244_v58 = vpack.c.bf16 %v64_v55, %v62_v54  ;;  %v66_v60 = vld [vmem:[%s547_s1 + $0x120] sm:$0xff]  ;;  %v68_v61 = vld [vmem:[%s547_s1 + $0x130] sm:$0xff] }
   0xf   :  { %v246_v59 = vpack.c.bf16 %v69_v57, %v67_v56  ;;  %v71_v62 = vld [vmem:[%s547_s1 + $0x148] sm:$0xff]  ;;  %v73_v63 = vld [vmem:[%s547_s1 + $0x158] sm:$0xff]  ;;  %v248_v0 = vpack.c.bf16 %v68_v61, %v66_v60  ;;  %v70_v2 = vld [vmem:[%s547_s1 + $0x140] sm:$0xff] }
  0x10   :  { %v250_v1 = vpack.c.bf16 %v73_v63, %v71_v62  ;;  %v72_v3 = vld [vmem:[%s547_s1 + $0x150] sm:$0xff]  ;;  %v75_v4 = vld [vmem:[%s547_s1 + $0x168] sm:$0xff]  ;;  %v77_v5 = vld [vmem:[%s547_s1 + $0x178] sm:$0xff] }
  0x11   :  { %225 = vmatpush1.bf16.msra.mxu0 %v224_v26  ;;  %293 = vmatpush1.bf16.msra.mxu1 %v224_v26  ;;  %v252_v6 = vpack.c.bf16 %v72_v3, %v70_v2  ;;  %v254_v7 = vpack.c.bf16 %v77_v5, %v75_v4  ;;  %v74_v8 = vld [vmem:[%s547_s1 + $0x160] sm:$0xff]  ;;  %v76_v9 = vld [vmem:[%s547_s1 + $0x170] sm:$0xff]  ;;  %v79_v10 = vld [vmem:[%s547_s1 + $0x188] sm:$0xff] }
  0x12   :  { %227 = vmatprep.subr.bf16.mxu0 %v226_v27  ;;  %278 = vmatprep.subr.bf16.mxu1 %v226_v27  ;;  %v81_v11 = vld [vmem:[%s547_s1 + $0x198] sm:$0xff]  ;;  %v256_v12 = vpack.c.bf16 %v76_v9, %v74_v8  ;;  %v78_v14 = vld [vmem:[%s547_s1 + $0x180] sm:$0xff]  ;;  %v80_v15 = vld [vmem:[%s547_s1 + $0x190] sm:$0xff] }
  0x13   :  { %v258_v13 = vpack.c.bf16 %v81_v11, %v79_v10  ;;  %v83_v16 = vld [vmem:[%s547_s1 + $0x1a8] sm:$0xff]  ;;  %v85_v17 = vld [vmem:[%s547_s1 + $0x1b8] sm:$0xff]  ;;  %v260_v18 = vpack.c.bf16 %v80_v15, %v78_v14  ;;  %v82_v20 = vld [vmem:[%s547_s1 + $0x1a0] sm:$0xff] }
  0x14   :  { %v262_v19 = vpack.c.bf16 %v85_v17, %v83_v16  ;;  %v84_v21 = vld [vmem:[%s547_s1 + $0x1b0] sm:$0xff]  ;;  %v87_v22 = vld [vmem:[%s547_s1 + $0x1c8] sm:$0xff]  ;;  %v89_v23 = vld [vmem:[%s547_s1 + $0x1d8] sm:$0xff] }
  0x15   :  { %229 = vmatpush1.bf16.msra.mxu0 %v228_v32  ;;  %294 = vmatpush1.bf16.msra.mxu1 %v228_v32  ;;  %v264_v24 = vpack.c.bf16 %v84_v21, %v82_v20  ;;  %v266_v25 = vpack.c.bf16 %v89_v23, %v87_v22  ;;  %v86_v26 = vld [vmem:[%s547_s1 + $0x1c0] sm:$0xff]  ;;  %v88_v27 = vld [vmem:[%s547_s1 + $0x1d0] sm:$0xff]  ;;  %v91_v28 = vld [vmem:[%s547_s1 + $0x1e8] sm:$0xff] }
  0x16   :  { %231 = vmatprep.subr.bf16.mxu0 %v230_v33  ;;  %279 = vmatprep.subr.bf16.mxu1 %v230_v33  ;;  %v93_v29 = vld [vmem:[%s547_s1 + $0x1f8] sm:$0xff]  ;;  %v268_v30 = vpack.c.bf16 %v88_v27, %v86_v26  ;;  %v90_v32 = vld [vmem:[%s547_s1 + $0x1e0] sm:$0xff]  ;;  %v92_v33 = vld [vmem:[%s547_s1 + $0x1f0] sm:$0xff] }
  0x17   :  { %v270_v31 = vpack.c.bf16 %v93_v29, %v91_v28  ;;  %v272_v34 = vpack.c.bf16 %v92_v33, %v90_v32  ;;  %v26_v35 = vld [vmem:[%s548_s0] sm:$0xff]  ;;  %v28_v36 = vld [vmem:[%s548_s0 + $0x10] sm:$0x3f]  ;;  %v25_v44 = vld [vmem:[#allocation2 + $0x18] sm:$0x3f] }
  0x18   :  { %v24_v42 = vld [vmem:[#allocation2 + $0x10] sm:$0x3f] }
  0x19   :  { %233 = vmatpush1.bf16.msra.mxu0 %v232_v38  ;;  %295 = vmatpush1.bf16.msra.mxu1 %v232_v38  ;;  %v189_v38 = vshrl.u32 %v188_v37, 7 }
  0x1a   :  { %235 = vmatprep.subr.bf16.mxu0 %v234_v40  ;;  %280 = vmatprep.subr.bf16.mxu1 %v234_v40  ;;  %v186_v40 = vld [vmem:[%s549_s2] sm:$0x3] }
  0x1b   :  { %v190_v39 = vsub.s32 0, %v189_v38  ;;  %v194_v41 = vsub.s32 1, %v189_v38 }
  0x1d   :  { %237 = vmatpush1.bf16.msra.mxu0 %v236_v46  ;;  %296 = vmatpush1.bf16.msra.mxu1 %v236_v46  ;;  %v191_v43 = vrot.slane %v186_v40, %v190_v39 }
  0x1e   :  { %239 = vmatprep.subr.bf16.mxu0 %v238_v47  ;;  %281 = vmatprep.subr.bf16.mxu1 %v238_v47  ;;  %v195_v47 = vrot.slane %v186_v40, %v194_v41 }
  0x21   :  { %241 = vmatpush1.bf16.msra.mxu0 %v240_v52  ;;  %297 = vmatpush1.bf16.msra.mxu1 %v240_v52 }
  0x22   :  { %243 = vmatprep.subr.bf16.mxu0 %v242_v53  ;;  %282 = vmatprep.subr.bf16.mxu1 %v242_v53 }
  0x25   :  { %245 = vmatpush1.bf16.msra.mxu0 %v244_v58  ;;  %298 = vmatpush1.bf16.msra.mxu1 %v244_v58 }
  0x26   :  { %247 = vmatprep.subr.bf16.mxu0 %v246_v59  ;;  %283 = vmatprep.subr.bf16.mxu1 %v246_v59 }
  0x29   :  { %249 = vmatpush1.bf16.msra.mxu0 %v248_v0  ;;  %299 = vmatpush1.bf16.msra.mxu1 %v248_v0 }
  0x2a   :  { %251 = vmatprep.subr.bf16.mxu0 %v250_v1  ;;  %284 = vmatprep.subr.bf16.mxu1 %v250_v1 }
  0x2d   :  { %253 = vmatpush1.bf16.msra.mxu0 %v252_v6  ;;  %300 = vmatpush1.bf16.msra.mxu1 %v252_v6 }
  0x2e   :  { %255 = vmatprep.subr.bf16.mxu0 %v254_v7  ;;  %285 = vmatprep.subr.bf16.mxu1 %v254_v7 }
  0x31   :  { %257 = vmatpush1.bf16.msra.mxu0 %v256_v12  ;;  %301 = vmatpush1.bf16.msra.mxu1 %v256_v12 }
  0x32   :  { %259 = vmatprep.subr.bf16.mxu0 %v258_v13  ;;  %286 = vmatprep.subr.bf16.mxu1 %v258_v13 }
  0x35   :  { %261 = vmatpush1.bf16.msra.mxu0 %v260_v18  ;;  %302 = vmatpush1.bf16.msra.mxu1 %v260_v18 }
  0x36   :  { %263 = vmatprep.subr.bf16.mxu0 %v262_v19  ;;  %287 = vmatprep.subr.bf16.mxu1 %v262_v19 }
  0x39   :  { %265 = vmatpush1.bf16.msra.mxu0 %v264_v24  ;;  %303 = vmatpush1.bf16.msra.mxu1 %v264_v24 }
  0x3a   :  { %267 = vmatprep.subr.bf16.mxu0 %v266_v25  ;;  %288 = vmatprep.subr.bf16.mxu1 %v266_v25 }
  0x3d   :  { %269 = vmatpush1.bf16.msra.mxu0 %v268_v30  ;;  %304 = vmatpush1.bf16.msra.mxu1 %v268_v30 }
  0x3e   :  { %271 = vmatprep.subr.bf16.mxu0 %v270_v31  ;;  %289 = vmatprep.subr.bf16.mxu1 %v270_v31 }
  0x41   :  { %273 = vmatpush1.bf16.msra.mxu0 %v272_v34  ;;  %305 = vmatpush1.bf16.msra.mxu1 %v272_v34 }
  0x44   :  { %159 = vmatmul.mubr.f32.vlgmr.msra.gmra.mrb[0].mxu0 %v26_v35  ;;  %165 = vmatmul.mubr.f32.vlgmr.msra.gmra.mrb[0].mxu1 %v28_v36 }
 0x117   :  { %v160_v45 = vpop.f32.mrb[0].mxu0  ;;  %v166_v46 = vpop.f32.mrb[0].mxu1 }
 0x118   :  { %v173_v48 = vadd.f32 %v166_v46, %v24_v42  ;;  %v162_v49 = vpop.f32.mrb[1].mxu0  ;;  %v168_v50 = vpop.f32.mrb[1].mxu1  ;;  %v198_v52 = vadd.f32 %v191_v43, %v160_v45 }
 0x119   :  { %v174_v51 = vadd.f32 %v168_v50, %v25_v44  ;;  %v199_v53 = vadd.f32 %v195_v47, %v162_v49 }
 0x11a   :  { %177 = vst [vmem:[#allocation2 + $0x10] sm:$0x3f] %v173_v48  ;;  %202 = vst [vmem:[%s550_s3] sm:$0xff] %v198_v52 }
 0x11b   :  { %178 = vst [vmem:[#allocation2 + $0x18] sm:$0x3f] %v174_v51  ;;  %203 = vst [vmem:[%s550_s3 + $0x8] sm:$0xff] %v199_v53 }
 0x121   :  { %v184_v54 = vld [vmem:[#allocation2 + $0x10] sm:$0x3f] }
 0x122   :  { %v200_v55 = vadd.f32 %v191_v43, %v184_v54  ;;  %v185_v56 = vld [vmem:[#allocation2 + $0x18] sm:$0x3f] }
 0x123   :  { %v201_v57 = vadd.f32 %v195_v47, %v185_v56 }
 0x124   :  { %204 = vst [vmem:[%s550_s3 + $0x10] sm:$0x3f] %v200_v55 }
 0x125   :  { %205 = vst [vmem:[%s550_s3 + $0x18] sm:$0x3f] %v201_v57 }

// kernel: bert_class_forward.20
= control target key start
LH: loop header
LB: loop body
LE: loop exit
PB: predicated region body
PF: predicated region fallthrough
CT: control target
= control target key end

     0   :  { %s2095_s1 = inlined_call_operand.vmem [shape: bf16[256,512], index: 1, kind: input, shape index: {}]   ;;  %s2096_s0 = inlined_call_operand.vmem [shape: bf16[64,256], index: 0, kind: input, shape index: {}]   ;;  %s2097_s2 = inlined_call_operand.vmem [shape: f32[1,512], index: 2, kind: input, shape index: {}]   ;;  %s2098_s3 = inlined_call_operand.vmem [shape: bf16[64,512], index: 3, kind: output, shape index: {}]  }
   0x1   :  { %v1321_v0 = vld [vmem:[%s2095_s1 + $0x4] ss:$16 sps:$4 sm:$0xff]   ;;  %v1323_v1 = vld [vmem:[%s2095_s1 + $0xc] ss:$16 sps:$4 sm:$0xff]   ;;  %v1325_v2 = vld [vmem:[%s2095_s1] ss:$16 sps:$4 sm:$0xff]  }
   0x2   :  { %514 = vmatprep.subr.bf16.mxu0 %v1321_v0  ;;  %v1326_v3 = vld [vmem:[%s2095_s1 + $0x8] ss:$16 sps:$4 sm:$0xff]   ;;  %587 = vmatprep.subr.bf16.mxu1 %v1323_v1  ;;  %v1327_v4 = vld [vmem:[%s2095_s1 + $0x24] ss:$16 sps:$4 sm:$0xff]   ;;  %v1329_v5 = vld [vmem:[%s2095_s1 + $0x2c] ss:$16 sps:$4 sm:$0xff]  }
   0x3   :  { %515 = vmatpush1.bf16.msra.mxu0 %v1325_v2  ;;  %588 = vmatpush1.bf16.msra.mxu1 %v1326_v3  ;;  %v1331_v6 = vld [vmem:[%s2095_s1 + $0x20] ss:$16 sps:$4 sm:$0xff]   ;;  %v1332_v7 = vld [vmem:[%s2095_s1 + $0x28] ss:$16 sps:$4 sm:$0xff]   ;;  %v1333_v8 = vld [vmem:[%s2095_s1 + $0x44] ss:$16 sps:$4 sm:$0xff]  }
   0x4   :  { %516 = vmatprep.subr.bf16.mxu0 %v1327_v4  ;;  %589 = vmatprep.subr.bf16.mxu1 %v1329_v5  ;;  %v1335_v9 = vld [vmem:[%s2095_s1 + $0x4c] ss:$16 sps:$4 sm:$0xff]   ;;  %v1337_v10 = vld [vmem:[%s2095_s1 + $0x40] ss:$16 sps:$4 sm:$0xff]   ;;  %v1338_v11 = vld [vmem:[%s2095_s1 + $0x48] ss:$16 sps:$4 sm:$0xff]  }
   0x5   :  { %v1339_v12 = vld [vmem:[%s2095_s1 + $0x64] ss:$16 sps:$4 sm:$0xff]   ;;  %v1341_v13 = vld [vmem:[%s2095_s1 + $0x6c] ss:$16 sps:$4 sm:$0xff]   ;;  %v1343_v14 = vld [vmem:[%s2095_s1 + $0x60] ss:$16 sps:$4 sm:$0xff]  }
   0x6   :  { %v1344_v15 = vld [vmem:[%s2095_s1 + $0x68] ss:$16 sps:$4 sm:$0xff]   ;;  %v1345_v16 = vld [vmem:[%s2095_s1 + $0x84] ss:$16 sps:$4 sm:$0xff]   ;;  %v1347_v17 = vld [vmem:[%s2095_s1 + $0x8c] ss:$16 sps:$4 sm:$0xff]  }
   0x7   :  { %517 = vmatpush1.bf16.msra.mxu0 %v1331_v6  ;;  %590 = vmatpush1.bf16.msra.mxu1 %v1332_v7  ;;  %v1349_v18 = vld [vmem:[%s2095_s1 + $0x80] ss:$16 sps:$4 sm:$0xff]   ;;  %v1350_v19 = vld [vmem:[%s2095_s1 + $0x88] ss:$16 sps:$4 sm:$0xff]   ;;  %v1351_v20 = vld [vmem:[%s2095_s1 + $0xa4] ss:$16 sps:$4 sm:$0xff]  }
   0x8   :  { %518 = vmatprep.subr.bf16.mxu0 %v1333_v8  ;;  %591 = vmatprep.subr.bf16.mxu1 %v1335_v9  ;;  %v1353_v21 = vld [vmem:[%s2095_s1 + $0xac] ss:$16 sps:$4 sm:$0xff]   ;;  %v1355_v22 = vld [vmem:[%s2095_s1 + $0xa0] ss:$16 sps:$4 sm:$0xff]   ;;  %v1356_v23 = vld [vmem:[%s2095_s1 + $0xa8] ss:$16 sps:$4 sm:$0xff]   ;;  %v761_v8 = vlaneseq }
   0x9   :  { %v1357_v24 = vld [vmem:[%s2095_s1 + $0xc4] ss:$16 sps:$4 sm:$0xff]   ;;  %v1359_v25 = vld [vmem:[%s2095_s1 + $0xcc] ss:$16 sps:$4 sm:$0xff]   ;;  %v1361_v26 = vld [vmem:[%s2095_s1 + $0xc0] ss:$16 sps:$4 sm:$0xff]  }
   0xa   :  { %v1362_v27 = vld [vmem:[%s2095_s1 + $0xc8] ss:$16 sps:$4 sm:$0xff]   ;;  %v1363_v28 = vld [vmem:[%s2095_s1 + $0xe4] ss:$16 sps:$4 sm:$0xff]   ;;  %v1365_v29 = vld [vmem:[%s2095_s1 + $0xec] ss:$16 sps:$4 sm:$0xff]  }
   0xb   :  { %519 = vmatpush1.bf16.msra.mxu0 %v1337_v10  ;;  %592 = vmatpush1.bf16.msra.mxu1 %v1338_v11  ;;  %v1367_v30 = vld [vmem:[%s2095_s1 + $0xe0] ss:$16 sps:$4 sm:$0xff]   ;;  %v1368_v31 = vld [vmem:[%s2095_s1 + $0xe8] ss:$16 sps:$4 sm:$0xff]   ;;  %v1369_v32 = vld [vmem:[%s2095_s1 + $0x104] ss:$16 sps:$4 sm:$0xff]  }
   0xc   :  { %520 = vmatprep.subr.bf16.mxu0 %v1339_v12  ;;  %593 = vmatprep.subr.bf16.mxu1 %v1341_v13  ;;  %v1371_v33 = vld [vmem:[%s2095_s1 + $0x10c] ss:$16 sps:$4 sm:$0xff]   ;;  %v1373_v34 = vld [vmem:[%s2095_s1 + $0x100] ss:$16 sps:$4 sm:$0xff]   ;;  %v1374_v35 = vld [vmem:[%s2095_s1 + $0x108] ss:$16 sps:$4 sm:$0xff]  }
   0xd   :  { %v1375_v36 = vld [vmem:[%s2095_s1 + $0x124] ss:$16 sps:$4 sm:$0xff]   ;;  %v1377_v37 = vld [vmem:[%s2095_s1 + $0x12c] ss:$16 sps:$4 sm:$0xff]   ;;  %v1379_v38 = vld [vmem:[%s2095_s1 + $0x120] ss:$16 sps:$4 sm:$0xff]  }
   0xe   :  { %v1380_v39 = vld [vmem:[%s2095_s1 + $0x128] ss:$16 sps:$4 sm:$0xff]   ;;  %v1381_v40 = vld [vmem:[%s2095_s1 + $0x144] ss:$16 sps:$4 sm:$0xff]   ;;  %v1383_v41 = vld [vmem:[%s2095_s1 + $0x14c] ss:$16 sps:$4 sm:$0xff]  }
   0xf   :  { %521 = vmatpush1.bf16.msra.mxu0 %v1343_v14  ;;  %594 = vmatpush1.bf16.msra.mxu1 %v1344_v15  ;;  %v1385_v42 = vld [vmem:[%s2095_s1 + $0x140] ss:$16 sps:$4 sm:$0xff]   ;;  %v1386_v43 = vld [vmem:[%s2095_s1 + $0x148] ss:$16 sps:$4 sm:$0xff]   ;;  %v1387_v44 = vld [vmem:[%s2095_s1 + $0x164] ss:$16 sps:$4 sm:$0xff]  }
  0x10   :  { %522 = vmatprep.subr.bf16.mxu0 %v1345_v16  ;;  %595 = vmatprep.subr.bf16.mxu1 %v1347_v17  ;;  %v1389_v45 = vld [vmem:[%s2095_s1 + $0x16c] ss:$16 sps:$4 sm:$0xff]   ;;  %v1391_v46 = vld [vmem:[%s2095_s1 + $0x160] ss:$16 sps:$4 sm:$0xff]   ;;  %v1392_v47 = vld [vmem:[%s2095_s1 + $0x168] ss:$16 sps:$4 sm:$0xff]  }
  0x11   :  { %v1419_v48 = vld [vmem:[%s2096_s0 + $0x4] ss:$8 sps:$4 sm:$0xff]   ;;  %v1397_v51 = vld [vmem:[%s2095_s1 + $0x180] ss:$16 sps:$4 sm:$0xff]   ;;  %v1398_v52 = vld [vmem:[%s2095_s1 + $0x188] ss:$16 sps:$4 sm:$0xff]  }
  0x12   :  { %v1393_v49 = vld [vmem:[%s2095_s1 + $0x184] ss:$16 sps:$4 sm:$0xff]   ;;  %v1395_v50 = vld [vmem:[%s2095_s1 + $0x18c] ss:$16 sps:$4 sm:$0xff]   ;;  %546 = vmatprep.mubr.bf16.mxu0 %v1419_v48  ;;  %619 = vmatprep.mubr.bf16.mxu1 %v1419_v48  ;;  %v1403_v55 = vld [vmem:[%s2095_s1 + $0x1a0] ss:$16 sps:$4 sm:$0xff]  }
  0x13   :  { %523 = vmatpush1.bf16.msra.mxu0 %v1349_v18  ;;  %596 = vmatpush1.bf16.msra.mxu1 %v1350_v19  ;;  %v1399_v53 = vld [vmem:[%s2095_s1 + $0x1a4] ss:$16 sps:$4 sm:$0xff]   ;;  %v1401_v54 = vld [vmem:[%s2095_s1 + $0x1ac] ss:$16 sps:$4 sm:$0xff]   ;;  %v1404_v56 = vld [vmem:[%s2095_s1 + $0x1a8] ss:$16 sps:$4 sm:$0xff]  }
  0x14   :  { %524 = vmatprep.subr.bf16.mxu0 %v1351_v20  ;;  %597 = vmatprep.subr.bf16.mxu1 %v1353_v21  ;;  %v1405_v57 = vld [vmem:[%s2095_s1 + $0x1c4] ss:$16 sps:$4 sm:$0xff]   ;;  %v1407_v58 = vld [vmem:[%s2095_s1 + $0x1cc] ss:$16 sps:$4 sm:$0xff]   ;;  %v1409_v59 = vld [vmem:[%s2095_s1 + $0x1c0] ss:$16 sps:$4 sm:$0xff]  }
  0x15   :  { %v1410_v60 = vld [vmem:[%s2095_s1 + $0x1c8] ss:$16 sps:$4 sm:$0xff]   ;;  %v1411_v61 = vld [vmem:[%s2095_s1 + $0x1e4] ss:$16 sps:$4 sm:$0xff]   ;;  %v1413_v62 = vld [vmem:[%s2095_s1 + $0x1ec] ss:$16 sps:$4 sm:$0xff]  }
  0x16   :  { %v1415_v63 = vld [vmem:[%s2095_s1 + $0x1e0] ss:$16 sps:$4 sm:$0xff]   ;;  %v1416_v0 = vld [vmem:[%s2095_s1 + $0x1e8] ss:$16 sps:$4 sm:$0xff]   ;;  %v1420_v2 = vld [vmem:[%s2096_s0 + $0x14] ss:$8 sps:$4 sm:$0xff]  }
  0x17   :  { %525 = vmatpush1.bf16.msra.mxu0 %v1355_v22  ;;  %598 = vmatpush1.bf16.msra.mxu1 %v1356_v23  ;;  %v1417_v1 = vld [vmem:[%s2096_s0] ss:$8 sps:$4 sm:$0xff]   ;;  %v1422_v3 = vld [vmem:[%s2096_s0 + $0x10] ss:$8 sps:$4 sm:$0xff]   ;;  %v1423_v4 = vld [vmem:[%s2096_s0 + $0x24] ss:$8 sps:$4 sm:$0xff]  }
  0x18   :  { %526 = vmatprep.subr.bf16.mxu0 %v1357_v24  ;;  %599 = vmatprep.subr.bf16.mxu1 %v1359_v25  ;;  %v1425_v5 = vld [vmem:[%s2096_s0 + $0x20] ss:$8 sps:$4 sm:$0xff]   ;;  %v1426_v6 = vld [vmem:[%s2096_s0 + $0x34] ss:$8 sps:$4 sm:$0xff]   ;;  %v1428_v7 = vld [vmem:[%s2096_s0 + $0x30] ss:$8 sps:$4 sm:$0xff]  }
  0x19   :  { %v762_v9 = vshrl.u32 %v761_v8, 7  ;;  %v759_v12 = vld [vmem:[%s2097_s2] sm:$0xf] }
  0x1b   :  { %527 = vmatpush1.bf16.msra.mxu0 %v1361_v26  ;;  %600 = vmatpush1.bf16.msra.mxu1 %v1362_v27  ;;  %v763_v10 = vsub.s32 0, %v762_v9  ;;  %v771_v11 = vsub.s32 2, %v762_v9  ;;  %v767_v13 = vsub.s32 1, %v762_v9  ;;  %v775_v14 = vsub.s32 3, %v762_v9 }
  0x1c   :  { %528 = vmatprep.subr.bf16.mxu0 %v1363_v28  ;;  %601 = vmatprep.subr.bf16.mxu1 %v1365_v29 }
  0x1d   :  { %v1732_v15 = vrot.slane %v759_v12, %v763_v10  ;;  %v1734_v16 = vrot.slane %v759_v12, %v771_v11  ;;  %v1736_v17 = vrot.slane %v759_v12, %v767_v13  ;;  %v1738_v18 = vrot.slane %v759_v12, %v775_v14 }
  0x1f   :  { %529 = vmatpush1.bf16.msra.mxu0 %v1367_v30  ;;  %602 = vmatpush1.bf16.msra.mxu1 %v1368_v31 }
  0x20   :  { %530 = vmatprep.subr.bf16.mxu0 %v1369_v32  ;;  %603 = vmatprep.subr.bf16.mxu1 %v1371_v33 }
  0x23   :  { %531 = vmatpush1.bf16.msra.mxu0 %v1373_v34  ;;  %604 = vmatpush1.bf16.msra.mxu1 %v1374_v35 }
  0x24   :  { %532 = vmatprep.subr.bf16.mxu0 %v1375_v36  ;;  %605 = vmatprep.subr.bf16.mxu1 %v1377_v37 }
  0x27   :  { %533 = vmatpush1.bf16.msra.mxu0 %v1379_v38  ;;  %606 = vmatpush1.bf16.msra.mxu1 %v1380_v39 }
  0x28   :  { %534 = vmatprep.subr.bf16.mxu0 %v1381_v40  ;;  %607 = vmatprep.subr.bf16.mxu1 %v1383_v41 }
  0x2b   :  { %535 = vmatpush1.bf16.msra.mxu0 %v1385_v42  ;;  %608 = vmatpush1.bf16.msra.mxu1 %v1386_v43 }
  0x2c   :  { %536 = vmatprep.subr.bf16.mxu0 %v1387_v44  ;;  %609 = vmatprep.subr.bf16.mxu1 %v1389_v45 }
  0x2f   :  { %537 = vmatpush1.bf16.msra.mxu0 %v1391_v46  ;;  %610 = vmatpush1.bf16.msra.mxu1 %v1392_v47 }
  0x30   :  { %538 = vmatprep.subr.bf16.mxu0 %v1393_v49  ;;  %611 = vmatprep.subr.bf16.mxu1 %v1395_v50 }
  0x33   :  { %539 = vmatpush1.bf16.msra.mxu0 %v1397_v51  ;;  %612 = vmatpush1.bf16.msra.mxu1 %v1398_v52 }
  0x34   :  { %540 = vmatprep.subr.bf16.mxu0 %v1399_v53  ;;  %613 = vmatprep.subr.bf16.mxu1 %v1401_v54 }
  0x37   :  { %541 = vmatpush1.bf16.msra.mxu0 %v1403_v55  ;;  %614 = vmatpush1.bf16.msra.mxu1 %v1404_v56 }
  0x38   :  { %542 = vmatprep.subr.bf16.mxu0 %v1405_v57  ;;  %615 = vmatprep.subr.bf16.mxu1 %v1407_v58 }
  0x3b   :  { %543 = vmatpush1.bf16.msra.mxu0 %v1409_v59  ;;  %616 = vmatpush1.bf16.msra.mxu1 %v1410_v60 }
  0x3c   :  { %544 = vmatprep.subr.bf16.mxu0 %v1411_v61  ;;  %617 = vmatprep.subr.bf16.mxu1 %v1413_v62 }
  0x3f   :  { %545 = vmatpush1.bf16.msra.mxu0 %v1415_v63  ;;  %618 = vmatpush1.bf16.msra.mxu1 %v1416_v0 }
  0x42   :  { %547 = vmatmul.mubr.bf16.vlgmr.msra.gmra.mrb[0].mxu0 %v1417_v1  ;;  %620 = vmatmul.mubr.bf16.vlgmr.msra.gmra.mrb[0].mxu1 %v1417_v1 }
  0x43   :  { %556 = vmatprep.mubr.bf16.mxu0 %v1420_v2  ;;  %629 = vmatprep.mubr.bf16.mxu1 %v1420_v2 }
  0x4a   :  { %557 = vmatmul.mubr.bf16.gmra.mrb[4].mxu0 %v1422_v3  ;;  %630 = vmatmul.mubr.bf16.gmra.mrb[4].mxu1 %v1422_v3 }
  0x4b   :  { %566 = vmatprep.mubr.bf16.mxu0 %v1423_v4  ;;  %639 = vmatprep.mubr.bf16.mxu1 %v1423_v4 }
  0x52   :  { %567 = vmatmul.mubr.bf16.gmra.mrb[8].mxu0 %v1425_v5  ;;  %640 = vmatmul.mubr.bf16.gmra.mrb[8].mxu1 %v1425_v5 }
  0x53   :  { %576 = vmatprep.mubr.bf16.mxu0 %v1426_v6  ;;  %649 = vmatprep.mubr.bf16.mxu1 %v1426_v6 }
  0x5a   :  { %577 = vmatmul.mubr.bf16.gmra.mrb[12].mxu0 %v1428_v7  ;;  %650 = vmatmul.mubr.bf16.gmra.mrb[12].mxu1 %v1428_v7 }
 0x115   :  { %v548_v19 = vpop.f32.mrb[0].mxu0  ;;  %v621_v20 = vpop.f32.mrb[0].mxu1 }
 0x116   :  { %v1741_v21 = vadd.f32 %v1732_v15, %v548_v19  ;;  %v1744_v22 = vadd.f32 %v1734_v16, %v621_v20  ;;  %v550_v23 = vpop.f32.mrb[1].mxu0  ;;  %v623_v24 = vpop.f32.mrb[1].mxu1 }
 0x117   :  { %v1747_v25 = vadd.f32 %v1736_v17, %v550_v23  ;;  %v1750_v26 = vadd.f32 %v1738_v18, %v623_v24  ;;  %v552_v27 = vpop.f32.mrb[2].mxu0  ;;  %v625_v28 = vpop.f32.mrb[2].mxu1 }
 0x118   :  { %v813_v29 = vmul.f32 %v1741_v21, %v1741_v21  ;;  %v815_v30 = vmul.f32 %v1744_v22, %v1744_v22  ;;  %v1757_v31 = vadd.f32 %v1732_v15, %v552_v27  ;;  %v1760_v32 = vadd.f32 %v1734_v16, %v625_v28  ;;  %v554_v33 = vpop.f32.mrb[3].mxu0  ;;  %v627_v34 = vpop.f32.mrb[3].mxu1 }
 0x119   :  { %v814_v35 = vmul.f32 %v1747_v25, %v1747_v25  ;;  %v816_v36 = vmul.f32 %v1750_v26, %v1750_v26  ;;  %v1767_v37 = vadd.f32 %v1736_v17, %v554_v33  ;;  %v1770_v38 = vadd.f32 %v1738_v18, %v627_v34 }
 0x11a   :  { %v845_v39 = vmul.f32 %v813_v29, %v1741_v21  ;;  %v847_v40 = vmul.f32 %v815_v30, %v1744_v22  ;;  %v817_v41 = vmul.f32 %v1757_v31, %v1757_v31  ;;  %v819_v42 = vmul.f32 %v1760_v32, %v1760_v32 }
 0x11b   :  { %v846_v43 = vmul.f32 %v814_v35, %v1747_v25  ;;  %v848_v44 = vmul.f32 %v816_v36, %v1750_v26  ;;  %v818_v45 = vmul.f32 %v1767_v37, %v1767_v37  ;;  %v820_v46 = vmul.f32 %v1770_v38, %v1770_v38 }
 0x11c   :  { %v877_v47 = vmul.f32 0.044715, %v845_v39  ;;  %v879_v48 = vmul.f32 0.044715, %v847_v40  ;;  %v849_v49 = vmul.f32 %v817_v41, %v1757_v31  ;;  %v851_v50 = vmul.f32 %v819_v42, %v1760_v32 }
 0x11d   :  { %v878_v51 = vmul.f32 0.044715, %v846_v43  ;;  %v880_v52 = vmul.f32 0.044715, %v848_v44  ;;  %v850_v53 = vmul.f32 %v818_v45, %v1767_v37  ;;  %v852_v54 = vmul.f32 %v820_v46, %v1770_v38  ;;  %v558_v55 = vpop.f32.mrb[4].mxu0  ;;  %v631_v56 = vpop.f32.mrb[4].mxu1 }
 0x11e   :  { %v909_v57 = vadd.f32 %v877_v47, %v1741_v21  ;;  %v911_v58 = vadd.f32 %v879_v48, %v1744_v22  ;;  %v881_v59 = vmul.f32 0.044715, %v849_v49  ;;  %v883_v60 = vmul.f32 0.044715, %v851_v50  ;;  %v560_v61 = vpop.f32.mrb[5].mxu0  ;;  %v633_v62 = vpop.f32.mrb[5].mxu1 }
 0x11f   :  { %v910_v63 = vadd.f32 %v878_v51, %v1747_v25  ;;  %v912_v0 = vadd.f32 %v880_v52, %v1750_v26  ;;  %v882_v1 = vmul.f32 0.044715, %v850_v53  ;;  %v884_v2 = vmul.f32 0.044715, %v852_v54  ;;  %v562_v3 = vpop.f32.mrb[6].mxu0  ;;  %v635_v4 = vpop.f32.mrb[6].mxu1 }
 0x120   :  { %v941_v5 = vmul.f32 0.7978846, %v909_v57  ;;  %v943_v6 = vmul.f32 0.7978846, %v911_v58  ;;  %v913_v7 = vadd.f32 %v881_v59, %v1757_v31  ;;  %v915_v8 = vadd.f32 %v883_v60, %v1760_v32  ;;  %v564_v9 = vpop.f32.mrb[7].mxu0  ;;  %v637_v10 = vpop.f32.mrb[7].mxu1 }
 0x121   :  { %v942_v11 = vmul.f32 0.7978846, %v910_v63  ;;  %v944_v12 = vmul.f32 0.7978846, %v912_v0  ;;  %v914_v13 = vadd.f32 %v882_v1, %v1767_v37  ;;  %v916_v14 = vadd.f32 %v884_v2, %v1770_v38 }
 0x122   :  { %1429 = vtanh.f32 %v941_v5  ;;  %v945_v19 = vmul.f32 0.7978846, %v913_v7  ;;  %v947_v20 = vmul.f32 0.7978846, %v915_v8  ;;  %v1797_v23 = vadd.f32 %v1732_v15, %v558_v55 }
 0x123   :  { %1431 = vtanh.f32 %v943_v6  ;;  %v946_v24 = vmul.f32 0.7978846, %v914_v13  ;;  %v948_v27 = vmul.f32 0.7978846, %v916_v14  ;;  %v1800_v28 = vadd.f32 %v1734_v16, %v631_v56 }
 0x124   :  { %1433 = vtanh.f32 %v942_v11  ;;  %v821_v29 = vmul.f32 %v1797_v23, %v1797_v23  ;;  %v1805_v30 = vadd.f32 %v1736_v17, %v560_v61  ;;  %v1808_v33 = vadd.f32 %v1738_v18, %v633_v62 }
 0x125   :  { %1435 = vtanh.f32 %v944_v12  ;;  %v823_v34 = vmul.f32 %v1800_v28, %v1800_v28  ;;  %v1813_v35 = vadd.f32 %v1732_v15, %v562_v3  ;;  %v1816_v36 = vadd.f32 %v1734_v16, %v635_v4  ;;  %v1818_v39 = vpop.f32.mrb[8].mxu0  ;;  %v1820_v40 = vpop.f32.mrb[8].mxu1 }
 0x126   :  { %1437 = vtanh.f32 %v945_v19  ;;  %v853_v41 = vmul.f32 %v821_v29, %v1797_v23  ;;  %v822_v42 = vmul.f32 %v1805_v30, %v1805_v30  ;;  %v824_v43 = vmul.f32 %v1808_v33, %v1808_v33  ;;  %v1827_v44 = vpop.f32.mrb[9].mxu0  ;;  %v1829_v45 = vpop.f32.mrb[9].mxu1 }
 0x127   :  { %1439 = vtanh.f32 %v947_v20  ;;  %v855_v46 = vmul.f32 %v823_v34, %v1800_v28  ;;  %v825_v47 = vmul.f32 %v1813_v35, %v1813_v35  ;;  %v827_v48 = vmul.f32 %v1816_v36, %v1816_v36  ;;  %v1836_v49 = vpop.f32.mrb[10].mxu0  ;;  %v1838_v50 = vpop.f32.mrb[10].mxu1 }
 0x128   :  { %1441 = vtanh.f32 %v946_v24  ;;  %v885_v51 = vmul.f32 0.044715, %v853_v41  ;;  %v854_v52 = vmul.f32 %v822_v42, %v1805_v30  ;;  %v856_v53 = vmul.f32 %v824_v43, %v1808_v33  ;;  %v1842_v54 = vpop.f32.mrb[11].mxu0  ;;  %v1844_v55 = vpop.f32.mrb[11].mxu1 }
 0x129   :  { %1443 = vtanh.f32 %v948_v27  ;;  %v887_v56 = vmul.f32 0.044715, %v855_v46  ;;  %v857_v57 = vmul.f32 %v825_v47, %v1813_v35  ;;  %v859_v58 = vmul.f32 %v827_v48, %v1816_v36 }
 0x12a   :  { %v917_v59 = vadd.f32 %v885_v51, %v1797_v23  ;;  %v886_v60 = vmul.f32 0.044715, %v854_v52  ;;  %v888_v61 = vmul.f32 0.044715, %v856_v53  ;;  %v1850_v62 = vadd.f32 %v1736_v17, %v564_v9 }
 0x12b   :  { %v919_v63 = vadd.f32 %v887_v56, %v1800_v28  ;;  %v889_v0 = vmul.f32 0.044715, %v857_v57  ;;  %v891_v1 = vmul.f32 0.044715, %v859_v58  ;;  %v1854_v2 = vadd.f32 %v1738_v18, %v637_v10 }
 0x12c   :  { %v1430_v3 = vpop.eup %1429  ;;  %v949_v4 = vmul.f32 0.7978846, %v917_v59  ;;  %v918_v5 = vadd.f32 %v886_v60, %v1805_v30  ;;  %v920_v6 = vadd.f32 %v888_v61, %v1808_v33  ;;  %v826_v7 = vmul.f32 %v1850_v62, %v1850_v62 }
 0x12d   :  { %v1432_v8 = vpop.eup %1431  ;;  %v1005_v11 = vadd.f32 1.0, %v1430_v3  ;;  %v951_v9 = vmul.f32 0.7978846, %v919_v63  ;;  %v921_v12 = vadd.f32 %v889_v0, %v1813_v35  ;;  %v923_v13 = vadd.f32 %v891_v1, %v1816_v36  ;;  %v1862_v14 = vpop.f32.mrb[12].mxu0 }
 0x12e   :  { %v1864_v10 = vpop.f32.mrb[12].mxu1  ;;  %v1434_v19 = vpop.eup %1433  ;;  %v1007_v20 = vadd.f32 1.0, %v1432_v8  ;;  %1445 = vtanh.f32 %v949_v4  ;;  %v950_v24 = vmul.f32 0.7978846, %v918_v5  ;;  %v952_v27 = vmul.f32 0.7978846, %v920_v6 }
 0x12f   :  { %v1866_v29 = vpop.f32.mrb[13].mxu0  ;;  %v1436_v34 = vpop.eup %1435  ;;  %v1037_v41 = vmul.f32 0.5, %v1005_v11  ;;  %v1006_v42 = vadd.f32 1.0, %v1434_v19  ;;  %1447 = vtanh.f32 %v951_v9  ;;  %v953_v43 = vmul.f32 0.7978846, %v921_v12 }
 0x130   :  { %v1868_v46 = vpop.f32.mrb[13].mxu1  ;;  %v1870_v47 = vpop.f32.mrb[14].mxu0  ;;  %v1039_v51 = vmul.f32 0.5, %v1007_v20  ;;  %v1008_v52 = vadd.f32 1.0, %v1436_v34  ;;  %1449 = vtanh.f32 %v950_v24  ;;  %v955_v53 = vmul.f32 0.7978846, %v923_v13 }
 0x131   :  { %v1438_v48 = vpop.eup %1437  ;;  %v1872_v56 = vpop.f32.mrb[14].mxu1  ;;  %v1069_v59 = vmul.f32 %v1037_v41, %v1741_v21  ;;  %v1038_v60 = vmul.f32 0.5, %v1006_v42  ;;  %1451 = vtanh.f32 %v952_v27  ;;  %v858_v13 = vmul.f32 %v826_v7, %v1850_v62 }
 0x132   :  { %v1874_v57 = vpop.f32.mrb[15].mxu0  ;;  %v1440_v58 = vpop.eup %1439  ;;  %v1009_v61 = vadd.f32 1.0, %v1438_v48  ;;  %v1071_v1 = vmul.f32 %v1039_v51, %v1744_v22  ;;  %v1040_v3 = vmul.f32 0.5, %v1008_v52  ;;  %1453 = vtanh.f32 %v953_v43 }
 0x133   :  { %v1877_v63 = vpop.f32.mrb[15].mxu1  ;;  %v1442_v0 = vpop.eup %1441  ;;  %v1011_v4 = vadd.f32 1.0, %v1440_v58  ;;  %v1070_v6 = vmul.f32 %v1038_v60, %v1747_v25  ;;  %1455 = vtanh.f32 %v955_v53  ;;  %v828_v22 = vmul.f32 %v1854_v2, %v1854_v2 }
 0x134   :  { %v1444_v5 = vpop.eup %1443  ;;  %v1041_v8 = vmul.f32 0.5, %v1009_v61  ;;  %v1010_v11 = vadd.f32 1.0, %v1442_v0  ;;  %v1072_v9 = vmul.f32 %v1040_v3, %v1750_v26  ;;  %v890_v41 = vmul.f32 0.044715, %v858_v13 }
 0x135   :  { %v1043_v21 = vmul.f32 0.5, %v1011_v4  ;;  %v1012_v12 = vadd.f32 1.0, %v1444_v5  ;;  %v1305_v19 = vpack.c.bf16 %v1070_v6, %v1069_v59  ;;  %v860_v7 = vmul.f32 %v828_v22, %v1854_v2 }
 0x136   :  { %v1073_v20 = vmul.f32 %v1041_v8, %v1757_v31  ;;  %v1042_v24 = vmul.f32 0.5, %v1010_v11  ;;  %v1306_v27 = vpack.c.bf16 %v1072_v9, %v1071_v1  ;;  %v1894_v31 = vadd.f32 %v1732_v15, %v1818_v39 }
 0x137   :  { %v1075_v34 = vmul.f32 %v1043_v21, %v1760_v32  ;;  %v1044_v25 = vmul.f32 0.5, %v1012_v12  ;;  %1197 = vst [vmem:[%s2098_s3] sm:$0xff] %v1305_v19  ;;  %v1898_v42 = vadd.f32 %v1734_v16, %v1820_v40  ;;  %v922_v48 = vadd.f32 %v890_v41, %v1850_v62 }
 0x138   :  { %v1074_v26 = vmul.f32 %v1042_v24, %v1767_v37  ;;  %v1446_v43 = vpop.eup %1445  ;;  %1198 = vst [vmem:[%s2098_s3 + $0x8] sm:$0xff] %v1306_v27  ;;  %v1907_v37 = vadd.f32 %v1736_v17, %v1827_v44  ;;  %v1911_v39 = vadd.f32 %v1738_v18, %v1829_v45  ;;  %v892_v53 = vmul.f32 0.044715, %v860_v7 }
 0x139   :  { %v1076_v32 = vmul.f32 %v1044_v25, %v1770_v38  ;;  %v1448_v51 = vpop.eup %1447  ;;  %v1013_v52 = vadd.f32 1.0, %v1446_v43  ;;  %v829_v58 = vmul.f32 %v1894_v31, %v1894_v31  ;;  %v954_v61 = vmul.f32 0.7978846, %v922_v48 }
 0x13a   :  { %v1307_v40 = vpack.c.bf16 %v1074_v26, %v1073_v20  ;;  %v1450_v59 = vpop.eup %1449  ;;  %v1015_v38 = vadd.f32 1.0, %v1448_v51  ;;  %v831_v0 = vmul.f32 %v1898_v42, %v1898_v42  ;;  %v924_v3 = vadd.f32 %v892_v53, %v1854_v2 }
 0x13b   :  { %v1308_v60 = vpack.c.bf16 %v1076_v32, %v1075_v34  ;;  %v1452_v44 = vpop.eup %1451  ;;  %v1045_v45 = vmul.f32 0.5, %v1013_v52  ;;  %v1014_v1 = vadd.f32 1.0, %v1450_v59  ;;  %v861_v4 = vmul.f32 %v829_v58, %v1894_v31 }
 0x13c   :  { %1199 = vst [vmem:[%s2098_s3 + $0x10] sm:$0xff] %v1307_v40  ;;  %v1454_v5 = vpop.eup %1453  ;;  %v1047_v6 = vmul.f32 0.5, %v1015_v38  ;;  %v1016_v8 = vadd.f32 1.0, %v1452_v44  ;;  %1457 = vtanh.f32 %v954_v61  ;;  %v863_v11 = vmul.f32 %v831_v0, %v1898_v42 }
 0x13d   :  { %1200 = vst [vmem:[%s2098_s3 + $0x18] sm:$0xff] %v1308_v60  ;;  %v1456_v9 = vpop.eup %1455  ;;  %v1077_v21 = vmul.f32 %v1045_v45, %v1797_v23  ;;  %v1046_v12 = vmul.f32 0.5, %v1014_v1  ;;  %v1017_v13 = vadd.f32 1.0, %v1454_v5  ;;  %v956_v19 = vmul.f32 0.7978846, %v924_v3 }
 0x13e   :  { %v1079_v20 = vmul.f32 %v1047_v6, %v1800_v28  ;;  %v1048_v24 = vmul.f32 0.5, %v1016_v8  ;;  %v1019_v22 = vadd.f32 1.0, %v1456_v9  ;;  %v893_v27 = vmul.f32 0.044715, %v861_v4 }
 0x13f   :  { %v1078_v34 = vmul.f32 %v1046_v12, %v1805_v30  ;;  %v1049_v25 = vmul.f32 0.5, %v1017_v13  ;;  %1459 = vtanh.f32 %v956_v19  ;;  %v895_v41 = vmul.f32 0.044715, %v863_v11 }
 0x140   :  { %v1080_v26 = vmul.f32 %v1048_v24, %v1808_v33  ;;  %v1051_v7 = vmul.f32 0.5, %v1019_v22  ;;  %v925_v43 = vadd.f32 %v893_v27, %v1894_v31  ;;  %v830_v23 = vmul.f32 %v1907_v37, %v1907_v37 }
 0x141   :  { %v1309_v32 = vpack.c.bf16 %v1078_v34, %v1077_v21  ;;  %v1081_v48 = vmul.f32 %v1049_v25, %v1813_v35  ;;  %v927_v28 = vadd.f32 %v895_v41, %v1898_v42  ;;  %v832_v51 = vmul.f32 %v1911_v39, %v1911_v39 }
 0x142   :  { %v1310_v30 = vpack.c.bf16 %v1080_v26, %v1079_v20  ;;  %v1938_v40 = vmul.f32 %v1051_v7, %v1816_v36  ;;  %v957_v52 = vmul.f32 0.7978846, %v925_v43  ;;  %v862_v33 = vmul.f32 %v830_v23, %v1907_v37 }
 0x143   :  { %1201 = vst [vmem:[%s2098_s3 + $0x20] sm:$0xff] %v1309_v32  ;;  %v959_v53 = vmul.f32 0.7978846, %v927_v28  ;;  %v864_v58 = vmul.f32 %v832_v51, %v1911_v39  ;;  %v1947_v35 = vadd.f32 %v1732_v15, %v1836_v49  ;;  %v1951_v59 = vadd.f32 %v1734_v16, %v1838_v50 }
 0x144   :  { %1202 = vst [vmem:[%s2098_s3 + $0x28] sm:$0xff] %v1310_v30  ;;  %1461 = vtanh.f32 %v957_v52  ;;  %v894_v36 = vmul.f32 0.044715, %v862_v33  ;;  %v1958_v60 = vadd.f32 %v1736_v17, %v1842_v54  ;;  %v1962_v38 = vadd.f32 %v1738_v18, %v1844_v55 }
 0x145   :  { %1463 = vtanh.f32 %v959_v53  ;;  %v896_v49 = vmul.f32 0.044715, %v864_v58  ;;  %v833_v50 = vmul.f32 %v1947_v35, %v1947_v35  ;;  %v835_v61 = vmul.f32 %v1951_v59, %v1951_v59 }
 0x146   :  { %v1458_v0 = vpop.eup %1457  ;;  %v926_v44 = vadd.f32 %v894_v36, %v1907_v37  ;;  %v834_v45 = vmul.f32 %v1958_v60, %v1958_v60  ;;  %v836_v54 = vmul.f32 %v1962_v38, %v1962_v38  ;;  %v1975_v55 = vadd.f32 %v1732_v15, %v1862_v14 }
 0x147   :  { %v1018_v1 = vadd.f32 1.0, %v1458_v0  ;;  %v928_v3 = vadd.f32 %v896_v49, %v1911_v39  ;;  %v865_v4 = vmul.f32 %v833_v50, %v1947_v35  ;;  %v867_v5 = vmul.f32 %v835_v61, %v1951_v59 }
 0x148   :  { %v958_v6 = vmul.f32 0.7978846, %v926_v44  ;;  %v866_v8 = vmul.f32 %v834_v45, %v1958_v60  ;;  %v868_v11 = vmul.f32 %v836_v54, %v1962_v38  ;;  %v837_v9 = vmul.f32 %v1975_v55, %v1975_v55 }
 0x149   :  { %v1460_v21 = vpop.eup %1459  ;;  %v1050_v12 = vmul.f32 0.5, %v1018_v1  ;;  %v960_v13 = vmul.f32 0.7978846, %v928_v3  ;;  %v897_v14 = vmul.f32 0.044715, %v865_v4  ;;  %v1986_v19 = vadd.f32 %v1734_v16, %v1864_v10 }
 0x14a   :  { %v1020_v20 = vadd.f32 1.0, %v1460_v21  ;;  %1465 = vtanh.f32 %v958_v6  ;;  %v899_v24 = vmul.f32 0.044715, %v867_v5  ;;  %v898_v22 = vmul.f32 0.044715, %v866_v8 }
 0x14b   :  { %v1082_v27 = vmul.f32 %v1050_v12, %v1850_v62  ;;  %1467 = vtanh.f32 %v960_v13  ;;  %v929_v34 = vadd.f32 %v897_v14, %v1947_v35  ;;  %v900_v25 = vmul.f32 0.044715, %v868_v11 }
 0x14c   :  { %v1052_v41 = vmul.f32 0.5, %v1020_v20  ;;  %v931_v26 = vadd.f32 %v899_v24, %v1951_v59  ;;  %v930_v7 = vadd.f32 %v898_v22, %v1958_v60  ;;  %v869_v43 = vmul.f32 %v837_v9, %v1975_v55 }
 0x14d   :  { %v1311_v23 = vpack.c.bf16 %v1082_v27, %v1081_v48  ;;  %v961_v10 = vmul.f32 0.7978846, %v929_v34  ;;  %v932_v32 = vadd.f32 %v900_v25, %v1962_v38  ;;  %v839_v28 = vmul.f32 %v1986_v19, %v1986_v19 }
 0x14e   :  { %v1462_v51 = vpop.eup %1461  ;;  %v1084_v62 = vmul.f32 %v1052_v41, %v1854_v2  ;;  %v963_v30 = vmul.f32 0.7978846, %v931_v26  ;;  %v962_v52 = vmul.f32 0.7978846, %v930_v7  ;;  %v901_v33 = vmul.f32 0.044715, %v869_v43 }
 0x14f   :  { %v1464_v53 = vpop.eup %1463  ;;  %1203 = vst [vmem:[%s2098_s3 + $0x30] sm:$0xff] %v1311_v23  ;;  %v1021_v58 = vadd.f32 1.0, %v1462_v51  ;;  %1469 = vtanh.f32 %v961_v10  ;;  %v964_v48 = vmul.f32 0.7978846, %v932_v32  ;;  %v871_v36 = vmul.f32 %v839_v28, %v1986_v19 }
 0x150   :  { %v1312_v49 = vpack.c.bf16 %v1084_v62, %v1938_v40  ;;  %v1023_v50 = vadd.f32 1.0, %v1464_v53  ;;  %1471 = vtanh.f32 %v963_v30  ;;  %v933_v61 = vadd.f32 %v901_v33, %v1975_v55 }
 0x151   :  { %v1053_v2 = vmul.f32 0.5, %v1021_v58  ;;  %1473 = vtanh.f32 %v962_v52  ;;  %v903_v0 = vmul.f32 0.044715, %v871_v36  ;;  %v2005_v44 = vadd.f32 %v1736_v17, %v1866_v29 }
 0x152   :  { %1204 = vst [vmem:[%s2098_s3 + $0x38] sm:$0xff] %v1312_v49  ;;  %v1055_v45 = vmul.f32 0.5, %v1023_v50  ;;  %1475 = vtanh.f32 %v964_v48  ;;  %v965_v54 = vmul.f32 0.7978846, %v933_v61  ;;  %v2012_v40 = vadd.f32 %v1738_v18, %v1868_v46 }
 0x153   :  { %v1085_v1 = vmul.f32 %v1053_v2, %v1894_v31  ;;  %v935_v3 = vadd.f32 %v903_v0, %v1986_v19  ;;  %v838_v4 = vmul.f32 %v2005_v44, %v2005_v44  ;;  %v2020_v29 = vadd.f32 %v1732_v15, %v1870_v47 }
 0x154   :  { %v1466_v5 = vpop.eup %1465  ;;  %v1087_v6 = vmul.f32 %v1055_v45, %v1898_v42  ;;  %1477 = vtanh.f32 %v965_v54  ;;  %v840_v8 = vmul.f32 %v2012_v40, %v2012_v40  ;;  %v2027_v46 = vadd.f32 %v1734_v16, %v1872_v56 }
 0x155   :  { %v1468_v31 = vpop.eup %1467  ;;  %v1022_v11 = vadd.f32 1.0, %v1466_v5  ;;  %v967_v9 = vmul.f32 0.7978846, %v935_v3  ;;  %v870_v21 = vmul.f32 %v838_v4, %v2005_v44  ;;  %v841_v15 = vmul.f32 %v2020_v29, %v2020_v29 }
 0x156   :  { %v1024_v47 = vadd.f32 1.0, %v1468_v31  ;;  %v872_v12 = vmul.f32 %v840_v8, %v2012_v40  ;;  %v843_v42 = vmul.f32 %v2027_v46, %v2027_v46  ;;  %v2037_v13 = vadd.f32 %v1736_v17, %v1874_v57 }
 0x157   :  { %v1054_v16 = vmul.f32 0.5, %v1022_v11  ;;  %1479 = vtanh.f32 %v967_v9  ;;  %v902_v56 = vmul.f32 0.044715, %v870_v21  ;;  %v873_v14 = vmul.f32 %v841_v15, %v2020_v29 }
 0x158   :  { %v1056_v20 = vmul.f32 0.5, %v1024_v47  ;;  %v904_v24 = vmul.f32 0.044715, %v872_v12  ;;  %v875_v22 = vmul.f32 %v843_v42, %v2027_v46  ;;  %v842_v27 = vmul.f32 %v2037_v13, %v2037_v13 }
 0x159   :  { %v1470_v34 = vpop.eup %1469  ;;  %v1086_v25 = vmul.f32 %v1054_v16, %v1907_v37  ;;  %v934_v41 = vadd.f32 %v902_v56, %v2005_v44  ;;  %v905_v26 = vmul.f32 0.044715, %v873_v14  ;;  %v2047_v17 = vadd.f32 %v1738_v18, %v1877_v63 }
 0x15a   :  { %v1472_v57 = vpop.eup %1471  ;;  %v1088_v7 = vmul.f32 %v1056_v20, %v1911_v39  ;;  %v1025_v43 = vadd.f32 1.0, %v1470_v34  ;;  %v936_v23 = vadd.f32 %v904_v24, %v2012_v40  ;;  %v907_v10 = vmul.f32 0.044715, %v875_v22 }
 0x15b   :  { %v1474_v32 = vpop.eup %1473  ;;  %v1313_v28 = vpack.c.bf16 %v1086_v25, %v1085_v1  ;;  %v1027_v51 = vadd.f32 1.0, %v1472_v57  ;;  %v966_v62 = vmul.f32 0.7978846, %v934_v41  ;;  %v937_v37 = vadd.f32 %v905_v26, %v2020_v29 }
 0x15c   :  { %v1476_v30 = vpop.eup %1475  ;;  %v1314_v52 = vpack.c.bf16 %v1088_v7, %v1087_v6  ;;  %v1057_v33 = vmul.f32 0.5, %v1025_v43  ;;  %v1026_v53 = vadd.f32 1.0, %v1474_v32  ;;  %v968_v58 = vmul.f32 0.7978846, %v936_v23 }
 0x15d   :  { %1205 = vst [vmem:[%s2098_s3 + $0x40] sm:$0xff] %v1313_v28  ;;  %v1059_v18 = vmul.f32 0.5, %v1027_v51  ;;  %v1028_v63 = vadd.f32 1.0, %v1476_v30  ;;  %1481 = vtanh.f32 %v966_v62  ;;  %v969_v39 = vmul.f32 0.7978846, %v937_v37 }
 0x15e   :  { %v1478_v48 = vpop.eup %1477  ;;  %1206 = vst [vmem:[%s2098_s3 + $0x48] sm:$0xff] %v1314_v52  ;;  %v1089_v36 = vmul.f32 %v1057_v33, %v1947_v35  ;;  %v1058_v49 = vmul.f32 0.5, %v1026_v53  ;;  %1483 = vtanh.f32 %v968_v58  ;;  %v939_v50 = vadd.f32 %v907_v10, %v2027_v46 }
 0x15f   :  { %v1091_v61 = vmul.f32 %v1059_v18, %v1951_v59  ;;  %v1060_v2 = vmul.f32 0.5, %v1028_v63  ;;  %1485 = vtanh.f32 %v969_v39  ;;  %v874_v54 = vmul.f32 %v842_v27, %v2037_v13 }
 0x160   :  { %v1090_v0 = vmul.f32 %v1058_v49, %v1958_v60  ;;  %v971_v45 = vmul.f32 0.7978846, %v939_v50  ;;  %v844_v1 = vmul.f32 %v2047_v17, %v2047_v17  ;;  %v1029_v5 = vadd.f32 1.0, %v1478_v48 }
 0x161   :  { %v1480_v3 = vpop.eup %1479  ;;  %v1092_v4 = vmul.f32 %v1060_v2, %v1962_v38  ;;  %v906_v6 = vmul.f32 0.044715, %v874_v54 }
 0x162   :  { %v1315_v35 = vpack.c.bf16 %v1090_v0, %v1089_v36  ;;  %v1031_v31 = vadd.f32 1.0, %v1480_v3  ;;  %1487 = vtanh.f32 %v971_v45  ;;  %v876_v59 = vmul.f32 %v844_v1, %v2047_v17 }
 0x163   :  { %v1316_v8 = vpack.c.bf16 %v1092_v4, %v1091_v61  ;;  %v938_v60 = vadd.f32 %v906_v6, %v2037_v13  ;;  %v1061_v38 = vmul.f32 0.5, %v1029_v5 }
 0x164   :  { %1207 = vst [vmem:[%s2098_s3 + $0x50] sm:$0xff] %v1315_v35  ;;  %v908_v11 = vmul.f32 0.044715, %v876_v59  ;;  %v1063_v15 = vmul.f32 0.5, %v1031_v31 }
 0x165   :  { %1208 = vst [vmem:[%s2098_s3 + $0x58] sm:$0xff] %v1316_v8  ;;  %v970_v9 = vmul.f32 0.7978846, %v938_v60  ;;  %v1093_v20 = vmul.f32 %v1061_v38, %v1975_v55 }
 0x166   :  { %v940_v47 = vadd.f32 %v908_v11, %v2047_v17  ;;  %v1095_v22 = vmul.f32 %v1063_v15, %v1986_v19 }
 0x167   :  { %v1482_v21 = vpop.eup %1481  ;;  %1489 = vtanh.f32 %v970_v9 }
 0x168   :  { %v1484_v12 = vpop.eup %1483  ;;  %v1030_v42 = vadd.f32 1.0, %v1482_v21  ;;  %v972_v14 = vmul.f32 0.7978846, %v940_v47 }
 0x169   :  { %v1486_v16 = vpop.eup %1485  ;;  %v1032_v56 = vadd.f32 1.0, %v1484_v12 }
 0x16a   :  { %v1062_v24 = vmul.f32 0.5, %v1030_v42  ;;  %1491 = vtanh.f32 %v972_v14  ;;  %v1033_v26 = vadd.f32 1.0, %v1486_v16 }
 0x16b   :  { %v1064_v27 = vmul.f32 0.5, %v1032_v56 }
 0x16c   :  { %v1094_v34 = vmul.f32 %v1062_v24, %v2005_v44  ;;  %v1488_v25 = vpop.eup %1487  ;;  %v1065_v55 = vmul.f32 0.5, %v1033_v26 }
 0x16d   :  { %v1096_v41 = vmul.f32 %v1064_v27, %v2012_v40  ;;  %v1035_v43 = vadd.f32 1.0, %v1488_v25 }
 0x16e   :  { %v1317_v57 = vpack.c.bf16 %v1094_v34, %v1093_v20  ;;  %v1097_v32 = vmul.f32 %v1065_v55, %v2020_v29 }
 0x16f   :  { %v1318_v7 = vpack.c.bf16 %v1096_v41, %v1095_v22  ;;  %v1067_v10 = vmul.f32 0.5, %v1035_v43 }
 0x170   :  { %1209 = vst [vmem:[%s2098_s3 + $0x60] sm:$0xff] %v1317_v57 }
 0x171   :  { %1210 = vst [vmem:[%s2098_s3 + $0x68] sm:$0xff] %v1318_v7  ;;  %v1490_v19 = vpop.eup %1489  ;;  %v1099_v62 = vmul.f32 %v1067_v10, %v2027_v46 }
 0x172   :  { %v1034_v23 = vadd.f32 1.0, %v1490_v19 }
 0x174   :  { %v1492_v44 = vpop.eup %1491  ;;  %v1066_v40 = vmul.f32 0.5, %v1034_v23 }
 0x175   :  { %v1036_v28 = vadd.f32 1.0, %v1492_v44 }
 0x176   :  { %v1098_v51 = vmul.f32 %v1066_v40, %v2037_v13 }
 0x177   :  { %v1068_v37 = vmul.f32 0.5, %v1036_v28 }
 0x178   :  { %v1319_v30 = vpack.c.bf16 %v1098_v51, %v1097_v32 }
 0x179   :  { %v1100_v52 = vmul.f32 %v1068_v37, %v2047_v17 }
 0x17a   :  { %1211 = vst [vmem:[%s2098_s3 + $0x70] sm:$0xff] %v1319_v30 }
 0x17b   :  { %v1320_v33 = vpack.c.bf16 %v1100_v52, %v1099_v62 }
 0x17d   :  { %1212 = vst [vmem:[%s2098_s3 + $0x78] sm:$0xff] %v1320_v33 }

// kernel: bert_class_forward.14
= control target key start
LH: loop header
LB: loop body
LE: loop exit
PB: predicated region body
PF: predicated region fallthrough
CT: control target
= control target key end

     0   :  { %v229_v3 = vmov 0.0   ;;  %v154_v51 = vlaneseq  ;;  %s367_s1 = inlined_call_operand.vmem [shape: f32[128,256], index: 1, kind: input, shape index: {}]   ;;  %s368_s0 = inlined_call_operand.vmem [shape: f32[14,128], index: 0, kind: input, shape index: {}]   ;;  %s369_s2 = inlined_call_operand.vmem [shape: f32[1,256], index: 2, kind: input, shape index: {}]   ;;  %s370_s3 = inlined_call_operand.vmem [shape: f32[14,256], index: 3, kind: output, shape index: {}]  }
   0x1   :  { %v29_v0 = vld [vmem:[%s367_s1 + $0x8] sm:$0xff]  ;;  %v31_v1 = vld [vmem:[%s367_s1 + $0x18] sm:$0xff]  ;;  %v28_v2 = vld [vmem:[%s367_s1] sm:$0xff]  ;;  %124 = vmatprep.mubr.f32.mxu0 %v229_v3  ;;  %20 = vst [vmem:[#allocation2 + $0x10] sm:$0x3f] %v229_v3  ;;  %130 = vmatprep.mubr.f32.mxu1 %v229_v3 }
   0x2   :  { %21 = vst [vmem:[#allocation2 + $0x18] sm:$0x3f] %v229_v3  ;;  %v180_v4 = vpack.c.bf16 %v31_v1, %v29_v0  ;;  %v30_v5 = vld [vmem:[%s367_s1 + $0x10] sm:$0xff]  ;;  %v33_v6 = vld [vmem:[%s367_s1 + $0x28] sm:$0xff]  ;;  %v35_v7 = vld [vmem:[%s367_s1 + $0x38] sm:$0xff]  ;;  %v155_v52 = vshrl.u32 %v154_v51, 7 }
   0x3   :  { %v182_v8 = vpack.c.bf16 %v30_v5, %v28_v2  ;;  %v184_v9 = vpack.c.bf16 %v35_v7, %v33_v6  ;;  %v32_v10 = vld [vmem:[%s367_s1 + $0x20] sm:$0xff]  ;;  %v34_v11 = vld [vmem:[%s367_s1 + $0x30] sm:$0xff]  ;;  %v37_v12 = vld [vmem:[%s367_s1 + $0x48] sm:$0xff] }
   0x4   :  { %181 = vmatprep.subr.bf16.mxu0 %v180_v4  ;;  %212 = vmatprep.subr.bf16.mxu1 %v180_v4  ;;  %v39_v13 = vld [vmem:[%s367_s1 + $0x58] sm:$0xff]  ;;  %v186_v14 = vpack.c.bf16 %v34_v11, %v32_v10  ;;  %v36_v16 = vld [vmem:[%s367_s1 + $0x40] sm:$0xff]  ;;  %v38_v17 = vld [vmem:[%s367_s1 + $0x50] sm:$0xff]  ;;  %v156_v53 = vsub.s32 0, %v155_v52  ;;  %v160_v55 = vsub.s32 1, %v155_v52 }
   0x5   :  { %183 = vmatpush1.bf16.msra.mxu0 %v182_v8  ;;  %220 = vmatpush1.bf16.msra.mxu1 %v182_v8  ;;  %v188_v15 = vpack.c.bf16 %v39_v13, %v37_v12  ;;  %v41_v18 = vld [vmem:[%s367_s1 + $0x68] sm:$0xff]  ;;  %v43_v19 = vld [vmem:[%s367_s1 + $0x78] sm:$0xff]  ;;  %v190_v20 = vpack.c.bf16 %v38_v17, %v36_v16  ;;  %v40_v22 = vld [vmem:[%s367_s1 + $0x60] sm:$0xff] }
   0x6   :  { %185 = vmatprep.subr.bf16.mxu0 %v184_v9  ;;  %213 = vmatprep.subr.bf16.mxu1 %v184_v9  ;;  %v192_v21 = vpack.c.bf16 %v43_v19, %v41_v18  ;;  %v42_v23 = vld [vmem:[%s367_s1 + $0x70] sm:$0xff]  ;;  %v45_v24 = vld [vmem:[%s367_s1 + $0x88] sm:$0xff]  ;;  %v47_v25 = vld [vmem:[%s367_s1 + $0x98] sm:$0xff] }
   0x7   :  { %v194_v26 = vpack.c.bf16 %v42_v23, %v40_v22  ;;  %v196_v27 = vpack.c.bf16 %v47_v25, %v45_v24  ;;  %v44_v28 = vld [vmem:[%s367_s1 + $0x80] sm:$0xff]  ;;  %v46_v29 = vld [vmem:[%s367_s1 + $0x90] sm:$0xff]  ;;  %v49_v30 = vld [vmem:[%s367_s1 + $0xa8] sm:$0xff] }
   0x8   :  { %v51_v31 = vld [vmem:[%s367_s1 + $0xb8] sm:$0xff]  ;;  %v198_v32 = vpack.c.bf16 %v46_v29, %v44_v28  ;;  %v48_v34 = vld [vmem:[%s367_s1 + $0xa0] sm:$0xff]  ;;  %v50_v35 = vld [vmem:[%s367_s1 + $0xb0] sm:$0xff] }
   0x9   :  { %187 = vmatpush1.bf16.msra.mxu0 %v186_v14  ;;  %221 = vmatpush1.bf16.msra.mxu1 %v186_v14  ;;  %v200_v33 = vpack.c.bf16 %v51_v31, %v49_v30  ;;  %v53_v36 = vld [vmem:[%s367_s1 + $0xc8] sm:$0xff]  ;;  %v55_v37 = vld [vmem:[%s367_s1 + $0xd8] sm:$0xff]  ;;  %v202_v38 = vpack.c.bf16 %v50_v35, %v48_v34  ;;  %v52_v40 = vld [vmem:[%s367_s1 + $0xc0] sm:$0xff] }
   0xa   :  { %189 = vmatprep.subr.bf16.mxu0 %v188_v15  ;;  %214 = vmatprep.subr.bf16.mxu1 %v188_v15  ;;  %v204_v39 = vpack.c.bf16 %v55_v37, %v53_v36  ;;  %v54_v41 = vld [vmem:[%s367_s1 + $0xd0] sm:$0xff]  ;;  %v57_v42 = vld [vmem:[%s367_s1 + $0xe8] sm:$0xff]  ;;  %v59_v43 = vld [vmem:[%s367_s1 + $0xf8] sm:$0xff] }
   0xb   :  { %v206_v44 = vpack.c.bf16 %v54_v41, %v52_v40  ;;  %v208_v45 = vpack.c.bf16 %v59_v43, %v57_v42  ;;  %v56_v46 = vld [vmem:[%s367_s1 + $0xe0] sm:$0xff]  ;;  %v58_v47 = vld [vmem:[%s367_s1 + $0xf0] sm:$0xff]  ;;  %v27_v50 = vld [vmem:[%s368_s0 + $0x8] sm:$0x3f] }
   0xc   :  { %v210_v48 = vpack.c.bf16 %v58_v47, %v56_v46  ;;  %v26_v49 = vld [vmem:[%s368_s0] sm:$0xff]  ;;  %v24_v56 = vld [vmem:[#allocation2 + $0x10] sm:$0x3f]  ;;  %v25_v58 = vld [vmem:[#allocation2 + $0x18] sm:$0x3f] }
   0xd   :  { %191 = vmatpush1.bf16.msra.mxu0 %v190_v20  ;;  %222 = vmatpush1.bf16.msra.mxu1 %v190_v20  ;;  %v152_v54 = vld [vmem:[%s369_s2] sm:$0x3] }
   0xe   :  { %193 = vmatprep.subr.bf16.mxu0 %v192_v21  ;;  %215 = vmatprep.subr.bf16.mxu1 %v192_v21  ;;  %v157_v57 = vrot.slane %v152_v54, %v156_v53  ;;  %v161_v61 = vrot.slane %v152_v54, %v160_v55 }
  0x11   :  { %195 = vmatpush1.bf16.msra.mxu0 %v194_v26  ;;  %223 = vmatpush1.bf16.msra.mxu1 %v194_v26 }
  0x12   :  { %197 = vmatprep.subr.bf16.mxu0 %v196_v27  ;;  %216 = vmatprep.subr.bf16.mxu1 %v196_v27 }
  0x15   :  { %199 = vmatpush1.bf16.msra.mxu0 %v198_v32  ;;  %224 = vmatpush1.bf16.msra.mxu1 %v198_v32 }
  0x16   :  { %201 = vmatprep.subr.bf16.mxu0 %v200_v33  ;;  %217 = vmatprep.subr.bf16.mxu1 %v200_v33 }
  0x19   :  { %203 = vmatpush1.bf16.msra.mxu0 %v202_v38  ;;  %225 = vmatpush1.bf16.msra.mxu1 %v202_v38 }
  0x1a   :  { %205 = vmatprep.subr.bf16.mxu0 %v204_v39  ;;  %218 = vmatprep.subr.bf16.mxu1 %v204_v39 }
  0x1d   :  { %207 = vmatpush1.bf16.msra.mxu0 %v206_v44  ;;  %226 = vmatpush1.bf16.msra.mxu1 %v206_v44 }
  0x1e   :  { %209 = vmatprep.subr.bf16.mxu0 %v208_v45  ;;  %219 = vmatprep.subr.bf16.mxu1 %v208_v45 }
  0x21   :  { %211 = vmatpush1.bf16.msra.mxu0 %v210_v48  ;;  %227 = vmatpush1.bf16.msra.mxu1 %v210_v48 }
  0x24   :  { %125 = vmatmul.mubr.f32.vlgmr.msra.gmra.mrb[0].mxu0 %v26_v49  ;;  %131 = vmatmul.mubr.f32.vlgmr.msra.gmra.mrb[0].mxu1 %v27_v50 }
  0xf7   :  { %v126_v59 = vpop.f32.mrb[0].mxu0  ;;  %v132_v60 = vpop.f32.mrb[0].mxu1 }
  0xf8   :  { %v139_v62 = vadd.f32 %v132_v60, %v24_v56  ;;  %v128_v63 = vpop.f32.mrb[1].mxu0  ;;  %v134_v0 = vpop.f32.mrb[1].mxu1  ;;  %v164_v2 = vadd.f32 %v157_v57, %v126_v59 }
  0xf9   :  { %v140_v1 = vadd.f32 %v134_v0, %v25_v58  ;;  %v165_v3 = vadd.f32 %v161_v61, %v128_v63 }
  0xfa   :  { %143 = vst [vmem:[#allocation2 + $0x10] sm:$0x3f] %v139_v62  ;;  %v168_v4 = vmax.f32 %v164_v2, 0.0 }
  0xfb   :  { %144 = vst [vmem:[#allocation2 + $0x18] sm:$0x3f] %v140_v1  ;;  %v169_v5 = vmax.f32 %v165_v3, 0.0 }
  0xfc   :  { %172 = vst [vmem:[%s370_s3] sm:$0xff] %v168_v4 }
  0xfd   :  { %173 = vst [vmem:[%s370_s3 + $0x8] sm:$0xff] %v169_v5 }
 0x101   :  { %v150_v6 = vld [vmem:[#allocation2 + $0x10] sm:$0x3f] }
 0x102   :  { %v166_v7 = vadd.f32 %v157_v57, %v150_v6  ;;  %v151_v8 = vld [vmem:[#allocation2 + $0x18] sm:$0x3f] }
 0x103   :  { %v167_v9 = vadd.f32 %v161_v61, %v151_v8 }
 0x104   :  { %v170_v10 = vmax.f32 %v166_v7, 0.0 }
 0x105   :  { %v171_v11 = vmax.f32 %v167_v9, 0.0 }
 0x106   :  { %174 = vst [vmem:[%s370_s3 + $0x10] sm:$0x3f] %v170_v10 }
 0x107   :  { %175 = vst [vmem:[%s370_s3 + $0x18] sm:$0x3f] %v171_v11 }

// kernel: bert_class_forward.27
= control target key start
LH: loop header
LB: loop body
LE: loop exit
PB: predicated region body
PF: predicated region fallthrough
CT: control target
= control target key end

     0   :  { %s558_s1 = inlined_call_operand.vmem [shape: bf16[256,128], index: 1, kind: input, shape index: {}]   ;;  %s559_s0 = inlined_call_operand.vmem [shape: bf16[64,256], index: 0, kind: input, shape index: {}]   ;;  %s560_s2 = inlined_call_operand.vmem [shape: f32[1,128], index: 2, kind: input, shape index: {}]   ;;  %s561_s3 = inlined_call_operand.vmem [shape: f32[64,128], index: 3, kind: output, shape index: {}]  }
   0x1   :  { %v411_v0 = vld [vmem:[%s558_s1 + $0x40] sm:$0xff]   ;;  %v413_v2 = vld [vmem:[%s558_s1 + $0x48] sm:$0xff]   ;;  %v415_v4 = vld [vmem:[%s558_s1 + $0x50] sm:$0xff]  }
   0x2   :  { %v412_v1 = vld [vmem:[%s558_s1] sm:$0xff]   ;;  %355 = vmatprep.subr.bf16.mxu0 %v411_v0  ;;  %395 = vmatprep.subr.bf16.mxu1 %v411_v0  ;;  %v414_v3 = vld [vmem:[%s558_s1 + $0x8] sm:$0xff]   ;;  %v416_v5 = vld [vmem:[%s558_s1 + $0x10] sm:$0xff]  }
   0x3   :  { %356 = vmatpush3.bf16.msra.mxu0 %v412_v1  ;;  %403 = vmatpush3.bf16.msra.mxu1 %v412_v1  ;;  %v417_v6 = vld [vmem:[%s558_s1 + $0x58] sm:$0xff]   ;;  %v419_v8 = vld [vmem:[%s558_s1 + $0x60] sm:$0xff]   ;;  %v421_v10 = vld [vmem:[%s558_s1 + $0x68] sm:$0xff]  }
   0x4   :  { %357 = vmatprep.subr.bf16.mxu0 %v413_v2  ;;  %396 = vmatprep.subr.bf16.mxu1 %v413_v2  ;;  %v418_v7 = vld [vmem:[%s558_s1 + $0x18] sm:$0xff]   ;;  %v420_v9 = vld [vmem:[%s558_s1 + $0x20] sm:$0xff]   ;;  %v422_v13 = vld [vmem:[%s558_s1 + $0x28] sm:$0xff]  }
   0x5   :  { %v429_v11 = vld [vmem:[%s559_s0 + $0x4] ss:$8 sps:$4 sm:$0xff]   ;;  %v423_v14 = vld [vmem:[%s558_s1 + $0x70] sm:$0xff]   ;;  %v425_v16 = vld [vmem:[%s558_s1 + $0x78] sm:$0xff]  }
   0x6   :  { %v432_v12 = vld [vmem:[%s559_s0 + $0x24] ss:$8 sps:$4 sm:$0xff]   ;;  %243 = vmatprep.mubr.bf16.mxu0 %v429_v11  ;;  %v424_v15 = vld [vmem:[%s558_s1 + $0x30] sm:$0xff]   ;;  %v426_v17 = vld [vmem:[%s558_s1 + $0x38] sm:$0xff]  }
   0x7   :  { %358 = vmatpush3.bf16.msra.mxu0 %v414_v3  ;;  %404 = vmatpush3.bf16.msra.mxu1 %v414_v3  ;;  %v427_v18 = vld [vmem:[%s559_s0] ss:$8 sps:$4 sm:$0xff]   ;;  %v433_v20 = vld [vmem:[%s559_s0 + $0x14] ss:$8 sps:$4 sm:$0xff]   ;;  %v437_v22 = vld [vmem:[%s559_s0 + $0x10] ss:$8 sps:$4 sm:$0xff]  }
   0x8   :  { %359 = vmatprep.subr.bf16.mxu0 %v415_v4  ;;  %397 = vmatprep.subr.bf16.mxu1 %v415_v4  ;;  %v430_v19 = vld [vmem:[%s559_s0 + $0x20] ss:$8 sps:$4 sm:$0xff]   ;;  %v435_v21 = vld [vmem:[%s559_s0 + $0x34] ss:$8 sps:$4 sm:$0xff]   ;;  %v438_v23 = vld [vmem:[%s559_s0 + $0x30] ss:$8 sps:$4 sm:$0xff]  }
   0x9   :  { %259 = vmatprep.mubr.bf16.mxu1 %v432_v12  ;;  %v354_v27 = vld [vmem:[%s560_s2] ss:$0 sm:$0xff] }
   0xb   :  { %360 = vmatpush3.bf16.msra.mxu0 %v416_v5  ;;  %405 = vmatpush3.bf16.msra.mxu1 %v416_v5 }
   0xc   :  { %361 = vmatprep.subr.bf16.mxu0 %v417_v6  ;;  %398 = vmatprep.subr.bf16.mxu1 %v417_v6 }
   0xf   :  { %362 = vmatpush3.bf16.msra.mxu0 %v418_v7  ;;  %406 = vmatpush3.bf16.msra.mxu1 %v418_v7 }
  0x10   :  { %363 = vmatprep.subr.bf16.mxu0 %v419_v8  ;;  %399 = vmatprep.subr.bf16.mxu1 %v419_v8 }
  0x13   :  { %364 = vmatpush3.bf16.msra.mxu0 %v420_v9  ;;  %407 = vmatpush3.bf16.msra.mxu1 %v420_v9 }
  0x14   :  { %365 = vmatprep.subr.bf16.mxu0 %v421_v10  ;;  %400 = vmatprep.subr.bf16.mxu1 %v421_v10 }
  0x17   :  { %366 = vmatpush3.bf16.msra.mxu0 %v422_v13  ;;  %408 = vmatpush3.bf16.msra.mxu1 %v422_v13 }
  0x18   :  { %367 = vmatprep.subr.bf16.mxu0 %v423_v14  ;;  %401 = vmatprep.subr.bf16.mxu1 %v423_v14 }
  0x1b   :  { %368 = vmatpush3.bf16.msra.mxu0 %v424_v15  ;;  %409 = vmatpush3.bf16.msra.mxu1 %v424_v15 }
  0x1c   :  { %369 = vmatprep.subr.bf16.mxu0 %v425_v16  ;;  %402 = vmatprep.subr.bf16.mxu1 %v425_v16 }
  0x1f   :  { %370 = vmatpush3.bf16.msra.mxu0 %v426_v17  ;;  %410 = vmatpush3.bf16.msra.mxu1 %v426_v17 }
  0x22   :  { %244 = vmatmul.mubr.bf16.vlgmr.msra.gmra.mrb[0].mxu0 %v427_v18  ;;  %260 = vmatmul.mubr.bf16.vlgmr.msra.gmra.mrb[0].mxu1 %v430_v19 }
  0x23   :  { %251 = vmatprep.mubr.bf16.mxu0 %v433_v20  ;;  %267 = vmatprep.mubr.bf16.mxu1 %v435_v21 }
  0x2a   :  { %252 = vmatmul.mubr.bf16.gmra.mrb[4].mxu0 %v437_v22  ;;  %268 = vmatmul.mubr.bf16.gmra.mrb[4].mxu1 %v438_v23 }
  0xf5   :  { %v371_v24 = vpop.f32.mrb[0].mxu0  ;;  %v383_v25 = vpop.f32.mrb[0].mxu1 }
  0xf6   :  { %v372_v26 = vpop.f32.mrb[1].mxu0  ;;  %v384_v28 = vpop.f32.mrb[1].mxu1 }
  0xf7   :  { %v373_v29 = vadd.f32 %v372_v26, %v371_v24  ;;  %v385_v30 = vadd.f32 %v384_v28, %v383_v25  ;;  %v374_v31 = vpop.f32.mrb[2].mxu0  ;;  %v386_v32 = vpop.f32.mrb[2].mxu1 }
  0xf8   :  { %v375_v33 = vpop.f32.mrb[3].mxu0  ;;  %v387_v34 = vpop.f32.mrb[3].mxu1 }
  0xf9   :  { %v310_v35 = vadd.f32 %v373_v29, %v354_v27  ;;  %v314_v36 = vadd.f32 %v385_v30, %v354_v27  ;;  %v376_v37 = vadd.f32 %v375_v33, %v374_v31  ;;  %v388_v38 = vadd.f32 %v387_v34, %v386_v32 }
  0xfb   :  { %318 = vst [vmem:[%s561_s3] sm:$0xff] %v310_v35  ;;  %322 = vst [vmem:[%s561_s3 + $0x20] sm:$0xff] %v314_v36  ;;  %v311_v39 = vadd.f32 %v376_v37, %v354_v27  ;;  %v315_v40 = vadd.f32 %v388_v38, %v354_v27 }
  0xfd   :  { %319 = vst [vmem:[%s561_s3 + $0x8] sm:$0xff] %v311_v39  ;;  %323 = vst [vmem:[%s561_s3 + $0x28] sm:$0xff] %v315_v40  ;;  %v377_v41 = vpop.f32.mrb[4].mxu0  ;;  %v389_v42 = vpop.f32.mrb[4].mxu1 }
  0xfe   :  { %v378_v43 = vpop.f32.mrb[5].mxu0  ;;  %v390_v44 = vpop.f32.mrb[5].mxu1 }
  0xff   :  { %v379_v45 = vadd.f32 %v378_v43, %v377_v41  ;;  %v391_v46 = vadd.f32 %v390_v44, %v389_v42  ;;  %v380_v47 = vpop.f32.mrb[6].mxu0  ;;  %v392_v48 = vpop.f32.mrb[6].mxu1 }
 0x100   :  { %v381_v49 = vpop.f32.mrb[7].mxu0  ;;  %v393_v50 = vpop.f32.mrb[7].mxu1 }
 0x101   :  { %v312_v51 = vadd.f32 %v379_v45, %v354_v27  ;;  %v316_v52 = vadd.f32 %v391_v46, %v354_v27  ;;  %v382_v53 = vadd.f32 %v381_v49, %v380_v47  ;;  %v394_v54 = vadd.f32 %v393_v50, %v392_v48 }
 0x103   :  { %320 = vst [vmem:[%s561_s3 + $0x10] sm:$0xff] %v312_v51  ;;  %324 = vst [vmem:[%s561_s3 + $0x30] sm:$0xff] %v316_v52  ;;  %v313_v55 = vadd.f32 %v382_v53, %v354_v27  ;;  %v317_v56 = vadd.f32 %v394_v54, %v354_v27 }
 0x105   :  { %321 = vst [vmem:[%s561_s3 + $0x18] sm:$0xff] %v313_v55  ;;  %325 = vst [vmem:[%s561_s3 + $0x38] sm:$0xff] %v317_v56 }

</bundles_post_ra>
